<compile_context>
chip_gen: v6e
topology: v6e:2x2x1
jax: 0.10.0
libtpu: 0.0.40
codegen_flags: <defaults>
</compile_context>

<pallas_src>
import jax
import jax.numpy as jnp
from jax.experimental import pallas as pl
from jax.experimental.pallas import tpu as pltpu


# ----------------------------------------------------------------------------- 
# Kernel
# ----------------------------------------------------------------------------- 
def _make_upblock_kernel(h_out, w_out, lanes, compute_dtype):
    """Builds the fused per-sample kernel (static spatial sizes closed over)."""
    hp, wp = h_out + 2, w_out + 2
    hpwp = hp * wp
    hw = h_out * w_out
    # Centered 3x3 tap shifts in the flat padded layout: the conv output for the
    # interior position p = (oh+1)*wp + (ow+1) reads the padded image at
    # p + (dy-1)*wp + (dx-1).
    shifts = tuple((dy - 1) * wp + (dx - 1) for dy in range(3) for dx in range(3))

    def lane_shift(v, s):
        # out[:, p] = v[:, (p + s) % lanes] for a static s.  Only lanes whose
        # read does not wrap are consumed downstream (the rest are masked), so
        # the circular semantics never matter.  Implemented as two lane slices
        # + one concat on a 128-aligned lane dim; pltpu.roll (XLU slot) is the
        # drop-in alternative if these copies show up in profiles.
        k = s % lanes
        if k == 0:
            return v
        return jnp.concatenate([v[:, k:], v[:, :k]], axis=1)

    def kernel(x_ref, k1t_ref, w1_ref, w2_ref, gmat_ref, gn_ref, mask_ref,
               out_ref):
        f32 = jnp.float32
        cout = out_ref.shape[1]
        mask = mask_ref[...]                                 # (1, lanes) f32

        # ---- Stage 0: bilinear 2x upsample + zero pad as ONE MXU matmul ------
        xp = jnp.dot(x_ref[0], k1t_ref[...],
                     preferred_element_type=f32)             # (cin, lanes) f32
        xp = xp.astype(compute_dtype)

        def conv3x3(p, w_taps_ref):
            """3x3 conv on the flat padded layout: 9 lane-shifts feeding 9
            accumulated (Cout, C) @ (C, lanes) matmuls (bf16 in, f32 acc)."""
            acc = None
            for t, s in enumerate(shifts):
                d = jnp.dot(w_taps_ref[t], lane_shift(p, s),
                            preferred_element_type=f32)      # (cout, lanes)
                acc = d if acc is None else acc + d
            return acc

        def gn_gelu(acc, gamma, beta):
            """GroupNorm (one-pass masked stats, group combine as a single
            (Cout,Cout)@(Cout,2) matmul) + exact-erf GELU, all in f32."""
            accm = acc * mask                                # zero pad/garbage
            ch_sum = jnp.sum(accm, axis=1, keepdims=True)    # (cout, 1)
            ch_ssq = jnp.sum(accm * accm, axis=1, keepdims=True)
            stats = jnp.concatenate([ch_sum, ch_ssq], axis=1)            # (cout, 2)
            gstats = jnp.dot(gmat_ref[...], stats,
                             preferred_element_type=f32)     # group means
            mean = gstats[:, 0:1]
            var = jnp.maximum(gstats[:, 1:2] - mean * mean, 0.0)
            scale = gamma * jax.lax.rsqrt(var + 1e-5)
            shift = beta - mean * scale
            y = accm * scale + shift
            # exact GELU (matches torch.nn.GELU() default erf form)
            y = 0.5 * y * (1.0 + jax.lax.erf(y * 0.7071067811865476))
            # Re-zero the pad ring: this is directly the zero-padded input of
            # the next rolled conv (no inter-stage re-layout / HBM round trip).
            return y * mask

        gn = gn_ref[...]                                     # (cout, 4) f32
        y1 = gn_gelu(conv3x3(xp, w1_ref), gn[:, 0:1], gn[:, 1:2])
        y2 = gn_gelu(conv3x3(y1.astype(compute_dtype), w2_ref),
                     gn[:, 2:3], gn[:, 3:4])

        # ---- Extract the interior pixels, store lane-dense NCHW-flat ---------
        out = y2[:, :hpwp].reshape(cout, hp, wp)[:, 1:1 + h_out, 1:1 + w_out]
        out_ref[...] = out.reshape(1, cout, hw).astype(out_ref.dtype)

    return kernel


# ----------------------------------------------------------------------------- 
# Wrapper
# ----------------------------------------------------------------------------- 
def _bilinear_pad_matrix(in_size, out_size):
    """(out_size+2, in_size) matrix whose interior rows are align_corners=True
    bilinear weights (identity when in_size == out_size) and whose first/last
    rows are zero, so it also implements the conv's zero padding."""
    if in_size == 1:
        body = jnp.ones((out_size, 1), jnp.float32)
    else:
        src = jnp.arange(out_size, dtype=jnp.float32) * (
            (in_size - 1) / max(out_size - 1, 1))
        i0 = jnp.clip(jnp.floor(src).astype(jnp.int32), 0, in_size - 1)
        i1 = jnp.clip(i0 + 1, 0, in_size - 1)
        f = (src - i0.astype(jnp.float32))[:, None]
        body = (jax.nn.one_hot(i0, in_size, dtype=jnp.float32) * (1.0 - f)
                + jax.nn.one_hot(i1, in_size, dtype=jnp.float32) * f)
    z = jnp.zeros((1, in_size), jnp.float32)
    return jnp.concatenate([z, body, z], axis=0)


def _pick_vmem_limit():
    """Per-generation VMEM limit: ~48 MiB on v7x (64 MiB/TC physical), ~100 MiB
    on v5e/v6e (128 MiB physical)."""
    try:
        cap = int(pltpu.get_tpu_info().vmem_capacity_bytes)
    except Exception:
        cap = 64 * 1024 * 1024
    return int(min(max(cap - 16 * 1024 * 1024, 32 * 1024 * 1024),
                   100 * 1024 * 1024))


def up_block_forward(x_nchw, params, compute_dtype=jnp.bfloat16):
    """UpBlock forward (NCHW in / NCHW out), matching the PyTorch module."""
    n, cin, h_in, w_in = x_nchw.shape
    cout = params["w1"].shape[0]
    groups = params["groups"]
    assert cout % groups == 0, "GroupNorm requires Cout % groups == 0"
    cg = cout // groups

    h_out, w_out = 2 * h_in, 2 * w_in
    hp, wp = h_out + 2, w_out + 2
    hpwp, hw = hp * wp, h_out * w_out
    hinwin = h_in * w_in
    lanes = ((hpwp + 127) // 128) * 128          # 128-aligned flat padded layout

    # Lane-dense flattened input (NCHW is contiguous -> free reshape).
    x_flat = x_nchw.reshape(n, cin, hinwin).astype(compute_dtype)

    # Fused "upsample + zero-pad" Kronecker matrix, lane-padded to `lanes`.
    rhp = _bilinear_pad_matrix(h_in, h_out)                    # (hp, h_in)
    rwp = _bilinear_pad_matrix(w_in, w_out)                    # (wp, w_in)
    k1t = jnp.pad(jnp.kron(rhp, rwp).T,
                  ((0, 0), (0, lanes - hpwp))).astype(compute_dtype)

    # Conv weights folded per tap, t = dy*3 + dx: (9, Cout, C).
    w1t = jnp.transpose(params["w1"], (2, 3, 0, 1)).reshape(
        9, cout, cin).astype(compute_dtype)
    w2t = jnp.transpose(params["w2"], (2, 3, 0, 1)).reshape(
        9, cout, cout).astype(compute_dtype)

    # Group-mean matrix: gmat @ per-channel [sum, sumsq] -> per-group means.
    gid = jnp.arange(cout) // cg
    gmat = (gid[:, None] == gid[None, :]).astype(jnp.float32) / float(cg * hw)

    # GN affine params packed as (Cout, 4) = [gamma1, beta1, gamma2, beta2].
    gnp = jnp.stack([params["g1"], params["b1"], params["g2"], params["b2"]],
                    axis=1).astype(jnp.float32)

    # Interior (valid-output) mask in the flat padded layout.
    mh = (jnp.arange(hp) >= 1) & (jnp.arange(hp) <= h_out)
    mw = (jnp.arange(wp) >= 1) & (jnp.arange(wp) <= w_out)
    mask = jnp.pad((mh[:, None] & mw[None, :]).reshape(1, hpwp),
                   ((0, 0), (0, lanes - hpwp))).astype(jnp.float32)

    kernel = _make_upblock_kernel(h_out, w_out, lanes, compute_dtype)

    itemsize = jnp.dtype(compute_dtype).itemsize
    flops = 2 * n * lanes * (cin * hinwin + 9 * cout * cin + 9 * cout * cout)
    bytes_accessed = int(
        (x_flat.size + k1t.size + w1t.size + w2t.size) * itemsize
        + (gmat.size + gnp.size + mask.size) * 4
        + n * cout * hw * 4)
    cost = pl.CostEstimate(flops=int(flops),
                           transcendentals=int(2 * n * cout * lanes),
                           bytes_accessed=bytes_accessed)

    out = pl.pallas_call(
        kernel,
        out_shape=jax.ShapeDtypeStruct((n, cout, hw), jnp.float32),
        grid=(n,),
        in_specs=[
            pl.BlockSpec((1, cin, hinwin), lambda b: (b, 0, 0)),   # x (per sample)
            pl.BlockSpec((hinwin, lanes), lambda b: (0, 0)),       # upsample+pad
            pl.BlockSpec((9, cout, cin), lambda b: (0, 0, 0)),     # conv1 taps
            pl.BlockSpec((9, cout, cout), lambda b: (0, 0, 0)),    # conv2 taps
            pl.BlockSpec((cout, cout), lambda b: (0, 0)),          # group-mean mat
            pl.BlockSpec((cout, 4), lambda b: (0, 0)),             # GN affine
            pl.BlockSpec((1, lanes), lambda b: (0, 0)),            # interior mask
        ],
        out_specs=pl.BlockSpec((1, cout, hw), lambda b: (b, 0, 0)),
        compiler_params=pltpu.CompilerParams(
            dimension_semantics=("parallel",),
            vmem_limit_bytes=_pick_vmem_limit()),
        cost_estimate=cost,
    )(x_flat, k1t, w1t, w2t, gmat, gnp, mask)

    # Metadata-only reshape back to NCHW.
    return out.reshape(n, cout, h_out, w_out)


# ----------------------------------------------------------------------------- 
# Params + pure-JAX reference
# ----------------------------------------------------------------------------- 
def make_params(key, in_channels, out_channels):
    """Parameters in the PyTorch layout (Conv2d OIHW, bias=False; GN affine)."""
    k1, k2 = jax.random.split(key)
    return {
        "w1": 0.1 * jax.random.normal(k1, (out_channels, in_channels, 3, 3),
                                      jnp.float32),
        "w2": 0.1 * jax.random.normal(k2, (out_channels, out_channels, 3, 3),
                                      jnp.float32),
        "g1": jnp.ones((out_channels,), jnp.float32),
        "b1": jnp.zeros((out_channels,), jnp.float32),
        "g2": jnp.ones((out_channels,), jnp.float32),
        "b2": jnp.zeros((out_channels,), jnp.float32),
        "groups": min(8, out_channels),
    }


def _reference_upblock(x, params):
    """Pure-JAX reference (gather upsample, lax.conv, two-pass GN)."""

    def upsample2x_align_corners(xx):
        _, _, hi, wi = xx.shape
        ho, wo = 2 * hi, 2 * wi

        def coords(isz, osz):
            src = jnp.arange(osz, dtype=jnp.float32) * ((isz - 1) / (osz - 1))
            i0 = jnp.clip(jnp.floor(src).astype(jnp.int32), 0, isz - 1)
            i1 = jnp.clip(i0 + 1, 0, isz - 1)
            return i0, i1, src - i0.astype(jnp.float32)

        h0, h1, hf = coords(hi, ho)
        w0, w1, wf = coords(wi, wo)
        xh = (xx[:, :, h0, :] * (1.0 - hf)[None, None, :, None]
              + xx[:, :, h1, :] * hf[None, None, :, None])
        return (xh[:, :, :, w0] * (1.0 - wf)[None, None, None, :]
                + xh[:, :, :, w1] * wf[None, None, None, :])

    def conv3x3(xx, w_oihw):
        return jax.lax.conv_general_dilated(
            xx, w_oihw, window_strides=(1, 1), padding=((1, 1), (1, 1)),
            dimension_numbers=("NCHW", "OIHW", "NCHW"))

    def group_norm(xx, gamma, beta, groups):
        n_, c_, h_, w_ = xx.shape
        xg = xx.reshape(n_, groups, c_ // groups, h_, w_)
        m = jnp.mean(xg, axis=(2, 3, 4), keepdims=True)
        v = jnp.mean((xg - m) ** 2, axis=(2, 3, 4), keepdims=True)
        xn = ((xg - m) / jnp.sqrt(v + 1e-5)).reshape(n_, c_, h_, w_)
        return xn * gamma[None, :, None, None] + beta[None, :, None, None]

    def gelu(xx):
        return 0.5 * xx * (1.0 + jax.lax.erf(xx * 0.7071067811865476))

    g = params["groups"]
    y = upsample2x_align_corners(x)
    y = gelu(group_norm(conv3x3(y, params["w1"]), params["g1"], params["b1"], g))
    y = gelu(group_norm(conv3x3(y, params["w2"]), params["g2"], params["b2"], g))
    return y


# ----------------------------------------------------------------------------- 
# Self-test
# ----------------------------------------------------------------------------- 
if __name__ == "__main__":
    key = jax.random.PRNGKey(0)
    k_x, k_p = jax.random.split(key)

    batch, in_channels, out_channels, spatial = 2, 4, 8, 16
    x = jax.random.normal(k_x, (batch, in_channels, spatial, spatial),
                          jnp.float32)  # NCHW, like the PyTorch module
    params = make_params(k_p, in_channels, out_channels)

    ref = _reference_upblock(x, params)
    expected_shape = (batch, out_channels, 2 * spatial, 2 * spatial)

    # Tight check of the fused algorithm (Kron resample, shifted-tap conv,
    # one-pass GN) with f32 matmul operands.
    out_f32 = jax.block_until_ready(
        up_block_forward(x, params, compute_dtype=jnp.float32))
    assert out_f32.shape == expected_shape, (out_f32.shape, expected_shape)
    err_f32 = float(jnp.max(jnp.abs(out_f32 - ref)))
    assert err_f32 < 1e-3, f"f32 path mismatch vs reference: {err_f32}"

    # Performance default: bf16 MXU operands (f32 accumulation) -> looser
    # tolerance purely from the deliberate bf16 cast, not from the algorithm.
    out = jax.block_until_ready(up_block_forward(x, params))
    assert out.shape == expected_shape, (out.shape, expected_shape)
    assert bool(jnp.all(jnp.isfinite(out)))
    err_bf16 = float(jnp.max(jnp.abs(out - ref)))
    assert err_bf16 < 1e-1, f"bf16 path mismatch vs reference: {err_bf16}"

    print("KERNEL_OK")
</pallas_src>

<mosaic_0001>
module attributes {stable_mosaic.version = 11 : i64} {
  func.func @kernel(%arg0: i32, %arg1: memref<1x4x256xf32, #tpu.memory_space<vmem>>, %arg2: memref<256x1280xf32, #tpu.memory_space<vmem>>, %arg3: memref<9x8x4xf32, #tpu.memory_space<vmem>>, %arg4: memref<9x8x8xf32, #tpu.memory_space<vmem>>, %arg5: memref<8x8xf32, #tpu.memory_space<vmem>>, %arg6: memref<8x4xf32, #tpu.memory_space<vmem>>, %arg7: memref<1x1280xf32, #tpu.memory_space<vmem>>, %arg8: memref<1x8x1024xf32, #tpu.memory_space<vmem>>) attributes {dimension_semantics = [#tpu.dimension_semantics<parallel>], iteration_bounds = array<i64: 2>, scalar_prefetch = 0 : i64, scratch_operands = 0 : i64, tpu.core_type = #tpu.core_type<tc>, window_params = [{transform_indices = @transform_0, window_bounds = array<i64: 1, 4, 256>}, {pipeline_mode = #tpu.pipeline_mode<synchronous>, transform_indices = @transform_1, window_bounds = array<i64: 256, 1280>}, {pipeline_mode = #tpu.pipeline_mode<synchronous>, transform_indices = @transform_2, window_bounds = array<i64: 9, 8, 4>}, {pipeline_mode = #tpu.pipeline_mode<synchronous>, transform_indices = @transform_3, window_bounds = array<i64: 9, 8, 8>}, {pipeline_mode = #tpu.pipeline_mode<synchronous>, transform_indices = @transform_4, window_bounds = array<i64: 8, 8>}, {pipeline_mode = #tpu.pipeline_mode<synchronous>, transform_indices = @transform_5, window_bounds = array<i64: 8, 4>}, {pipeline_mode = #tpu.pipeline_mode<synchronous>, transform_indices = @transform_6, window_bounds = array<i64: 1, 1280>}, {transform_indices = @transform_7, window_bounds = array<i64: 1, 8, 1024>}]} {
    %c0 = arith.constant 0 : index
    %c0_0 = arith.constant 0 : index
    %0 = vector.load %arg7[%c0, %c0_0] : memref<1x1280xf32, #tpu.memory_space<vmem>>, vector<1x1280xf32>
    %c0_1 = arith.constant 0 : index
    %c0_2 = arith.constant 0 : index
    %c0_3 = arith.constant 0 : index
    %1 = vector.load %arg1[%c0_1, %c0_2, %c0_3] : memref<1x4x256xf32, #tpu.memory_space<vmem>>, vector<1x4x256xf32>
    %2 = vector.shape_cast %1 : vector<1x4x256xf32> to vector<4x256xf32>
    %c0_4 = arith.constant 0 : index
    %c0_5 = arith.constant 0 : index
    %3 = vector.load %arg2[%c0_4, %c0_5] : memref<256x1280xf32, #tpu.memory_space<vmem>>, vector<256x1280xf32>
    %cst = arith.constant dense<0.000000e+00> : vector<4x1280xf32>
    %4 = tpu.matmul %2, %3, %cst {dimension_numbers = #tpu.dot_dimension_numbers<[1], [0], [0], [1], [0, 0, 1, 1], [], []>} : vector<4x256xf32>, vector<256x1280xf32>, vector<4x1280xf32> -> vector<4x1280xf32>
    %c0_6 = arith.constant 0 : index
    %c0_7 = arith.constant 0 : index
    %5 = vector.load %arg6[%c0_6, %c0_7] : memref<8x4xf32, #tpu.memory_space<vmem>>, vector<8x4xf32>
    %c0_8 = arith.constant 0 : index
    %c0_9 = arith.constant 0 : index
    %c0_10 = arith.constant 0 : index
    %6 = vector.load %arg3[%c0_8, %c0_9, %c0_10] : memref<9x8x4xf32, #tpu.memory_space<vmem>>, vector<1x8x4xf32>
    %7 = vector.shape_cast %6 : vector<1x8x4xf32> to vector<8x4xf32>
    %8 = vector.extract_strided_slice %4 {offsets = [0, 1245], sizes = [4, 35], strides = [1, 1]} : vector<4x1280xf32> to vector<4x35xf32>
    %9 = vector.extract_strided_slice %4 {offsets = [0, 0], sizes = [4, 1245], strides = [1, 1]} : vector<4x1280xf32> to vector<4x1245xf32>
    %10 = tpu.concatenate %8, %9 in 1 : vector<4x35xf32>, vector<4x1245xf32> -> vector<4x1280xf32>
    %cst_11 = arith.constant dense<0.000000e+00> : vector<8x1280xf32>
    %11 = tpu.matmul %7, %10, %cst_11 {dimension_numbers = #tpu.dot_dimension_numbers<[1], [0], [0], [1], [0, 0, 1, 1], [], []>} : vector<8x4xf32>, vector<4x1280xf32>, vector<8x1280xf32> -> vector<8x1280xf32>
    %c1 = arith.constant 1 : index
    %c0_12 = arith.constant 0 : index
    %c0_13 = arith.constant 0 : index
    %12 = vector.load %arg3[%c1, %c0_12, %c0_13] : memref<9x8x4xf32, #tpu.memory_space<vmem>>, vector<1x8x4xf32>
    %13 = vector.shape_cast %12 : vector<1x8x4xf32> to vector<8x4xf32>
    %14 = vector.extract_strided_slice %4 {offsets = [0, 1246], sizes = [4, 34], strides = [1, 1]} : vector<4x1280xf32> to vector<4x34xf32>
    %15 = vector.extract_strided_slice %4 {offsets = [0, 0], sizes = [4, 1246], strides = [1, 1]} : vector<4x1280xf32> to vector<4x1246xf32>
    %16 = tpu.concatenate %14, %15 in 1 : vector<4x34xf32>, vector<4x1246xf32> -> vector<4x1280xf32>
    %cst_14 = arith.constant dense<0.000000e+00> : vector<8x1280xf32>
    %17 = tpu.matmul %13, %16, %cst_14 {dimension_numbers = #tpu.dot_dimension_numbers<[1], [0], [0], [1], [0, 0, 1, 1], [], []>} : vector<8x4xf32>, vector<4x1280xf32>, vector<8x1280xf32> -> vector<8x1280xf32>
    %18 = arith.addf %11, %17 : vector<8x1280xf32>
    %c2 = arith.constant 2 : index
    %c0_15 = arith.constant 0 : index
    %c0_16 = arith.constant 0 : index
    %19 = vector.load %arg3[%c2, %c0_15, %c0_16] : memref<9x8x4xf32, #tpu.memory_space<vmem>>, vector<1x8x4xf32>
    %20 = vector.shape_cast %19 : vector<1x8x4xf32> to vector<8x4xf32>
    %21 = vector.extract_strided_slice %4 {offsets = [0, 1247], sizes = [4, 33], strides = [1, 1]} : vector<4x1280xf32> to vector<4x33xf32>
    %22 = vector.extract_strided_slice %4 {offsets = [0, 0], sizes = [4, 1247], strides = [1, 1]} : vector<4x1280xf32> to vector<4x1247xf32>
    %23 = tpu.concatenate %21, %22 in 1 : vector<4x33xf32>, vector<4x1247xf32> -> vector<4x1280xf32>
    %cst_17 = arith.constant dense<0.000000e+00> : vector<8x1280xf32>
    %24 = tpu.matmul %20, %23, %cst_17 {dimension_numbers = #tpu.dot_dimension_numbers<[1], [0], [0], [1], [0, 0, 1, 1], [], []>} : vector<8x4xf32>, vector<4x1280xf32>, vector<8x1280xf32> -> vector<8x1280xf32>
    %25 = arith.addf %18, %24 : vector<8x1280xf32>
    %c3 = arith.constant 3 : index
    %c0_18 = arith.constant 0 : index
    %c0_19 = arith.constant 0 : index
    %26 = vector.load %arg3[%c3, %c0_18, %c0_19] : memref<9x8x4xf32, #tpu.memory_space<vmem>>, vector<1x8x4xf32>
    %27 = vector.shape_cast %26 : vector<1x8x4xf32> to vector<8x4xf32>
    %28 = vector.extract_strided_slice %4 {offsets = [0, 1279], sizes = [4, 1], strides = [1, 1]} : vector<4x1280xf32> to vector<4x1xf32>
    %29 = vector.extract_strided_slice %4 {offsets = [0, 0], sizes = [4, 1279], strides = [1, 1]} : vector<4x1280xf32> to vector<4x1279xf32>
    %30 = tpu.concatenate %28, %29 in 1 : vector<4x1xf32>, vector<4x1279xf32> -> vector<4x1280xf32>
    %cst_20 = arith.constant dense<0.000000e+00> : vector<8x1280xf32>
    %31 = tpu.matmul %27, %30, %cst_20 {dimension_numbers = #tpu.dot_dimension_numbers<[1], [0], [0], [1], [0, 0, 1, 1], [], []>} : vector<8x4xf32>, vector<4x1280xf32>, vector<8x1280xf32> -> vector<8x1280xf32>
    %32 = arith.addf %25, %31 : vector<8x1280xf32>
    %c4 = arith.constant 4 : index
    %c0_21 = arith.constant 0 : index
    %c0_22 = arith.constant 0 : index
    %33 = vector.load %arg3[%c4, %c0_21, %c0_22] : memref<9x8x4xf32, #tpu.memory_space<vmem>>, vector<1x8x4xf32>
    %34 = vector.shape_cast %33 : vector<1x8x4xf32> to vector<8x4xf32>
    %cst_23 = arith.constant dense<0.000000e+00> : vector<8x1280xf32>
    %35 = tpu.matmul %34, %4, %cst_23 {dimension_numbers = #tpu.dot_dimension_numbers<[1], [0], [0], [1], [0, 0, 1, 1], [], []>} : vector<8x4xf32>, vector<4x1280xf32>, vector<8x1280xf32> -> vector<8x1280xf32>
    %36 = arith.addf %32, %35 : vector<8x1280xf32>
    %c5 = arith.constant 5 : index
    %c0_24 = arith.constant 0 : index
    %c0_25 = arith.constant 0 : index
    %37 = vector.load %arg3[%c5, %c0_24, %c0_25] : memref<9x8x4xf32, #tpu.memory_space<vmem>>, vector<1x8x4xf32>
    %38 = vector.shape_cast %37 : vector<1x8x4xf32> to vector<8x4xf32>
    %39 = vector.extract_strided_slice %4 {offsets = [0, 1], sizes = [4, 1279], strides = [1, 1]} : vector<4x1280xf32> to vector<4x1279xf32>
    %40 = vector.extract_strided_slice %4 {offsets = [0, 0], sizes = [4, 1], strides = [1, 1]} : vector<4x1280xf32> to vector<4x1xf32>
    %41 = tpu.concatenate %39, %40 in 1 : vector<4x1279xf32>, vector<4x1xf32> -> vector<4x1280xf32>
    %cst_26 = arith.constant dense<0.000000e+00> : vector<8x1280xf32>
    %42 = tpu.matmul %38, %41, %cst_26 {dimension_numbers = #tpu.dot_dimension_numbers<[1], [0], [0], [1], [0, 0, 1, 1], [], []>} : vector<8x4xf32>, vector<4x1280xf32>, vector<8x1280xf32> -> vector<8x1280xf32>
    %43 = arith.addf %36, %42 : vector<8x1280xf32>
    %c6 = arith.constant 6 : index
    %c0_27 = arith.constant 0 : index
    %c0_28 = arith.constant 0 : index
    %44 = vector.load %arg3[%c6, %c0_27, %c0_28] : memref<9x8x4xf32, #tpu.memory_space<vmem>>, vector<1x8x4xf32>
    %45 = vector.shape_cast %44 : vector<1x8x4xf32> to vector<8x4xf32>
    %46 = vector.extract_strided_slice %4 {offsets = [0, 33], sizes = [4, 1247], strides = [1, 1]} : vector<4x1280xf32> to vector<4x1247xf32>
    %47 = vector.extract_strided_slice %4 {offsets = [0, 0], sizes = [4, 33], strides = [1, 1]} : vector<4x1280xf32> to vector<4x33xf32>
    %48 = tpu.concatenate %46, %47 in 1 : vector<4x1247xf32>, vector<4x33xf32> -> vector<4x1280xf32>
    %cst_29 = arith.constant dense<0.000000e+00> : vector<8x1280xf32>
    %49 = tpu.matmul %45, %48, %cst_29 {dimension_numbers = #tpu.dot_dimension_numbers<[1], [0], [0], [1], [0, 0, 1, 1], [], []>} : vector<8x4xf32>, vector<4x1280xf32>, vector<8x1280xf32> -> vector<8x1280xf32>
    %50 = arith.addf %43, %49 : vector<8x1280xf32>
    %c7 = arith.constant 7 : index
    %c0_30 = arith.constant 0 : index
    %c0_31 = arith.constant 0 : index
    %51 = vector.load %arg3[%c7, %c0_30, %c0_31] : memref<9x8x4xf32, #tpu.memory_space<vmem>>, vector<1x8x4xf32>
    %52 = vector.shape_cast %51 : vector<1x8x4xf32> to vector<8x4xf32>
    %53 = vector.extract_strided_slice %4 {offsets = [0, 34], sizes = [4, 1246], strides = [1, 1]} : vector<4x1280xf32> to vector<4x1246xf32>
    %54 = vector.extract_strided_slice %4 {offsets = [0, 0], sizes = [4, 34], strides = [1, 1]} : vector<4x1280xf32> to vector<4x34xf32>
    %55 = tpu.concatenate %53, %54 in 1 : vector<4x1246xf32>, vector<4x34xf32> -> vector<4x1280xf32>
    %cst_32 = arith.constant dense<0.000000e+00> : vector<8x1280xf32>
    %56 = tpu.matmul %52, %55, %cst_32 {dimension_numbers = #tpu.dot_dimension_numbers<[1], [0], [0], [1], [0, 0, 1, 1], [], []>} : vector<8x4xf32>, vector<4x1280xf32>, vector<8x1280xf32> -> vector<8x1280xf32>
    %57 = arith.addf %50, %56 : vector<8x1280xf32>
    %c8 = arith.constant 8 : index
    %c0_33 = arith.constant 0 : index
    %c0_34 = arith.constant 0 : index
    %58 = vector.load %arg3[%c8, %c0_33, %c0_34] : memref<9x8x4xf32, #tpu.memory_space<vmem>>, vector<1x8x4xf32>
    %59 = vector.shape_cast %58 : vector<1x8x4xf32> to vector<8x4xf32>
    %60 = vector.extract_strided_slice %4 {offsets = [0, 35], sizes = [4, 1245], strides = [1, 1]} : vector<4x1280xf32> to vector<4x1245xf32>
    %61 = vector.extract_strided_slice %4 {offsets = [0, 0], sizes = [4, 35], strides = [1, 1]} : vector<4x1280xf32> to vector<4x35xf32>
    %62 = tpu.concatenate %60, %61 in 1 : vector<4x1245xf32>, vector<4x35xf32> -> vector<4x1280xf32>
    %cst_35 = arith.constant dense<0.000000e+00> : vector<8x1280xf32>
    %63 = tpu.matmul %59, %62, %cst_35 {dimension_numbers = #tpu.dot_dimension_numbers<[1], [0], [0], [1], [0, 0, 1, 1], [], []>} : vector<8x4xf32>, vector<4x1280xf32>, vector<8x1280xf32> -> vector<8x1280xf32>
    %64 = arith.addf %57, %63 : vector<8x1280xf32>
    %65 = vector.extract_strided_slice %5 {offsets = [0, 0], sizes = [8, 1], strides = [1, 1]} : vector<8x4xf32> to vector<8x1xf32>
    %66 = vector.extract_strided_slice %5 {offsets = [0, 1], sizes = [8, 1], strides = [1, 1]} : vector<8x4xf32> to vector<8x1xf32>
    %67 = vector.broadcast %0 : vector<1x1280xf32> to vector<8x1280xf32>
    %68 = arith.mulf %64, %67 : vector<8x1280xf32>
    %cst_36 = arith.constant dense<0.000000e+00> : vector<8xf32>
    %69 = vector.multi_reduction <add>, %68, %cst_36 [1] : vector<8x1280xf32> to vector<8xf32>
    %70 = vector.shape_cast %69 : vector<8xf32> to vector<8x1xf32>
    %71 = arith.mulf %68, %68 : vector<8x1280xf32>
    %cst_37 = arith.constant dense<0.000000e+00> : vector<8xf32>
    %72 = vector.multi_reduction <add>, %71, %cst_37 [1] : vector<8x1280xf32> to vector<8xf32>
    %73 = vector.shape_cast %72 : vector<8xf32> to vector<8x1xf32>
    %74 = tpu.concatenate %70, %73 in 1 : vector<8x1xf32>, vector<8x1xf32> -> vector<8x2xf32>
    %c0_38 = arith.constant 0 : index
    %c0_39 = arith.constant 0 : index
    %75 = vector.load %arg5[%c0_38, %c0_39] : memref<8x8xf32, #tpu.memory_space<vmem>>, vector<8x8xf32>
    %cst_40 = arith.constant dense<0.000000e+00> : vector<8x2xf32>
    %76 = tpu.matmul %75, %74, %cst_40 {dimension_numbers = #tpu.dot_dimension_numbers<[1], [0], [0], [1], [0, 0, 1, 1], [], []>} : vector<8x8xf32>, vector<8x2xf32>, vector<8x2xf32> -> vector<8x2xf32>
    %77 = vector.extract_strided_slice %76 {offsets = [0, 0], sizes = [8, 1], strides = [1, 1]} : vector<8x2xf32> to vector<8x1xf32>
    %78 = vector.extract_strided_slice %76 {offsets = [0, 1], sizes = [8, 1], strides = [1, 1]} : vector<8x2xf32> to vector<8x1xf32>
    %79 = arith.mulf %77, %77 : vector<8x1xf32>
    %80 = arith.subf %78, %79 : vector<8x1xf32>
    %cst_41 = arith.constant 0.000000e+00 : f32
    %81 = vector.broadcast %cst_41 : f32 to vector<8x1xf32>
    %82 = arith.maximumf %80, %81 : vector<8x1xf32>
    %cst_42 = arith.constant 9.99999974E-6 : f32
    %83 = vector.broadcast %cst_42 : f32 to vector<8x1xf32>
    %84 = arith.addf %82, %83 : vector<8x1xf32>
    %85 = math.rsqrt %84 : vector<8x1xf32>
    %86 = arith.mulf %65, %85 : vector<8x1xf32>
    %87 = arith.mulf %77, %86 : vector<8x1xf32>
    %88 = arith.subf %66, %87 : vector<8x1xf32>
    %89 = vector.broadcast %86 : vector<8x1xf32> to vector<8x1280xf32>
    %90 = arith.mulf %68, %89 : vector<8x1280xf32>
    %91 = vector.broadcast %88 : vector<8x1xf32> to vector<8x1280xf32>
    %92 = arith.addf %90, %91 : vector<8x1280xf32>
    %cst_43 = arith.constant 5.000000e-01 : f32
    %93 = vector.broadcast %cst_43 : f32 to vector<8x1280xf32>
    %94 = arith.mulf %93, %92 : vector<8x1280xf32>
    %cst_44 = arith.constant 0.707106769 : f32
    %95 = vector.broadcast %cst_44 : f32 to vector<8x1280xf32>
    %96 = arith.mulf %92, %95 : vector<8x1280xf32>
    %97 = math.erf %96 : vector<8x1280xf32>
    %cst_45 = arith.constant 1.000000e+00 : f32
    %98 = vector.broadcast %cst_45 : f32 to vector<8x1280xf32>
    %99 = arith.addf %98, %97 : vector<8x1280xf32>
    %100 = arith.mulf %94, %99 : vector<8x1280xf32>
    %101 = vector.broadcast %0 : vector<1x1280xf32> to vector<8x1280xf32>
    %102 = arith.mulf %100, %101 : vector<8x1280xf32>
    %c0_46 = arith.constant 0 : index
    %c0_47 = arith.constant 0 : index
    %c0_48 = arith.constant 0 : index
    %103 = vector.load %arg4[%c0_46, %c0_47, %c0_48] : memref<9x8x8xf32, #tpu.memory_space<vmem>>, vector<1x8x8xf32>
    %104 = vector.shape_cast %103 : vector<1x8x8xf32> to vector<8x8xf32>
    %105 = vector.extract_strided_slice %102 {offsets = [0, 1245], sizes = [8, 35], strides = [1, 1]} : vector<8x1280xf32> to vector<8x35xf32>
    %106 = vector.extract_strided_slice %102 {offsets = [0, 0], sizes = [8, 1245], strides = [1, 1]} : vector<8x1280xf32> to vector<8x1245xf32>
    %107 = tpu.concatenate %105, %106 in 1 : vector<8x35xf32>, vector<8x1245xf32> -> vector<8x1280xf32>
    %cst_49 = arith.constant dense<0.000000e+00> : vector<8x1280xf32>
    %108 = tpu.matmul %104, %107, %cst_49 {dimension_numbers = #tpu.dot_dimension_numbers<[1], [0], [0], [1], [0, 0, 1, 1], [], []>} : vector<8x8xf32>, vector<8x1280xf32>, vector<8x1280xf32> -> vector<8x1280xf32>
    %c1_50 = arith.constant 1 : index
    %c0_51 = arith.constant 0 : index
    %c0_52 = arith.constant 0 : index
    %109 = vector.load %arg4[%c1_50, %c0_51, %c0_52] : memref<9x8x8xf32, #tpu.memory_space<vmem>>, vector<1x8x8xf32>
    %110 = vector.shape_cast %109 : vector<1x8x8xf32> to vector<8x8xf32>
    %111 = vector.extract_strided_slice %102 {offsets = [0, 1246], sizes = [8, 34], strides = [1, 1]} : vector<8x1280xf32> to vector<8x34xf32>
    %112 = vector.extract_strided_slice %102 {offsets = [0, 0], sizes = [8, 1246], strides = [1, 1]} : vector<8x1280xf32> to vector<8x1246xf32>
    %113 = tpu.concatenate %111, %112 in 1 : vector<8x34xf32>, vector<8x1246xf32> -> vector<8x1280xf32>
    %cst_53 = arith.constant dense<0.000000e+00> : vector<8x1280xf32>
    %114 = tpu.matmul %110, %113, %cst_53 {dimension_numbers = #tpu.dot_dimension_numbers<[1], [0], [0], [1], [0, 0, 1, 1], [], []>} : vector<8x8xf32>, vector<8x1280xf32>, vector<8x1280xf32> -> vector<8x1280xf32>
    %115 = arith.addf %108, %114 : vector<8x1280xf32>
    %c2_54 = arith.constant 2 : index
    %c0_55 = arith.constant 0 : index
    %c0_56 = arith.constant 0 : index
    %116 = vector.load %arg4[%c2_54, %c0_55, %c0_56] : memref<9x8x8xf32, #tpu.memory_space<vmem>>, vector<1x8x8xf32>
    %117 = vector.shape_cast %116 : vector<1x8x8xf32> to vector<8x8xf32>
    %118 = vector.extract_strided_slice %102 {offsets = [0, 1247], sizes = [8, 33], strides = [1, 1]} : vector<8x1280xf32> to vector<8x33xf32>
    %119 = vector.extract_strided_slice %102 {offsets = [0, 0], sizes = [8, 1247], strides = [1, 1]} : vector<8x1280xf32> to vector<8x1247xf32>
    %120 = tpu.concatenate %118, %119 in 1 : vector<8x33xf32>, vector<8x1247xf32> -> vector<8x1280xf32>
    %cst_57 = arith.constant dense<0.000000e+00> : vector<8x1280xf32>
    %121 = tpu.matmul %117, %120, %cst_57 {dimension_numbers = #tpu.dot_dimension_numbers<[1], [0], [0], [1], [0, 0, 1, 1], [], []>} : vector<8x8xf32>, vector<8x1280xf32>, vector<8x1280xf32> -> vector<8x1280xf32>
    %122 = arith.addf %115, %121 : vector<8x1280xf32>
    %c3_58 = arith.constant 3 : index
    %c0_59 = arith.constant 0 : index
    %c0_60 = arith.constant 0 : index
    %123 = vector.load %arg4[%c3_58, %c0_59, %c0_60] : memref<9x8x8xf32, #tpu.memory_space<vmem>>, vector<1x8x8xf32>
    %124 = vector.shape_cast %123 : vector<1x8x8xf32> to vector<8x8xf32>
    %125 = vector.extract_strided_slice %102 {offsets = [0, 1279], sizes = [8, 1], strides = [1, 1]} : vector<8x1280xf32> to vector<8x1xf32>
    %126 = vector.extract_strided_slice %102 {offsets = [0, 0], sizes = [8, 1279], strides = [1, 1]} : vector<8x1280xf32> to vector<8x1279xf32>
    %127 = tpu.concatenate %125, %126 in 1 : vector<8x1xf32>, vector<8x1279xf32> -> vector<8x1280xf32>
    %cst_61 = arith.constant dense<0.000000e+00> : vector<8x1280xf32>
    %128 = tpu.matmul %124, %127, %cst_61 {dimension_numbers = #tpu.dot_dimension_numbers<[1], [0], [0], [1], [0, 0, 1, 1], [], []>} : vector<8x8xf32>, vector<8x1280xf32>, vector<8x1280xf32> -> vector<8x1280xf32>
    %129 = arith.addf %122, %128 : vector<8x1280xf32>
    %c4_62 = arith.constant 4 : index
    %c0_63 = arith.constant 0 : index
    %c0_64 = arith.constant 0 : index
    %130 = vector.load %arg4[%c4_62, %c0_63, %c0_64] : memref<9x8x8xf32, #tpu.memory_space<vmem>>, vector<1x8x8xf32>
    %131 = vector.shape_cast %130 : vector<1x8x8xf32> to vector<8x8xf32>
    %cst_65 = arith.constant dense<0.000000e+00> : vector<8x1280xf32>
    %132 = tpu.matmul %131, %102, %cst_65 {dimension_numbers = #tpu.dot_dimension_numbers<[1], [0], [0], [1], [0, 0, 1, 1], [], []>} : vector<8x8xf32>, vector<8x1280xf32>, vector<8x1280xf32> -> vector<8x1280xf32>
    %133 = arith.addf %129, %132 : vector<8x1280xf32>
    %c5_66 = arith.constant 5 : index
    %c0_67 = arith.constant 0 : index
    %c0_68 = arith.constant 0 : index
    %134 = vector.load %arg4[%c5_66, %c0_67, %c0_68] : memref<9x8x8xf32, #tpu.memory_space<vmem>>, vector<1x8x8xf32>
    %135 = vector.shape_cast %134 : vector<1x8x8xf32> to vector<8x8xf32>
    %136 = vector.extract_strided_slice %102 {offsets = [0, 1], sizes = [8, 1279], strides = [1, 1]} : vector<8x1280xf32> to vector<8x1279xf32>
    %137 = vector.extract_strided_slice %102 {offsets = [0, 0], sizes = [8, 1], strides = [1, 1]} : vector<8x1280xf32> to vector<8x1xf32>
    %138 = tpu.concatenate %136, %137 in 1 : vector<8x1279xf32>, vector<8x1xf32> -> vector<8x1280xf32>
    %cst_69 = arith.constant dense<0.000000e+00> : vector<8x1280xf32>
    %139 = tpu.matmul %135, %138, %cst_69 {dimension_numbers = #tpu.dot_dimension_numbers<[1], [0], [0], [1], [0, 0, 1, 1], [], []>} : vector<8x8xf32>, vector<8x1280xf32>, vector<8x1280xf32> -> vector<8x1280xf32>
    %140 = arith.addf %133, %139 : vector<8x1280xf32>
    %c6_70 = arith.constant 6 : index
    %c0_71 = arith.constant 0 : index
    %c0_72 = arith.constant 0 : index
    %141 = vector.load %arg4[%c6_70, %c0_71, %c0_72] : memref<9x8x8xf32, #tpu.memory_space<vmem>>, vector<1x8x8xf32>
    %142 = vector.shape_cast %141 : vector<1x8x8xf32> to vector<8x8xf32>
    %143 = vector.extract_strided_slice %102 {offsets = [0, 33], sizes = [8, 1247], strides = [1, 1]} : vector<8x1280xf32> to vector<8x1247xf32>
    %144 = vector.extract_strided_slice %102 {offsets = [0, 0], sizes = [8, 33], strides = [1, 1]} : vector<8x1280xf32> to vector<8x33xf32>
    %145 = tpu.concatenate %143, %144 in 1 : vector<8x1247xf32>, vector<8x33xf32> -> vector<8x1280xf32>
    %cst_73 = arith.constant dense<0.000000e+00> : vector<8x1280xf32>
    %146 = tpu.matmul %142, %145, %cst_73 {dimension_numbers = #tpu.dot_dimension_numbers<[1], [0], [0], [1], [0, 0, 1, 1], [], []>} : vector<8x8xf32>, vector<8x1280xf32>, vector<8x1280xf32> -> vector<8x1280xf32>
    %147 = arith.addf %140, %146 : vector<8x1280xf32>
    %c7_74 = arith.constant 7 : index
    %c0_75 = arith.constant 0 : index
    %c0_76 = arith.constant 0 : index
    %148 = vector.load %arg4[%c7_74, %c0_75, %c0_76] : memref<9x8x8xf32, #tpu.memory_space<vmem>>, vector<1x8x8xf32>
    %149 = vector.shape_cast %148 : vector<1x8x8xf32> to vector<8x8xf32>
    %150 = vector.extract_strided_slice %102 {offsets = [0, 34], sizes = [8, 1246], strides = [1, 1]} : vector<8x1280xf32> to vector<8x1246xf32>
    %151 = vector.extract_strided_slice %102 {offsets = [0, 0], sizes = [8, 34], strides = [1, 1]} : vector<8x1280xf32> to vector<8x34xf32>
    %152 = tpu.concatenate %150, %151 in 1 : vector<8x1246xf32>, vector<8x34xf32> -> vector<8x1280xf32>
    %cst_77 = arith.constant dense<0.000000e+00> : vector<8x1280xf32>
    %153 = tpu.matmul %149, %152, %cst_77 {dimension_numbers = #tpu.dot_dimension_numbers<[1], [0], [0], [1], [0, 0, 1, 1], [], []>} : vector<8x8xf32>, vector<8x1280xf32>, vector<8x1280xf32> -> vector<8x1280xf32>
    %154 = arith.addf %147, %153 : vector<8x1280xf32>
    %c8_78 = arith.constant 8 : index
    %c0_79 = arith.constant 0 : index
    %c0_80 = arith.constant 0 : index
    %155 = vector.load %arg4[%c8_78, %c0_79, %c0_80] : memref<9x8x8xf32, #tpu.memory_space<vmem>>, vector<1x8x8xf32>
    %156 = vector.shape_cast %155 : vector<1x8x8xf32> to vector<8x8xf32>
    %157 = vector.extract_strided_slice %102 {offsets = [0, 35], sizes = [8, 1245], strides = [1, 1]} : vector<8x1280xf32> to vector<8x1245xf32>
    %158 = vector.extract_strided_slice %102 {offsets = [0, 0], sizes = [8, 35], strides = [1, 1]} : vector<8x1280xf32> to vector<8x35xf32>
    %159 = tpu.concatenate %157, %158 in 1 : vector<8x1245xf32>, vector<8x35xf32> -> vector<8x1280xf32>
    %cst_81 = arith.constant dense<0.000000e+00> : vector<8x1280xf32>
    %160 = tpu.matmul %156, %159, %cst_81 {dimension_numbers = #tpu.dot_dimension_numbers<[1], [0], [0], [1], [0, 0, 1, 1], [], []>} : vector<8x8xf32>, vector<8x1280xf32>, vector<8x1280xf32> -> vector<8x1280xf32>
    %161 = arith.addf %154, %160 : vector<8x1280xf32>
    %162 = vector.extract_strided_slice %5 {offsets = [0, 2], sizes = [8, 1], strides = [1, 1]} : vector<8x4xf32> to vector<8x1xf32>
    %163 = vector.extract_strided_slice %5 {offsets = [0, 3], sizes = [8, 1], strides = [1, 1]} : vector<8x4xf32> to vector<8x1xf32>
    %164 = vector.broadcast %0 : vector<1x1280xf32> to vector<8x1280xf32>
    %165 = arith.mulf %161, %164 : vector<8x1280xf32>
    %cst_82 = arith.constant dense<0.000000e+00> : vector<8xf32>
    %166 = vector.multi_reduction <add>, %165, %cst_82 [1] : vector<8x1280xf32> to vector<8xf32>
    %167 = vector.shape_cast %166 : vector<8xf32> to vector<8x1xf32>
    %168 = arith.mulf %165, %165 : vector<8x1280xf32>
    %cst_83 = arith.constant dense<0.000000e+00> : vector<8xf32>
    %169 = vector.multi_reduction <add>, %168, %cst_83 [1] : vector<8x1280xf32> to vector<8xf32>
    %170 = vector.shape_cast %169 : vector<8xf32> to vector<8x1xf32>
    %171 = tpu.concatenate %167, %170 in 1 : vector<8x1xf32>, vector<8x1xf32> -> vector<8x2xf32>
    %c0_84 = arith.constant 0 : index
    %c0_85 = arith.constant 0 : index
    %172 = vector.load %arg5[%c0_84, %c0_85] : memref<8x8xf32, #tpu.memory_space<vmem>>, vector<8x8xf32>
    %cst_86 = arith.constant dense<0.000000e+00> : vector<8x2xf32>
    %173 = tpu.matmul %172, %171, %cst_86 {dimension_numbers = #tpu.dot_dimension_numbers<[1], [0], [0], [1], [0, 0, 1, 1], [], []>} : vector<8x8xf32>, vector<8x2xf32>, vector<8x2xf32> -> vector<8x2xf32>
    %174 = vector.extract_strided_slice %173 {offsets = [0, 0], sizes = [8, 1], strides = [1, 1]} : vector<8x2xf32> to vector<8x1xf32>
    %175 = vector.extract_strided_slice %173 {offsets = [0, 1], sizes = [8, 1], strides = [1, 1]} : vector<8x2xf32> to vector<8x1xf32>
    %176 = arith.mulf %174, %174 : vector<8x1xf32>
    %177 = arith.subf %175, %176 : vector<8x1xf32>
    %cst_87 = arith.constant 0.000000e+00 : f32
    %178 = vector.broadcast %cst_87 : f32 to vector<8x1xf32>
    %179 = arith.maximumf %177, %178 : vector<8x1xf32>
    %cst_88 = arith.constant 9.99999974E-6 : f32
    %180 = vector.broadcast %cst_88 : f32 to vector<8x1xf32>
    %181 = arith.addf %179, %180 : vector<8x1xf32>
    %182 = math.rsqrt %181 : vector<8x1xf32>
    %183 = arith.mulf %162, %182 : vector<8x1xf32>
    %184 = arith.mulf %174, %183 : vector<8x1xf32>
    %185 = arith.subf %163, %184 : vector<8x1xf32>
    %186 = vector.broadcast %183 : vector<8x1xf32> to vector<8x1280xf32>
    %187 = arith.mulf %165, %186 : vector<8x1280xf32>
    %188 = vector.broadcast %185 : vector<8x1xf32> to vector<8x1280xf32>
    %189 = arith.addf %187, %188 : vector<8x1280xf32>
    %cst_89 = arith.constant 5.000000e-01 : f32
    %190 = vector.broadcast %cst_89 : f32 to vector<8x1280xf32>
    %191 = arith.mulf %190, %189 : vector<8x1280xf32>
    %cst_90 = arith.constant 0.707106769 : f32
    %192 = vector.broadcast %cst_90 : f32 to vector<8x1280xf32>
    %193 = arith.mulf %189, %192 : vector<8x1280xf32>
    %194 = math.erf %193 : vector<8x1280xf32>
    %cst_91 = arith.constant 1.000000e+00 : f32
    %195 = vector.broadcast %cst_91 : f32 to vector<8x1280xf32>
    %196 = arith.addf %195, %194 : vector<8x1280xf32>
    %197 = arith.mulf %191, %196 : vector<8x1280xf32>
    %198 = vector.broadcast %0 : vector<1x1280xf32> to vector<8x1280xf32>
    %199 = arith.mulf %197, %198 : vector<8x1280xf32>
    %200 = vector.extract_strided_slice %199 {offsets = [0, 0], sizes = [8, 1156], strides = [1, 1]} : vector<8x1280xf32> to vector<8x1156xf32>
    %201 = vector.shape_cast %200 : vector<8x1156xf32> to vector<8x34x34xf32>
    %202 = vector.extract_strided_slice %201 {offsets = [0, 1, 1], sizes = [8, 32, 32], strides = [1, 1, 1]} : vector<8x34x34xf32> to vector<8x32x32xf32>
    %203 = vector.shape_cast %202 : vector<8x32x32xf32> to vector<1x8x1024xf32>
    %c0_92 = arith.constant 0 : index
    %c0_93 = arith.constant 0 : index
    %c0_94 = arith.constant 0 : index
    %204 = vector.load %arg8[%c0_92, %c0_93, %c0_94] : memref<1x8x1024xf32, #tpu.memory_space<vmem>>, vector<1x8x1024xf32>
    tpu.vector_store %arg8[%c0_92, %c0_93, %c0_94], %203 {strides = array<i32>} : memref<1x8x1024xf32, #tpu.memory_space<vmem>>, vector<1x8x1024xf32>,
    return
  }
  func.func @transform_0(%arg0: i32) -> (i32, i32, i32) {
    %c0_i32 = arith.constant 0 : i32
    %c0_i32_0 = arith.constant 0 : i32
    %c0_i32_1 = arith.constant 0 : i32
    return %arg0, %c0_i32, %c0_i32_0 : i32, i32, i32
  }
  func.func @transform_1(%arg0: i32) -> (i32, i32) {
    %c0_i32 = arith.constant 0 : i32
    %c0_i32_0 = arith.constant 0 : i32
    %c0_i32_1 = arith.constant 0 : i32
    return %c0_i32, %c0_i32_0 : i32, i32
  }
  func.func @transform_2(%arg0: i32) -> (i32, i32, i32) {
    %c0_i32 = arith.constant 0 : i32
    %c0_i32_0 = arith.constant 0 : i32
    %c0_i32_1 = arith.constant 0 : i32
    %c0_i32_2 = arith.constant 0 : i32
    return %c0_i32, %c0_i32_0, %c0_i32_1 : i32, i32, i32
  }
  func.func @transform_3(%arg0: i32) -> (i32, i32, i32) {
    %c0_i32 = arith.constant 0 : i32
    %c0_i32_0 = arith.constant 0 : i32
    %c0_i32_1 = arith.constant 0 : i32
    %c0_i32_2 = arith.constant 0 : i32
    return %c0_i32, %c0_i32_0, %c0_i32_1 : i32, i32, i32
  }
  func.func @transform_4(%arg0: i32) -> (i32, i32) {
    %c0_i32 = arith.constant 0 : i32
    %c0_i32_0 = arith.constant 0 : i32
    %c0_i32_1 = arith.constant 0 : i32
    return %c0_i32, %c0_i32_0 : i32, i32
  }
  func.func @transform_5(%arg0: i32) -> (i32, i32) {
    %c0_i32 = arith.constant 0 : i32
    %c0_i32_0 = arith.constant 0 : i32
    %c0_i32_1 = arith.constant 0 : i32
    return %c0_i32, %c0_i32_0 : i32, i32
  }
  func.func @transform_6(%arg0: i32) -> (i32, i32) {
    %c0_i32 = arith.constant 0 : i32
    %c0_i32_0 = arith.constant 0 : i32
    %c0_i32_1 = arith.constant 0 : i32
    return %c0_i32, %c0_i32_0 : i32, i32
  }
  func.func @transform_7(%arg0: i32) -> (i32, i32, i32) {
    %c0_i32 = arith.constant 0 : i32
    %c0_i32_0 = arith.constant 0 : i32
    %c0_i32_1 = arith.constant 0 : i32
    return %arg0, %c0_i32, %c0_i32_0 : i32, i32, i32
  }
}

</mosaic_0001>

<bundles_post_ra>
// kernel: tpu_custom_call.1
= control target key start
LH: loop header
LB: loop body
LE: loop exit
PB: predicated region body
PF: predicated region fallthrough
CT: control target
= control target key end

     0   :  { %s14140_s0 = inlined_call_operand.hbm [shape: f32[2,4,256], index: 0, kind: input, shape index: {}]   ;;  %s14141_s1 = inlined_call_operand.hbm [shape: f32[256,1280], index: 1, kind: input, shape index: {}]   ;;  %s14142_s2 = inlined_call_operand.vmem [shape: f32[9,8,4], index: 2, kind: input, shape index: {}]   ;;  %s14143_s3 = inlined_call_operand.vmem [shape: f32[9,8,8], index: 3, kind: input, shape index: {}]   ;;  %s14144_s4 = inlined_call_operand.hbm [shape: f32[8,8], index: 4, kind: input, shape index: {}]   ;;  %s14145_s5 = inlined_call_operand.vmem [shape: f32[8,4], index: 5, kind: input, shape index: {}]   ;;  %s14146_s6 = inlined_call_operand.hbm [shape: f32[1,1280], index: 6, kind: input, shape index: {}]   ;;  %s14147_s7 = inlined_call_operand.hbm [shape: f32[2,8,1024], index: 7, kind: output, shape index: {}]  }
   0x1   :  { %14180 = sst [smem:[#allocation42_spill]] %s14141_s1 }
   0x2   :  { %14181 = sst [smem:[#allocation43_spill]] %s14144_s4 }
   0x3   :  { %12 = vsyncpa [#allocation3], 0 }
   0x4   :  { %14 = vsyncpa [#allocation3 + $0x1], 0 }
   0x5   :  { %15 = vsyncpa [#allocation6], 0 }
   0x6   :  { %16 = vsyncpa [#allocation9], 0 }
   0x7   :  { %17 = vsyncpa [#allocation4], 0 }
   0x8   :  { %19 = vsyncpa [#allocation4 + $0x1], 0  ;;  %s11389_s24 = smov 0   ;;  %s11391_s25 = smov 0  }
   0x9   :  { %s11393_s26 = smov 0   ;;  %s11395_s27 = smov 0  }
   0xa LB: > { %s11410_s28 = sadd.s32 4294967295, %s11289_s27   ;;  %s10695_s29 = sadd.s32 4294967294, %s11289_s27   ;;  %s11289_s27 = sphi %s11395_s27, %s14288_s27   ;;  %s11285_s26 = sphi %s11393_s26, %s14287_s26   ;;  %s11281_s25 = sphi %s11391_s25, %s14286_s25   ;;  %s11277_s24 = sphi %s11389_s24, %s14285_s24  }
   0xb   : > { %p45_p0 = scmp.ne.s32.totalorder %s11281_s25, %s11277_s24  ;;  %p14148_p1 = scmp.eq.s32.totalorder %s11410_s28, 0 }
   0xc   : > { %p201_p3 = scmp.eq.s32.totalorder %s10695_s29, 1  ;;  %p10696_p5 = scmp.ge.s32.totalorder %s11289_s27, 1 }
   0xd   : > { %p11419_p4 = por %p14148_p1, %p45_p0  ;;  %p208_p7 = scmp.lt.s32.totalorder %s11289_s27, 3 }
   0xe   : > { %p11424_p6 = por %p201_p3, %p45_p0  ;;  %s11291_s10 = smov [#allocation5]  }
   0xf   : > { %s14182_s30 = scalar_select %p11419_p4, 1, 0 }
  0x10   : > { %s14183_s8 = scalar_select %p11424_p6, 1, 0 }
  0x11   : > { %p11429_p8 = pnand %p10696_p5, %p208_p7  ;;  %s220_s11 = sshll.u32 %s11291_s10, 4  ;;  %s221_s11 = int_to_ptr.vmem [resolvable:$true] %s220_s11 }
  0x12   : > { %s11292_s13 = smov [#allocation7]   ;;  %s11293_s15 = smov [#allocation8]  }
  0x13   : > { %s14184_s9 = scalar_select %p11429_p8, 1, 0 }
  0x14   : > { %p10945_p9 = pneg %p11429_p8  ;;  %s240_s14 = sshll.u32 %s11292_s13, 4  ;;  %s241_s14 = int_to_ptr.vmem [resolvable:$true] %s240_s14 }
  0x15   : > { %s254_s16 = sshll.u32 %s11293_s15, 4  ;;  %s11122_s17 = scalar_lea.vmem %s221_s11, 40960  ;;  %s255_s16 = int_to_ptr.vmem [resolvable:$true] %s254_s16 }
  0x16   : > { %p11438_p11 = pnand %p10945_p9, %p14148_p1  ;;  %p11123_p13 = scmp.ne.s32.totalorder %s221_s11, %s11122_s17 }
  0x17   : > { %p11130_p5 = scmp.lt.s32.totalorder %s221_s11, %s221_s11  ;;  %p11131_p7 = scmp.lt.s32.totalorder %s11122_s17, %s11122_s17 }
  0x18   : > { %p11113_p12 = pneg %p11438_p11 }
  0x19   : > { %p11132_p9 = por %p11131_p7, %p11130_p5 }
  0x1a   : > { %p11125_p0 = pnand %p11123_p13, %p11113_p12 }
  0x1c   : > { %p11126_p3 = pneg %p11125_p0 }
  0x1e   : > { %p11133_p10 = pnand %p11132_p9, %p11126_p3 }
  0x20   : > { %11136 = shalt.err (!%p11133_p10)
}
  0x21   : > { %s11294_s18 = smov 1280   ;;  %s11295_s19 = smov 80  }
  0x22   : > { %s14186_s1 = sld [smem:[#allocation42_spill]]  ;;  %s11148_s22 = scalar_lea.vmem %s241_s14, 128 }
  0x23   : > { %p11149_p1 = scmp.ne.s32.totalorder %s241_s14, %s11148_s22  ;;  %p11156_p2 = scmp.lt.s32.totalorder %s241_s14, %s241_s14 }
  0x24   : > { %p11157_p6 = scmp.lt.s32.totalorder %s11148_s22, %s11148_s22 }
  0x25   : > { %p11151_p13 = pnand %p11149_p1, %p11113_p12 }
  0x26   : > { %p11158_p5 = por %p11157_p6, %p11156_p2 }
  0x27   : > { %p11152_p0 = pneg %p11151_p13 }
  0x28   : > { %10948 = dma.hbm_to_vmem [thread:$0]  (!%p11438_p11), %s14186_s1, 40960, %s221_s11, [#allocation6], %s11294_s18, %s11294_s18, %s11295_s19  }
  0x29   : > { %p11159_p3 = pnand %p11158_p5, %p11152_p0 }
  0x2b   : > { %11162 = shalt.err (!%p11159_p3)
}
  0x2c   : > { %s14187_s4 = sld [smem:[#allocation43_spill]]  ;;  %s11174_s10 = scalar_lea.vmem %s255_s16, 160 }
  0x2d   : > { %p11175_p10 = scmp.ne.s32.totalorder %s255_s16, %s11174_s10  ;;  %p11182_p9 = scmp.lt.s32.totalorder %s255_s16, %s255_s16 }
  0x2e   : > { %p11183_p13 = scmp.lt.s32.totalorder %s11174_s10, %s11174_s10 }
  0x2f   : > { %p11177_p7 = pnand %p11175_p10, %p11113_p12 }
  0x30   : > { %p11184_p4 = por %p11183_p13, %p11182_p9 }
  0x31   : > { %p11178_p1 = pneg %p11177_p7 }
  0x32   : > { %10951 = dma.hbm_to_vmem [thread:$0]  (!%p11438_p11), %s14187_s4, 128, %s241_s14, [#allocation6]  }
  0x33   : > { %p11185_p2 = pnand %p11184_p4, %p11178_p1 }
  0x35   : > { %11188 = shalt.err (!%p11185_p2)
}
  0x36   : > { %10954 = dma.hbm_to_vmem [thread:$0]  (!%p11438_p11), %s14146_s6, 160, %s255_s16, [#allocation9]  }
  0x37   : > { %s11469_s14 = sadd.s32 1, %s11289_s27   ;;  %s32_s12 = sadd.s32 1, %s11285_s26 }
  0x38   : > { %s29_s15 = ssub.s32 %s11289_s27, %s11469_s14  ;;  %p39_p6 = scmp.ne.s32.totalorder %s11285_s26, %s11281_s25 }
  0x39   : > { %p30_p4 = scmp.eq.s32.totalorder %s29_s15, 0  ;;  %p40_p12 = scmp.eq.s32.totalorder %s11289_s27, 0 }
  0x3a   : > { %p10966_p0 = scmp.lt.s32.totalorder %s11289_s27, 2  ;;  %p14188_p3 = scmp.eq.s32.totalorder %s11410_s28, 1 }
  0x3b   : > { %s11479_s17 = scalar_select %p30_p4, %s11285_s26, %s32_s12  }
  0x3c   : > { %p41_p5 = por %p40_p12, %p39_p6  ;;  %p11483_p10 = por %p14188_p3, %p39_p6 }
  0x3d   : > { %s265_s19 = sand.u32 1, %s11285_s26   ;;  %s10913_s20 = sshll.u32 %s11289_s27, 7 }
  0x3e   : > { %s14189_s18 = scalar_select %p11483_p10, 1, 0 }
  0x3f   : > { %s10701_s16 = sshll.u32 %s265_s19, 3  ;;  %s11492_s23 = scalar_lea.hbm %s14140_s0, %s10913_s20 }
  0x40   : > { %s269_s29 = scalar_lea.vmem [#allocation2], %s10701_s16  ;;  %p11494_p11 = pnand %p10966_p0, %p41_p5 }
  0x41   : > { %s277_s10 = sshll.u32 %s269_s29, 4  ;;  %s266_s13 = scalar_lea.sflag [#allocation3], %s265_s19  ;;  %s278_s10 = int_to_ptr.vmem [resolvable:$true] %s277_s10 }
  0x42   : > { %s11189_s15 = scalar_lea.hbm %s11492_s23, 128  ;;  %p11191_p1 = pneg %p11494_p11 }
  0x43   : > { %p11190_p7 = scmp.ne.s32.totalorder %s11492_s23, %s11189_s15  ;;  %s11194_s21 = scalar_lea.hbm %s14140_s0, 256 }
  0x44   : > { %p11195_p2 = scmp.lt.s32.totalorder %s11492_s23, %s14140_s0  ;;  %p11196_p4 = scmp.lt.s32.totalorder %s11194_s21, %s11189_s15 }
  0x45   : > { %p11192_p9 = pnand %p11191_p1, %p11190_p7 }
  0x46   : > { %p11197_p6 = por %p11196_p4, %p11195_p2 }
  0x47   : > { %p11193_p13 = pneg %p11192_p9 }
  0x49   : > { %p11198_p12 = pnand %p11197_p6, %p11193_p13 }
  0x4b   : > { %11201 = shalt.err (!%p11198_p12)
}
  0x4c   : > { %s11202_s29 = scalar_lea.vmem %s278_s10, 128  ;;  %s11296_s19 = smov [#allocation2]  }
  0x4d   : > { %p11203_p0 = scmp.ne.s32.totalorder %s278_s10, %s11202_s29  ;;  %s11207_s1 = sshll.u32 %s11296_s19, 4  ;;  %s11208_s1 = int_to_ptr.vmem [resolvable:$false] %s11207_s1 }
  0x4e   : > { %s11209_s4 = scalar_lea.vmem %s11208_s1, 256  ;;  %p11210_p7 = scmp.lt.s32.totalorder %s278_s10, %s11208_s1 }
  0x4f   : > { %p11205_p5 = pnand %p11203_p0, %p11191_p1  ;;  %p11211_p9 = scmp.lt.s32.totalorder %s11209_s4, %s11202_s29 }
  0x51   : > { %p11206_p3 = pneg %p11205_p5  ;;  %p11212_p10 = por %p11211_p9, %p11210_p7 }
  0x53   : > { %p11213_p8 = pnand %p11212_p10, %p11206_p3 }
  0x55   : > { %11216 = shalt.err (!%p11213_p8)
}
  0x56   : > { %10958 = dma.hbm_to_vmem [thread:$0]  (!%p11494_p11), %s11492_s23, 128, %s278_s10, %s266_s13  }
  0x57   : > { %p14191_p13 = scmp.ne.s32.totalorder %s14184_s9, 0 }
  0x59   : > { %286 = sbr.rel (%p14191_p13) target bundleno = 3807 (0xedf), region = 48 }
  0x5e   : > { %s11515_s15 = sand.u32 1, %s11281_s25   ;;  %p14192_p1 = scmp.ne.s32.totalorder %s14182_s30, 0 }
  0x5f   : > { %s10705_s12 = sshll.u32 %s11515_s15, 3  ;;  %s289_s20 = scalar_lea.sflag [#allocation3], %s11515_s15 }
  0x60   : > { %s11519_s1 = scalar_lea.vmem [#allocation2], %s10705_s12 }
  0x61   : > { %11260 = dma.done.wait (%p14192_p1), %s289_s20, 128  }
  0x62   : > { %11262 = vsyncadd (%p14192_p1), %s289_s20, 4294967168  ;;  %p14193_p8 = scmp.eq.s32.totalorder %s11410_s28, 0 }
  0x64   : > { %11264 = dma.done.wait (%p14193_p8), [#allocation6], 41088   ;;  %p14194_p10 = pmov %p14193_p8 }
  0x65   : > { %p14195_p11 = pmov %p14193_p8 }
  0x66   : > { %11266 = vsyncadd (%p14194_p10), [#allocation6], 4294926208 }
  0x67   : > { %11268 = dma.done.wait (%p14195_p11), [#allocation9], 160   ;;  %p14196_p2 = pmov %p14193_p8 }
  0x68   : > { %v489_v0 = vld [vmem:[#allocation5 + $0x4b8] sm:$0xff]  ;;  %v491_v1 = vld [vmem:[#allocation5 + $0x4c8] sm:$0xff]  ;;  %v488_v2 = vld [vmem:[#allocation5 + $0x4b0] sm:$0xff]  ;;  %s11297_s4 = smov 34   ;;  %s11298_s30 = smov 35   ;;  %vm1084_vm0 = vcmask 277504  }
  0x69   : > { %11270 = vsyncadd (%p14196_p2), [#allocation9], 4294967136  ;;  %661 = vmatprep.subr.mxu0 %v489_v0  ;;  %732 = vmatprep.subr.mxu1 %v491_v1  ;;  %v490_v3 = vld [vmem:[#allocation5 + $0x4c0] sm:$0xff]  ;;  %v479_v4 = vld [vmem:[#allocation5 + $0x468] sm:$0xff]  ;;  %s11299_s9 = smov 33   ;;  %s11300_s23 = smov 1  }
  0x6a   : > { %v481_v5 = vld [vmem:[#allocation5 + $0x478] sm:$0xff]  ;;  %662 = vmatpush1.msra.mxu0 %v488_v2  ;;  %733 = vmatpush1.msra.mxu1 %v490_v3  ;;  %v478_v6 = vld [vmem:[#allocation5 + $0x460] sm:$0xff]  ;;  %v480_v7 = vld [vmem:[#allocation5 + $0x470] sm:$0xff]  ;;  %vm1100_vm1 = vcmask 1043456   ;;  %s11302_s10 = smov 127   ;;  %s11303_s11 = smov 95  }
  0x6b   : > { %v469_v8 = vld [vmem:[#allocation5 + $0x418] sm:$0xff]  ;;  %663 = vmatprep.subr.mxu0 %v479_v4  ;;  %734 = vmatprep.subr.mxu1 %v481_v5  ;;  %v471_v9 = vld [vmem:[#allocation5 + $0x428] sm:$0xff]  ;;  %v468_v10 = vld [vmem:[#allocation5 + $0x410] sm:$0xff]  ;;  %s11304_s13 = smov 94   ;;  %s11305_s21 = smov 93   ;;  %vm1096_vm2 = vcmask 31744  }
  0x6c   : > { %v470_v11 = vld [vmem:[#allocation5 + $0x420] sm:$0xff]  ;;  %664 = vmatpush1.msra.mxu0 %v478_v6  ;;  %735 = vmatpush1.msra.mxu1 %v480_v7  ;;  %v459_v12 = vld [vmem:[#allocation5 + $0x3c8] sm:$0xff]  ;;  %v461_v13 = vld [vmem:[#allocation5 + $0x3d8] sm:$0xff]  ;;  %vm1049_vm3 = vcmask 285696   ;;  %vm2303_vm4 = vcmask 7168   ;;  %vm1879_vm5 = vcmask 269312  }
  0x6d   : > { %665 = vmatprep.subr.mxu0 %v469_v8  ;;  %736 = vmatprep.subr.mxu1 %v471_v9  ;;  %v458_v14 = vld [vmem:[#allocation5 + $0x3c0] sm:$0xff]  ;;  %v460_v15 = vld [vmem:[#allocation5 + $0x3d0] sm:$0xff]  ;;  %v449_v16 = vld [vmem:[#allocation5 + $0x378] sm:$0xff]  ;;  %vm3116_vm6 = vcmask 1039360   ;;  %vm3540_vm7 = vcmask 777216   ;;  %vm3964_vm8 = vcmask 769024  }
  0x6e   : > { %666 = vmatpush1.msra.mxu0 %v468_v10  ;;  %737 = vmatpush1.msra.mxu1 %v470_v11  ;;  %v451_v17 = vld [vmem:[#allocation5 + $0x388] sm:$0xff]  ;;  %v448_v18 = vld [vmem:[#allocation5 + $0x370] sm:$0xff]  ;;  %v450_v19 = vld [vmem:[#allocation5 + $0x380] sm:$0xff]  ;;  %vm4388_vm9 = vcmask 760832   ;;  %vm11306_vm10 = vmmov 0   ;;  %vm4886_vm11 = vcmask 64512  }
  0x6f   : > { %667 = vmatprep.subr.mxu0 %v459_v12  ;;  %738 = vmatprep.subr.mxu1 %v461_v13  ;;  %v439_v20 = vld [vmem:[#allocation5 + $0x328] sm:$0xff]  ;;  %v441_v21 = vld [vmem:[#allocation5 + $0x338] sm:$0xff]  ;;  %v438_v22 = vld [vmem:[#allocation5 + $0x320] sm:$0xff]  ;;  %s11310_s29 = smov 126   ;;  %s11312_s19 = smov 3   ;;  %vm8955_vm12 = vcmask 211968  }
  0x70   : > { %668 = vmatpush1.msra.mxu0 %v458_v14  ;;  %739 = vmatpush1.msra.mxu1 %v460_v15  ;;  %v440_v23 = vld [vmem:[#allocation5 + $0x330] sm:$0xff]  ;;  %v429_v24 = vld [vmem:[#allocation5 + $0x2d8] sm:$0xff]  ;;  %v431_v25 = vld [vmem:[#allocation5 + $0x2e8] sm:$0xff]  ;;  %s11314_s12 = smov 18   ;;  %s11315_s20 = smov 10   ;;  %vm8972_vm13 = vcmask 146432  }
  0x71   : > { %669 = vmatprep.subr.mxu0 %v449_v16  ;;  %740 = vmatprep.subr.mxu1 %v451_v17  ;;  %v428_v26 = vld [vmem:[#allocation5 + $0x2d0] sm:$0xff]  ;;  %v430_v27 = vld [vmem:[#allocation5 + $0x2e0] sm:$0xff]  ;;  %v419_v28 = vld [vmem:[#allocation5 + $0x288] sm:$0xff]  ;;  %s11321_s22 = smov 30   ;;  %s11323_s16 = smov 86   ;;  %vm8989_vm14 = vcmask 80896  }
  0x72   : > { %670 = vmatpush1.msra.mxu0 %v448_v18  ;;  %741 = vmatpush1.msra.mxu1 %v450_v19  ;;  %v421_v29 = vld [vmem:[#allocation5 + $0x298] sm:$0xff]  ;;  %v418_v30 = vld [vmem:[#allocation5 + $0x280] sm:$0xff]  ;;  %v420_v31 = vld [vmem:[#allocation5 + $0x290] sm:$0xff]  ;;  %vm9006_vm15 = vcmask 15360   ;;  %p14282_p6 = scmp.ne.s32.totalorder %s14189_s18, 0 }
  0x73   : > { %671 = vmatprep.subr.mxu0 %v439_v20  ;;  %742 = vmatprep.subr.mxu1 %v441_v21  ;;  %v409_v32 = vld [vmem:[#allocation5 + $0x238] sm:$0xff]  ;;  %v411_v33 = vld [vmem:[#allocation5 + $0x248] sm:$0xff]  ;;  %v408_v34 = vld [vmem:[#allocation5 + $0x230] sm:$0xff] }
  0x74   : > { %672 = vmatpush1.msra.mxu0 %v438_v22  ;;  %743 = vmatpush1.msra.mxu1 %v440_v23  ;;  %v410_v35 = vld [vmem:[#allocation5 + $0x240] sm:$0xff]  ;;  %v399_v36 = vld [vmem:[#allocation5 + $0x1e8] sm:$0xff]  ;;  %v401_v37 = vld [vmem:[#allocation5 + $0x1f8] sm:$0xff] }
  0x75   : > { %673 = vmatprep.subr.mxu0 %v429_v24  ;;  %744 = vmatprep.subr.mxu1 %v431_v25  ;;  %v398_v38 = vld [vmem:[#allocation5 + $0x1e0] sm:$0xff]  ;;  %v400_v39 = vld [vmem:[#allocation5 + $0x1f0] sm:$0xff]  ;;  %v389_v40 = vld [vmem:[#allocation5 + $0x198] sm:$0xff] }
  0x76   : > { %674 = vmatpush1.msra.mxu0 %v428_v26  ;;  %745 = vmatpush1.msra.mxu1 %v430_v27  ;;  %v391_v41 = vld [vmem:[#allocation5 + $0x1a8] sm:$0xff]  ;;  %v388_v42 = vld [vmem:[#allocation5 + $0x190] sm:$0xff]  ;;  %v390_v43 = vld [vmem:[#allocation5 + $0x1a0] sm:$0xff] }
  0x77   : > { %675 = vmatprep.subr.mxu0 %v419_v28  ;;  %746 = vmatprep.subr.mxu1 %v421_v29  ;;  %v379_v44 = vld [vmem:[#allocation5 + $0x148] sm:$0xff]  ;;  %v381_v45 = vld [vmem:[#allocation5 + $0x158] sm:$0xff]  ;;  %v378_v46 = vld [vmem:[#allocation5 + $0x140] sm:$0xff] }
  0x78   : > { %676 = vmatpush1.msra.mxu0 %v418_v30  ;;  %747 = vmatpush1.msra.mxu1 %v420_v31  ;;  %v380_v47 = vld [vmem:[#allocation5 + $0x150] sm:$0xff]  ;;  %v369_v48 = vld [vmem:[#allocation5 + $0xf8] sm:$0xff]  ;;  %v371_v49 = vld [vmem:[#allocation5 + $0x108] sm:$0xff] }
  0x79   : > { %677 = vmatprep.subr.mxu0 %v409_v32  ;;  %748 = vmatprep.subr.mxu1 %v411_v33  ;;  %v368_v50 = vld [vmem:[#allocation5 + $0xf0] sm:$0xff]  ;;  %v370_v51 = vld [vmem:[#allocation5 + $0x100] sm:$0xff]  ;;  %v359_v52 = vld [vmem:[#allocation5 + $0xa8] sm:$0xff] }
  0x7a   : > { %678 = vmatpush1.msra.mxu0 %v408_v34  ;;  %749 = vmatpush1.msra.mxu1 %v410_v35  ;;  %v361_v53 = vld [vmem:[#allocation5 + $0xb8] sm:$0xff]  ;;  %v358_v54 = vld [vmem:[#allocation5 + $0xa0] sm:$0xff]  ;;  %v360_v55 = vld [vmem:[#allocation5 + $0xb0] sm:$0xff] }
  0x7b   : > { %679 = vmatprep.subr.mxu0 %v399_v36  ;;  %750 = vmatprep.subr.mxu1 %v401_v37  ;;  %v349_v56 = vld [vmem:[#allocation5 + $0x58] sm:$0xff]  ;;  %v351_v57 = vld [vmem:[#allocation5 + $0x68] sm:$0xff]  ;;  %v348_v58 = vld [vmem:[#allocation5 + $0x50] sm:$0xff] }
  0x7c   : > { %680 = vmatpush1.msra.mxu0 %v398_v38  ;;  %751 = vmatpush1.msra.mxu1 %v400_v39  ;;  %v350_v59 = vld [vmem:[#allocation5 + $0x60] sm:$0xff]  ;;  %v339_v60 = vld [vmem:[#allocation5 + $0x8] sm:$0xff]  ;;  %v341_v61 = vld [vmem:[#allocation5 + $0x18] sm:$0xff] }
  0x7d   : > { %681 = vmatprep.subr.mxu0 %v389_v40  ;;  %752 = vmatprep.subr.mxu1 %v391_v41  ;;  %v338_v62 = vld [vmem:[#allocation5] sm:$0xff]  ;;  %v340_v63 = vld [vmem:[#allocation5 + $0x10] sm:$0xff]  ;;  %v649_v0 = vld [vmem:[#allocation5 + $0x9b8] sm:$0xff] }
  0x7e   : > { %682 = vmatpush1.msra.mxu0 %v388_v42  ;;  %753 = vmatpush1.msra.mxu1 %v390_v43  ;;  %v651_v1 = vld [vmem:[#allocation5 + $0x9c8] sm:$0xff]  ;;  %v648_v2 = vld [vmem:[#allocation5 + $0x9b0] sm:$0xff]  ;;  %v650_v3 = vld [vmem:[#allocation5 + $0x9c0] sm:$0xff] }
  0x7f   : > { %683 = vmatprep.subr.mxu0 %v379_v44  ;;  %754 = vmatprep.subr.mxu1 %v381_v45  ;;  %v639_v4 = vld [vmem:[#allocation5 + $0x968] sm:$0xff]  ;;  %v641_v5 = vld [vmem:[#allocation5 + $0x978] sm:$0xff]  ;;  %v638_v6 = vld [vmem:[#allocation5 + $0x960] sm:$0xff] }
  0x80   : > { %684 = vmatpush1.msra.mxu0 %v378_v46  ;;  %755 = vmatpush1.msra.mxu1 %v380_v47  ;;  %v640_v7 = vld [vmem:[#allocation5 + $0x970] sm:$0xff]  ;;  %v629_v8 = vld [vmem:[#allocation5 + $0x918] sm:$0xff]  ;;  %v631_v9 = vld [vmem:[#allocation5 + $0x928] sm:$0xff] }
  0x81   : > { %685 = vmatprep.subr.mxu0 %v369_v48  ;;  %756 = vmatprep.subr.mxu1 %v371_v49  ;;  %v628_v10 = vld [vmem:[#allocation5 + $0x910] sm:$0xff]  ;;  %v630_v11 = vld [vmem:[#allocation5 + $0x920] sm:$0xff]  ;;  %v619_v12 = vld [vmem:[#allocation5 + $0x8c8] sm:$0xff] }
  0x82   : > { %686 = vmatpush1.msra.mxu0 %v368_v50  ;;  %757 = vmatpush1.msra.mxu1 %v370_v51  ;;  %v621_v13 = vld [vmem:[#allocation5 + $0x8d8] sm:$0xff]  ;;  %v618_v14 = vld [vmem:[#allocation5 + $0x8c0] sm:$0xff]  ;;  %v620_v15 = vld [vmem:[#allocation5 + $0x8d0] sm:$0xff] }
  0x83   : > { %687 = vmatprep.subr.mxu0 %v359_v52  ;;  %758 = vmatprep.subr.mxu1 %v361_v53  ;;  %v609_v16 = vld [vmem:[#allocation5 + $0x878] sm:$0xff]  ;;  %v611_v17 = vld [vmem:[#allocation5 + $0x888] sm:$0xff]  ;;  %v608_v18 = vld [vmem:[#allocation5 + $0x870] sm:$0xff] }
  0x84   : > { %688 = vmatpush1.msra.mxu0 %v358_v54  ;;  %759 = vmatpush1.msra.mxu1 %v360_v55  ;;  %v610_v19 = vld [vmem:[#allocation5 + $0x880] sm:$0xff]  ;;  %v599_v20 = vld [vmem:[#allocation5 + $0x828] sm:$0xff]  ;;  %v601_v21 = vld [vmem:[#allocation5 + $0x838] sm:$0xff] }
  0x85   : > { %689 = vmatprep.subr.mxu0 %v349_v56  ;;  %760 = vmatprep.subr.mxu1 %v351_v57  ;;  %v598_v22 = vld [vmem:[#allocation5 + $0x820] sm:$0xff]  ;;  %v600_v23 = vld [vmem:[#allocation5 + $0x830] sm:$0xff]  ;;  %v589_v24 = vld [vmem:[#allocation5 + $0x7d8] sm:$0xff] }
  0x86   : > { %690 = vmatpush1.msra.mxu0 %v348_v58  ;;  %761 = vmatpush1.msra.mxu1 %v350_v59  ;;  %v591_v25 = vld [vmem:[#allocation5 + $0x7e8] sm:$0xff]  ;;  %v588_v26 = vld [vmem:[#allocation5 + $0x7d0] sm:$0xff]  ;;  %v590_v27 = vld [vmem:[#allocation5 + $0x7e0] sm:$0xff] }
  0x87   : > { %691 = vmatprep.subr.mxu0 %v339_v60  ;;  %762 = vmatprep.subr.mxu1 %v341_v61  ;;  %v579_v28 = vld [vmem:[#allocation5 + $0x788] sm:$0xff]  ;;  %v581_v29 = vld [vmem:[#allocation5 + $0x798] sm:$0xff]  ;;  %v578_v30 = vld [vmem:[#allocation5 + $0x780] sm:$0xff] }
  0x88   : > { %692 = vmatpush1.msra.mxu0 %v338_v62  ;;  %763 = vmatpush1.msra.mxu1 %v340_v63  ;;  %v580_v31 = vld [vmem:[#allocation5 + $0x790] sm:$0xff]  ;;  %v569_v32 = vld [vmem:[#allocation5 + $0x738] sm:$0xff]  ;;  %v571_v33 = vld [vmem:[#allocation5 + $0x748] sm:$0xff] }
  0x89   : > { %693 = vmatprep.subr.mxu0 %v649_v0  ;;  %764 = vmatprep.subr.mxu1 %v651_v1  ;;  %v568_v34 = vld [vmem:[#allocation5 + $0x730] sm:$0xff]  ;;  %v570_v35 = vld [vmem:[#allocation5 + $0x740] sm:$0xff]  ;;  %v559_v36 = vld [vmem:[#allocation5 + $0x6e8] sm:$0xff] }
  0x8a   : > { %694 = vmatpush2.msra.mxu0 %v648_v2  ;;  %765 = vmatpush2.msra.mxu1 %v650_v3  ;;  %v561_v37 = vld [vmem:[#allocation5 + $0x6f8] sm:$0xff]  ;;  %v558_v38 = vld [vmem:[#allocation5 + $0x6e0] sm:$0xff]  ;;  %v560_v39 = vld [vmem:[#allocation5 + $0x6f0] sm:$0xff] }
  0x8b   : > { %695 = vmatprep.subr.mxu0 %v639_v4  ;;  %766 = vmatprep.subr.mxu1 %v641_v5  ;;  %v549_v40 = vld [vmem:[#allocation5 + $0x698] sm:$0xff]  ;;  %v551_v41 = vld [vmem:[#allocation5 + $0x6a8] sm:$0xff]  ;;  %v548_v42 = vld [vmem:[#allocation5 + $0x690] sm:$0xff] }
  0x8c   : > { %696 = vmatpush2.msra.mxu0 %v638_v6  ;;  %767 = vmatpush2.msra.mxu1 %v640_v7  ;;  %v550_v43 = vld [vmem:[#allocation5 + $0x6a0] sm:$0xff]  ;;  %v539_v44 = vld [vmem:[#allocation5 + $0x648] sm:$0xff]  ;;  %v541_v45 = vld [vmem:[#allocation5 + $0x658] sm:$0xff] }
  0x8d   : > { %697 = vmatprep.subr.mxu0 %v629_v8  ;;  %768 = vmatprep.subr.mxu1 %v631_v9  ;;  %v538_v46 = vld [vmem:[#allocation5 + $0x640] sm:$0xff]  ;;  %v540_v47 = vld [vmem:[#allocation5 + $0x650] sm:$0xff]  ;;  %v529_v48 = vld [vmem:[#allocation5 + $0x5f8] sm:$0xff] }
  0x8e   : > { %698 = vmatpush2.msra.mxu0 %v628_v10  ;;  %769 = vmatpush2.msra.mxu1 %v630_v11  ;;  %v531_v49 = vld [vmem:[#allocation5 + $0x608] sm:$0xff]  ;;  %v528_v50 = vld [vmem:[#allocation5 + $0x5f0] sm:$0xff]  ;;  %v530_v51 = vld [vmem:[#allocation5 + $0x600] sm:$0xff] }
  0x8f   : > { %699 = vmatprep.subr.mxu0 %v619_v12  ;;  %770 = vmatprep.subr.mxu1 %v621_v13  ;;  %v519_v52 = vld [vmem:[#allocation5 + $0x5a8] sm:$0xff]  ;;  %v521_v53 = vld [vmem:[#allocation5 + $0x5b8] sm:$0xff]  ;;  %v518_v54 = vld [vmem:[#allocation5 + $0x5a0] sm:$0xff] }
  0x90   : > { %700 = vmatpush2.msra.mxu0 %v618_v14  ;;  %771 = vmatpush2.msra.mxu1 %v620_v15  ;;  %v520_v55 = vld [vmem:[#allocation5 + $0x5b0] sm:$0xff]  ;;  %v509_v57 = vld [vmem:[#allocation5 + $0x558] sm:$0xff]  ;;  %v511_v58 = vld [vmem:[#allocation5 + $0x568] sm:$0xff] }
  0x91   : > { %701 = vmatprep.subr.mxu0 %v609_v16  ;;  %772 = vmatprep.subr.mxu1 %v611_v17  ;;  %v11534_v56 = vld [vmem:[%s11519_s1] sm:$0xff]  ;;  %v510_v60 = vld [vmem:[#allocation5 + $0x560] sm:$0xff]  ;;  %v499_v61 = vld [vmem:[#allocation5 + $0x508] sm:$0xff]  ;;  %s11320_s1 = smov 4  }
  0x92   : > { %702 = vmatpush2.msra.mxu0 %v608_v18  ;;  %773 = vmatpush2.msra.mxu1 %v610_v19  ;;  %v508_v59 = vld [vmem:[#allocation5 + $0x550] sm:$0xff]  ;;  %v501_v62 = vld [vmem:[#allocation5 + $0x518] sm:$0xff]  ;;  %v11538_v63 = vcombine.high %v11534_v56, %v11534_v56  ;;  %v498_v0 = vld [vmem:[#allocation5 + $0x500] sm:$0xff] }
  0x93   : > { %703 = vmatprep.subr.mxu0 %v599_v20  ;;  %774 = vmatprep.subr.mxu1 %v601_v21  ;;  %v500_v1 = vld [vmem:[#allocation5 + $0x510] sm:$0xff]  ;;  %v493_v2 = vld [vmem:[#allocation5 + $0x4d8] sm:$0xff]  ;;  %v495_v3 = vld [vmem:[#allocation5 + $0x4e8] sm:$0xff] }
  0x94   : > { %704 = vmatpush2.msra.mxu0 %v598_v22  ;;  %775 = vmatpush2.msra.mxu1 %v600_v23  ;;  %v492_v4 = vld [vmem:[#allocation5 + $0x4d0] sm:$0xff]  ;;  %v494_v5 = vld [vmem:[#allocation5 + $0x4e0] sm:$0xff]  ;;  %v483_v6 = vld [vmem:[#allocation5 + $0x488] sm:$0xff] }
  0x95   : > { %705 = vmatprep.subr.mxu0 %v589_v24  ;;  %776 = vmatprep.subr.mxu1 %v591_v25  ;;  %v485_v7 = vld [vmem:[#allocation5 + $0x498] sm:$0xff]  ;;  %v482_v8 = vld [vmem:[#allocation5 + $0x480] sm:$0xff]  ;;  %v484_v9 = vld [vmem:[#allocation5 + $0x490] sm:$0xff] }
  0x96   : > { %706 = vmatpush2.msra.mxu0 %v588_v26  ;;  %777 = vmatpush2.msra.mxu1 %v590_v27  ;;  %v473_v10 = vld [vmem:[#allocation5 + $0x438] sm:$0xff]  ;;  %v475_v11 = vld [vmem:[#allocation5 + $0x448] sm:$0xff]  ;;  %v472_v12 = vld [vmem:[#allocation5 + $0x430] sm:$0xff] }
  0x97   : > { %707 = vmatprep.subr.mxu0 %v579_v28  ;;  %778 = vmatprep.subr.mxu1 %v581_v29  ;;  %v474_v13 = vld [vmem:[#allocation5 + $0x440] sm:$0xff]  ;;  %v463_v14 = vld [vmem:[#allocation5 + $0x3e8] sm:$0xff]  ;;  %v465_v15 = vld [vmem:[#allocation5 + $0x3f8] sm:$0xff] }
  0x98   : > { %708 = vmatpush2.msra.mxu0 %v578_v30  ;;  %779 = vmatpush2.msra.mxu1 %v580_v31  ;;  %v462_v16 = vld [vmem:[#allocation5 + $0x3e0] sm:$0xff]  ;;  %v464_v17 = vld [vmem:[#allocation5 + $0x3f0] sm:$0xff]  ;;  %v453_v18 = vld [vmem:[#allocation5 + $0x398] sm:$0xff] }
  0x99   : > { %709 = vmatprep.subr.mxu0 %v569_v32  ;;  %780 = vmatprep.subr.mxu1 %v571_v33  ;;  %v455_v19 = vld [vmem:[#allocation5 + $0x3a8] sm:$0xff]  ;;  %v452_v20 = vld [vmem:[#allocation5 + $0x390] sm:$0xff]  ;;  %v454_v21 = vld [vmem:[#allocation5 + $0x3a0] sm:$0xff] }
  0x9a   : > { %710 = vmatpush2.msra.mxu0 %v568_v34  ;;  %781 = vmatpush2.msra.mxu1 %v570_v35  ;;  %v443_v22 = vld [vmem:[#allocation5 + $0x348] sm:$0xff]  ;;  %v445_v23 = vld [vmem:[#allocation5 + $0x358] sm:$0xff]  ;;  %v442_v24 = vld [vmem:[#allocation5 + $0x340] sm:$0xff] }
  0x9b   : > { %711 = vmatprep.subr.mxu0 %v559_v36  ;;  %782 = vmatprep.subr.mxu1 %v561_v37  ;;  %v444_v25 = vld [vmem:[#allocation5 + $0x350] sm:$0xff]  ;;  %v433_v26 = vld [vmem:[#allocation5 + $0x2f8] sm:$0xff]  ;;  %v435_v27 = vld [vmem:[#allocation5 + $0x308] sm:$0xff] }
  0x9c   : > { %712 = vmatpush2.msra.mxu0 %v558_v38  ;;  %783 = vmatpush2.msra.mxu1 %v560_v39  ;;  %v432_v28 = vld [vmem:[#allocation5 + $0x2f0] sm:$0xff]  ;;  %v434_v29 = vld [vmem:[#allocation5 + $0x300] sm:$0xff]  ;;  %v423_v30 = vld [vmem:[#allocation5 + $0x2a8] sm:$0xff] }
  0x9d   : > { %713 = vmatprep.subr.mxu0 %v549_v40  ;;  %784 = vmatprep.subr.mxu1 %v551_v41  ;;  %v425_v31 = vld [vmem:[#allocation5 + $0x2b8] sm:$0xff]  ;;  %v422_v32 = vld [vmem:[#allocation5 + $0x2a0] sm:$0xff]  ;;  %v424_v33 = vld [vmem:[#allocation5 + $0x2b0] sm:$0xff] }
  0x9e   : > { %714 = vmatpush2.msra.mxu0 %v548_v42  ;;  %785 = vmatpush2.msra.mxu1 %v550_v43  ;;  %v413_v34 = vld [vmem:[#allocation5 + $0x258] sm:$0xff]  ;;  %v415_v35 = vld [vmem:[#allocation5 + $0x268] sm:$0xff]  ;;  %v412_v36 = vld [vmem:[#allocation5 + $0x250] sm:$0xff] }
  0x9f   : > { %715 = vmatprep.subr.mxu0 %v539_v44  ;;  %786 = vmatprep.subr.mxu1 %v541_v45  ;;  %v414_v37 = vld [vmem:[#allocation5 + $0x260] sm:$0xff]  ;;  %v403_v38 = vld [vmem:[#allocation5 + $0x208] sm:$0xff]  ;;  %v405_v39 = vld [vmem:[#allocation5 + $0x218] sm:$0xff] }
  0xa0   : > { %716 = vmatpush2.msra.mxu0 %v538_v46  ;;  %787 = vmatpush2.msra.mxu1 %v540_v47  ;;  %v402_v40 = vld [vmem:[#allocation5 + $0x200] sm:$0xff]  ;;  %v404_v41 = vld [vmem:[#allocation5 + $0x210] sm:$0xff]  ;;  %v393_v42 = vld [vmem:[#allocation5 + $0x1b8] sm:$0xff] }
  0xa1   : > { %717 = vmatprep.subr.mxu0 %v529_v48  ;;  %788 = vmatprep.subr.mxu1 %v531_v49  ;;  %v395_v43 = vld [vmem:[#allocation5 + $0x1c8] sm:$0xff]  ;;  %v392_v44 = vld [vmem:[#allocation5 + $0x1b0] sm:$0xff]  ;;  %v394_v45 = vld [vmem:[#allocation5 + $0x1c0] sm:$0xff] }
  0xa2   : > { %718 = vmatpush2.msra.mxu0 %v528_v50  ;;  %789 = vmatpush2.msra.mxu1 %v530_v51  ;;  %v383_v46 = vld [vmem:[#allocation5 + $0x168] sm:$0xff]  ;;  %v385_v47 = vld [vmem:[#allocation5 + $0x178] sm:$0xff]  ;;  %v382_v48 = vld [vmem:[#allocation5 + $0x160] sm:$0xff] }
  0xa3   : > { %719 = vmatprep.subr.mxu0 %v519_v52  ;;  %790 = vmatprep.subr.mxu1 %v521_v53  ;;  %v384_v49 = vld [vmem:[#allocation5 + $0x170] sm:$0xff]  ;;  %v373_v50 = vld [vmem:[#allocation5 + $0x118] sm:$0xff]  ;;  %v375_v51 = vld [vmem:[#allocation5 + $0x128] sm:$0xff] }
  0xa4   : > { %720 = vmatpush2.msra.mxu0 %v518_v54  ;;  %791 = vmatpush2.msra.mxu1 %v520_v55  ;;  %v372_v52 = vld [vmem:[#allocation5 + $0x110] sm:$0xff]  ;;  %v374_v53 = vld [vmem:[#allocation5 + $0x120] sm:$0xff]  ;;  %v363_v54 = vld [vmem:[#allocation5 + $0xc8] sm:$0xff] }
  0xa5   : > { %721 = vmatprep.subr.mxu0 %v509_v57  ;;  %792 = vmatprep.subr.mxu1 %v511_v58  ;;  %v365_v55 = vld [vmem:[#allocation5 + $0xd8] sm:$0xff]  ;;  %v362_v57 = vld [vmem:[#allocation5 + $0xc0] sm:$0xff]  ;;  %v364_v58 = vld [vmem:[#allocation5 + $0xd0] sm:$0xff] }
  0xa6   : > { %722 = vmatpush2.msra.mxu0 %v508_v59  ;;  %793 = vmatpush2.msra.mxu1 %v510_v60  ;;  %v353_v59 = vld [vmem:[#allocation5 + $0x78] sm:$0xff]  ;;  %v355_v60 = vld [vmem:[#allocation5 + $0x88] sm:$0xff] }
  0xa7   : > { %723 = vmatprep.subr.mxu0 %v499_v61  ;;  %794 = vmatprep.subr.mxu1 %v501_v62  ;;  %v352_v61 = vld [vmem:[#allocation5 + $0x70] sm:$0xff]  ;;  %v354_v62 = vld [vmem:[#allocation5 + $0x80] sm:$0xff] }
  0xa8   : > { %724 = vmatpush2.msra.mxu0 %v498_v0  ;;  %725 = vmatprep.mubr.f32.mxu0 %v11538_v63  ;;  %v343_v0 = vld [vmem:[#allocation5 + $0x28] sm:$0xff] }
  0xa9   : > { %795 = vmatpush2.msra.mxu1 %v500_v1  ;;  %796 = vmatprep.mubr.f32.mxu1 %v11538_v63  ;;  %v345_v1 = vld [vmem:[#allocation5 + $0x38] sm:$0xff] }
  0xaa   : > { %726 = vmatmul.mubr.f32.vlgmr.msra.gmra.mxu0 %v11534_v56  ;;  %797 = vmatmul.mubr.f32.vlgmr.msra.gmra.mxu1 %v11534_v56 }
  0xab   : > { %803 = vmatprep.subr.mxu0 %v493_v2  ;;  %874 = vmatprep.subr.mxu1 %v495_v3  ;;  %v342_v2 = vld [vmem:[#allocation5 + $0x20] sm:$0xff]  ;;  %v344_v3 = vld [vmem:[#allocation5 + $0x30] sm:$0xff] }
  0xac   : > { %804 = vmatpush1.msra.mxu0 %v492_v4  ;;  %875 = vmatpush1.msra.mxu1 %v494_v5  ;;  %v653_v4 = vld [vmem:[#allocation5 + $0x9d8] sm:$0xff]  ;;  %v655_v5 = vld [vmem:[#allocation5 + $0x9e8] sm:$0xff] }
  0xad   : > { %805 = vmatprep.subr.mxu0 %v483_v6  ;;  %876 = vmatprep.subr.mxu1 %v485_v7  ;;  %v652_v6 = vld [vmem:[#allocation5 + $0x9d0] sm:$0xff]  ;;  %v654_v7 = vld [vmem:[#allocation5 + $0x9e0] sm:$0xff] }
  0xae   : > { %806 = vmatpush1.msra.mxu0 %v482_v8  ;;  %877 = vmatpush1.msra.mxu1 %v484_v9  ;;  %v643_v8 = vld [vmem:[#allocation5 + $0x988] sm:$0xff]  ;;  %v645_v9 = vld [vmem:[#allocation5 + $0x998] sm:$0xff] }
  0xaf   : > { %807 = vmatprep.subr.mxu0 %v473_v10  ;;  %878 = vmatprep.subr.mxu1 %v475_v11  ;;  %v642_v10 = vld [vmem:[#allocation5 + $0x980] sm:$0xff]  ;;  %v644_v11 = vld [vmem:[#allocation5 + $0x990] sm:$0xff] }
  0xb0   : > { %808 = vmatpush1.msra.mxu0 %v472_v12  ;;  %879 = vmatpush1.msra.mxu1 %v474_v13  ;;  %v633_v12 = vld [vmem:[#allocation5 + $0x938] sm:$0xff]  ;;  %v635_v13 = vld [vmem:[#allocation5 + $0x948] sm:$0xff] }
  0xb1   : > { %809 = vmatprep.subr.mxu0 %v463_v14  ;;  %880 = vmatprep.subr.mxu1 %v465_v15  ;;  %v632_v14 = vld [vmem:[#allocation5 + $0x930] sm:$0xff]  ;;  %v634_v15 = vld [vmem:[#allocation5 + $0x940] sm:$0xff] }
  0xb2   : > { %810 = vmatpush1.msra.mxu0 %v462_v16  ;;  %881 = vmatpush1.msra.mxu1 %v464_v17  ;;  %v623_v16 = vld [vmem:[#allocation5 + $0x8e8] sm:$0xff]  ;;  %v625_v17 = vld [vmem:[#allocation5 + $0x8f8] sm:$0xff] }
  0xb3   : > { %811 = vmatprep.subr.mxu0 %v453_v18  ;;  %882 = vmatprep.subr.mxu1 %v455_v19  ;;  %v622_v18 = vld [vmem:[#allocation5 + $0x8e0] sm:$0xff]  ;;  %v624_v19 = vld [vmem:[#allocation5 + $0x8f0] sm:$0xff] }
  0xb4   : > { %812 = vmatpush1.msra.mxu0 %v452_v20  ;;  %883 = vmatpush1.msra.mxu1 %v454_v21  ;;  %v613_v20 = vld [vmem:[#allocation5 + $0x898] sm:$0xff]  ;;  %v615_v21 = vld [vmem:[#allocation5 + $0x8a8] sm:$0xff] }
  0xb5   : > { %813 = vmatprep.subr.mxu0 %v443_v22  ;;  %884 = vmatprep.subr.mxu1 %v445_v23  ;;  %v612_v22 = vld [vmem:[#allocation5 + $0x890] sm:$0xff]  ;;  %v614_v23 = vld [vmem:[#allocation5 + $0x8a0] sm:$0xff] }
  0xb6   : > { %814 = vmatpush1.msra.mxu0 %v442_v24  ;;  %885 = vmatpush1.msra.mxu1 %v444_v25  ;;  %v603_v24 = vld [vmem:[#allocation5 + $0x848] sm:$0xff]  ;;  %v605_v25 = vld [vmem:[#allocation5 + $0x858] sm:$0xff] }
  0xb7   : > { %815 = vmatprep.subr.mxu0 %v433_v26  ;;  %886 = vmatprep.subr.mxu1 %v435_v27  ;;  %v602_v26 = vld [vmem:[#allocation5 + $0x840] sm:$0xff]  ;;  %v604_v27 = vld [vmem:[#allocation5 + $0x850] sm:$0xff] }
  0xb8   : > { %816 = vmatpush1.msra.mxu0 %v432_v28  ;;  %887 = vmatpush1.msra.mxu1 %v434_v29  ;;  %v593_v28 = vld [vmem:[#allocation5 + $0x7f8] sm:$0xff]  ;;  %v595_v29 = vld [vmem:[#allocation5 + $0x808] sm:$0xff] }
  0xb9   : > { %817 = vmatprep.subr.mxu0 %v423_v30  ;;  %888 = vmatprep.subr.mxu1 %v425_v31  ;;  %v592_v30 = vld [vmem:[#allocation5 + $0x7f0] sm:$0xff]  ;;  %v594_v31 = vld [vmem:[#allocation5 + $0x800] sm:$0xff] }
  0xba   : > { %818 = vmatpush1.msra.mxu0 %v422_v32  ;;  %889 = vmatpush1.msra.mxu1 %v424_v33  ;;  %v583_v32 = vld [vmem:[#allocation5 + $0x7a8] sm:$0xff]  ;;  %v585_v33 = vld [vmem:[#allocation5 + $0x7b8] sm:$0xff] }
  0xbb   : > { %819 = vmatprep.subr.mxu0 %v413_v34  ;;  %890 = vmatprep.subr.mxu1 %v415_v35  ;;  %v582_v34 = vld [vmem:[#allocation5 + $0x7a0] sm:$0xff]  ;;  %v584_v35 = vld [vmem:[#allocation5 + $0x7b0] sm:$0xff] }
  0xbc   : > { %820 = vmatpush1.msra.mxu0 %v412_v36  ;;  %891 = vmatpush1.msra.mxu1 %v414_v37  ;;  %v573_v36 = vld [vmem:[#allocation5 + $0x758] sm:$0xff]  ;;  %v575_v37 = vld [vmem:[#allocation5 + $0x768] sm:$0xff] }
  0xbd   : > { %821 = vmatprep.subr.mxu0 %v403_v38  ;;  %892 = vmatprep.subr.mxu1 %v405_v39  ;;  %v572_v38 = vld [vmem:[#allocation5 + $0x750] sm:$0xff]  ;;  %v574_v39 = vld [vmem:[#allocation5 + $0x760] sm:$0xff] }
  0xbe   : > { %822 = vmatpush1.msra.mxu0 %v402_v40  ;;  %893 = vmatpush1.msra.mxu1 %v404_v41  ;;  %v563_v40 = vld [vmem:[#allocation5 + $0x708] sm:$0xff]  ;;  %v565_v41 = vld [vmem:[#allocation5 + $0x718] sm:$0xff] }
  0xbf   : > { %823 = vmatprep.subr.mxu0 %v393_v42  ;;  %894 = vmatprep.subr.mxu1 %v395_v43  ;;  %v562_v42 = vld [vmem:[#allocation5 + $0x700] sm:$0xff]  ;;  %v564_v43 = vld [vmem:[#allocation5 + $0x710] sm:$0xff] }
  0xc0   : > { %824 = vmatpush1.msra.mxu0 %v392_v44  ;;  %895 = vmatpush1.msra.mxu1 %v394_v45  ;;  %v553_v44 = vld [vmem:[#allocation5 + $0x6b8] sm:$0xff]  ;;  %v555_v45 = vld [vmem:[#allocation5 + $0x6c8] sm:$0xff] }
  0xc1   : > { %825 = vmatprep.subr.mxu0 %v383_v46  ;;  %896 = vmatprep.subr.mxu1 %v385_v47  ;;  %v552_v46 = vld [vmem:[#allocation5 + $0x6b0] sm:$0xff]  ;;  %v554_v47 = vld [vmem:[#allocation5 + $0x6c0] sm:$0xff] }
  0xc2   : > { %826 = vmatpush1.msra.mxu0 %v382_v48  ;;  %897 = vmatpush1.msra.mxu1 %v384_v49  ;;  %v543_v48 = vld [vmem:[#allocation5 + $0x668] sm:$0xff]  ;;  %v545_v49 = vld [vmem:[#allocation5 + $0x678] sm:$0xff] }
  0xc3   : > { %827 = vmatprep.subr.mxu0 %v373_v50  ;;  %898 = vmatprep.subr.mxu1 %v375_v51  ;;  %v542_v50 = vld [vmem:[#allocation5 + $0x660] sm:$0xff]  ;;  %v544_v51 = vld [vmem:[#allocation5 + $0x670] sm:$0xff] }
  0xc4   : > { %828 = vmatpush1.msra.mxu0 %v372_v52  ;;  %899 = vmatpush1.msra.mxu1 %v374_v53  ;;  %v533_v52 = vld [vmem:[#allocation5 + $0x618] sm:$0xff]  ;;  %v535_v53 = vld [vmem:[#allocation5 + $0x628] sm:$0xff] }
  0xc5   : > { %829 = vmatprep.subr.mxu0 %v363_v54  ;;  %900 = vmatprep.subr.mxu1 %v365_v55  ;;  %v532_v54 = vld [vmem:[#allocation5 + $0x610] sm:$0xff]  ;;  %v534_v55 = vld [vmem:[#allocation5 + $0x620] sm:$0xff] }
  0xc6   : > { %830 = vmatpush1.msra.mxu0 %v362_v57  ;;  %901 = vmatpush1.msra.mxu1 %v364_v58  ;;  %v523_v57 = vld [vmem:[#allocation5 + $0x5c8] sm:$0xff]  ;;  %v525_v58 = vld [vmem:[#allocation5 + $0x5d8] sm:$0xff] }
  0xc7   : > { %831 = vmatprep.subr.mxu0 %v353_v59  ;;  %902 = vmatprep.subr.mxu1 %v355_v60  ;;  %v522_v59 = vld [vmem:[#allocation5 + $0x5c0] sm:$0xff]  ;;  %v513_v60 = vld [vmem:[#allocation5 + $0x578] sm:$0xff] }
  0xc8   : > { %832 = vmatpush1.msra.mxu0 %v352_v61  ;;  %903 = vmatpush1.msra.mxu1 %v354_v62  ;;  %v524_v61 = vld [vmem:[#allocation5 + $0x5d0] sm:$0xff] }
  0xc9   : > { %833 = vmatprep.subr.mxu0 %v343_v0  ;;  %904 = vmatprep.subr.mxu1 %v345_v1  ;;  %v512_v62 = vld [vmem:[#allocation5 + $0x570] sm:$0xff]  ;;  %v515_v0 = vld [vmem:[#allocation5 + $0x588] sm:$0xff] }
  0xca   : > { %834 = vmatpush1.msra.mxu0 %v342_v2  ;;  %905 = vmatpush1.msra.mxu1 %v344_v3  ;;  %v503_v1 = vld [vmem:[#allocation5 + $0x528] sm:$0xff]  ;;  %v514_v2 = vld [vmem:[#allocation5 + $0x580] sm:$0xff] }
  0xcb   : > { %835 = vmatprep.subr.mxu0 %v653_v4  ;;  %906 = vmatprep.subr.mxu1 %v655_v5  ;;  %v502_v3 = vld [vmem:[#allocation5 + $0x520] sm:$0xff]  ;;  %v505_v4 = vld [vmem:[#allocation5 + $0x538] sm:$0xff] }
  0xcc   : > { %836 = vmatpush2.msra.mxu0 %v652_v6  ;;  %907 = vmatpush2.msra.mxu1 %v654_v7  ;;  %v497_v5 = vld [vmem:[#allocation5 + $0x4f8] sm:$0xff]  ;;  %v496_v6 = vld [vmem:[#allocation5 + $0x4f0] sm:$0xff] }
  0xcd   : > { %837 = vmatprep.subr.mxu0 %v643_v8  ;;  %908 = vmatprep.subr.mxu1 %v645_v9  ;;  %v504_v7 = vld [vmem:[#allocation5 + $0x530] sm:$0xff]  ;;  %v487_v8 = vld [vmem:[#allocation5 + $0x4a8] sm:$0xff]  ;;  %v486_v9 = vld [vmem:[#allocation5 + $0x4a0] sm:$0xff] }
  0xce   : > { %838 = vmatpush2.msra.mxu0 %v642_v10  ;;  %909 = vmatpush2.msra.mxu1 %v644_v11  ;;  %v477_v10 = vld [vmem:[#allocation5 + $0x458] sm:$0xff]  ;;  %v476_v11 = vld [vmem:[#allocation5 + $0x450] sm:$0xff] }
  0xcf   : > { %839 = vmatprep.subr.mxu0 %v633_v12  ;;  %910 = vmatprep.subr.mxu1 %v635_v13  ;;  %v467_v12 = vld [vmem:[#allocation5 + $0x408] sm:$0xff]  ;;  %v466_v13 = vld [vmem:[#allocation5 + $0x400] sm:$0xff] }
  0xd0   : > { %840 = vmatpush2.msra.mxu0 %v632_v14  ;;  %911 = vmatpush2.msra.mxu1 %v634_v15  ;;  %v457_v14 = vld [vmem:[#allocation5 + $0x3b8] sm:$0xff]  ;;  %v456_v15 = vld [vmem:[#allocation5 + $0x3b0] sm:$0xff] }
  0xd1   : > { %841 = vmatprep.subr.mxu0 %v623_v16  ;;  %912 = vmatprep.subr.mxu1 %v625_v17  ;;  %v447_v16 = vld [vmem:[#allocation5 + $0x368] sm:$0xff]  ;;  %v446_v17 = vld [vmem:[#allocation5 + $0x360] sm:$0xff] }
  0xd2   : > { %842 = vmatpush2.msra.mxu0 %v622_v18  ;;  %913 = vmatpush2.msra.mxu1 %v624_v19  ;;  %v437_v18 = vld [vmem:[#allocation5 + $0x318] sm:$0xff]  ;;  %v436_v19 = vld [vmem:[#allocation5 + $0x310] sm:$0xff] }
  0xd3   : > { %843 = vmatprep.subr.mxu0 %v613_v20  ;;  %914 = vmatprep.subr.mxu1 %v615_v21  ;;  %v427_v20 = vld [vmem:[#allocation5 + $0x2c8] sm:$0xff]  ;;  %v426_v21 = vld [vmem:[#allocation5 + $0x2c0] sm:$0xff] }
  0xd4   : > { %844 = vmatpush2.msra.mxu0 %v612_v22  ;;  %915 = vmatpush2.msra.mxu1 %v614_v23  ;;  %v417_v22 = vld [vmem:[#allocation5 + $0x278] sm:$0xff]  ;;  %v407_v23 = vld [vmem:[#allocation5 + $0x228] sm:$0xff] }
  0xd5   : > { %845 = vmatprep.subr.mxu0 %v603_v24  ;;  %916 = vmatprep.subr.mxu1 %v605_v25  ;;  %v406_v24 = vld [vmem:[#allocation5 + $0x220] sm:$0xff]  ;;  %v397_v25 = vld [vmem:[#allocation5 + $0x1d8] sm:$0xff] }
  0xd6   : > { %846 = vmatpush2.msra.mxu0 %v602_v26  ;;  %917 = vmatpush2.msra.mxu1 %v604_v27  ;;  %v396_v26 = vld [vmem:[#allocation5 + $0x1d0] sm:$0xff]  ;;  %v387_v27 = vld [vmem:[#allocation5 + $0x188] sm:$0xff] }
  0xd7   : > { %847 = vmatprep.subr.mxu0 %v593_v28  ;;  %918 = vmatprep.subr.mxu1 %v595_v29  ;;  %v386_v28 = vld [vmem:[#allocation5 + $0x180] sm:$0xff]  ;;  %v377_v29 = vld [vmem:[#allocation5 + $0x138] sm:$0xff] }
  0xd8   : > { %848 = vmatpush2.msra.mxu0 %v592_v30  ;;  %919 = vmatpush2.msra.mxu1 %v594_v31  ;;  %v376_v30 = vld [vmem:[#allocation5 + $0x130] sm:$0xff]  ;;  %v367_v31 = vld [vmem:[#allocation5 + $0xe8] sm:$0xff] }
  0xd9   : > { %849 = vmatprep.subr.mxu0 %v583_v32  ;;  %920 = vmatprep.subr.mxu1 %v585_v33  ;;  %v366_v32 = vld [vmem:[#allocation5 + $0xe0] sm:$0xff]  ;;  %v357_v33 = vld [vmem:[#allocation5 + $0x98] sm:$0xff] }
  0xda   : > { %850 = vmatpush2.msra.mxu0 %v582_v34  ;;  %921 = vmatpush2.msra.mxu1 %v584_v35  ;;  %v356_v34 = vld [vmem:[#allocation5 + $0x90] sm:$0xff]  ;;  %v347_v35 = vld [vmem:[#allocation5 + $0x48] sm:$0xff] }
  0xdb   : > { %851 = vmatprep.subr.mxu0 %v573_v36  ;;  %922 = vmatprep.subr.mxu1 %v575_v37  ;;  %v346_v36 = vld [vmem:[#allocation5 + $0x40] sm:$0xff]  ;;  %v657_v37 = vld [vmem:[#allocation5 + $0x9f8] sm:$0xff] }
  0xdc   : > { %852 = vmatpush2.msra.mxu0 %v572_v38  ;;  %923 = vmatpush2.msra.mxu1 %v574_v39  ;;  %v656_v38 = vld [vmem:[#allocation5 + $0x9f0] sm:$0xff]  ;;  %v647_v39 = vld [vmem:[#allocation5 + $0x9a8] sm:$0xff] }
  0xdd   : > { %853 = vmatprep.subr.mxu0 %v563_v40  ;;  %924 = vmatprep.subr.mxu1 %v565_v41  ;;  %v646_v40 = vld [vmem:[#allocation5 + $0x9a0] sm:$0xff]  ;;  %v637_v41 = vld [vmem:[#allocation5 + $0x958] sm:$0xff] }
  0xde   : > { %854 = vmatpush2.msra.mxu0 %v562_v42  ;;  %925 = vmatpush2.msra.mxu1 %v564_v43  ;;  %v636_v42 = vld [vmem:[#allocation5 + $0x950] sm:$0xff]  ;;  %v627_v43 = vld [vmem:[#allocation5 + $0x908] sm:$0xff] }
  0xdf   : > { %855 = vmatprep.subr.mxu0 %v553_v44  ;;  %926 = vmatprep.subr.mxu1 %v555_v45  ;;  %v626_v44 = vld [vmem:[#allocation5 + $0x900] sm:$0xff]  ;;  %v617_v45 = vld [vmem:[#allocation5 + $0x8b8] sm:$0xff] }
  0xe0   : > { %856 = vmatpush2.msra.mxu0 %v552_v46  ;;  %927 = vmatpush2.msra.mxu1 %v554_v47  ;;  %v616_v46 = vld [vmem:[#allocation5 + $0x8b0] sm:$0xff]  ;;  %v607_v47 = vld [vmem:[#allocation5 + $0x868] sm:$0xff] }
  0xe1   : > { %857 = vmatprep.subr.mxu0 %v543_v48  ;;  %928 = vmatprep.subr.mxu1 %v545_v49  ;;  %v606_v48 = vld [vmem:[#allocation5 + $0x860] sm:$0xff]  ;;  %v597_v49 = vld [vmem:[#allocation5 + $0x818] sm:$0xff] }
  0xe2   : > { %858 = vmatpush2.msra.mxu0 %v542_v50  ;;  %929 = vmatpush2.msra.mxu1 %v544_v51  ;;  %v596_v50 = vld [vmem:[#allocation5 + $0x810] sm:$0xff]  ;;  %v587_v51 = vld [vmem:[#allocation5 + $0x7c8] sm:$0xff] }
  0xe3   : > { %859 = vmatprep.subr.mxu0 %v533_v52  ;;  %930 = vmatprep.subr.mxu1 %v535_v53  ;;  %v586_v52 = vld [vmem:[#allocation5 + $0x7c0] sm:$0xff]  ;;  %v577_v53 = vld [vmem:[#allocation5 + $0x778] sm:$0xff] }
  0xe4   : > { %860 = vmatpush2.msra.mxu0 %v532_v54  ;;  %931 = vmatpush2.msra.mxu1 %v534_v55  ;;  %v576_v54 = vld [vmem:[#allocation5 + $0x770] sm:$0xff]  ;;  %v567_v55 = vld [vmem:[#allocation5 + $0x728] sm:$0xff] }
  0xe5   : > { %861 = vmatprep.subr.mxu0 %v523_v57  ;;  %932 = vmatprep.subr.mxu1 %v525_v58  ;;  %v566_v57 = vld [vmem:[#allocation5 + $0x720] sm:$0xff]  ;;  %v557_v58 = vld [vmem:[#allocation5 + $0x6d8] sm:$0xff] }
  0xe6   : > { %862 = vmatpush2.msra.mxu0 %v522_v59  ;;  %867 = vmatprep.mubr.f32.mxu0 %v11538_v63  ;;  %v556_v59 = vld [vmem:[#allocation5 + $0x6d0] sm:$0xff] }
  0xe7   : > { %863 = vmatprep.subr.mxu0 %v513_v60  ;;  %933 = vmatpush2.msra.mxu1 %v524_v61  ;;  %v547_v60 = vld [vmem:[#allocation5 + $0x688] sm:$0xff]  ;;  %v546_v61 = vld [vmem:[#allocation5 + $0x680] sm:$0xff] }
  0xe8   : > { %864 = vmatpush2.msra.mxu0 %v512_v62  ;;  %934 = vmatprep.subr.mxu1 %v515_v0  ;;  %v537_v62 = vld [vmem:[#allocation5 + $0x638] sm:$0xff]  ;;  %v536_v0 = vld [vmem:[#allocation5 + $0x630] sm:$0xff] }
  0xe9   : > { %865 = vmatprep.subr.mxu0 %v503_v1  ;;  %935 = vmatpush2.msra.mxu1 %v514_v2  ;;  %v527_v1 = vld [vmem:[#allocation5 + $0x5e8] sm:$0xff]  ;;  %v526_v2 = vld [vmem:[#allocation5 + $0x5e0] sm:$0xff] }
  0xea   : > { %866 = vmatpush2.msra.mxu0 %v502_v3  ;;  %936 = vmatprep.subr.mxu1 %v505_v4  ;;  %v517_v3 = vld [vmem:[#allocation5 + $0x598] sm:$0xff]  ;;  %v516_v4 = vld [vmem:[#allocation5 + $0x590] sm:$0xff] }
  0xeb   : > { %868 = vmatmul.mubr.f32.vlgmr.msra.gmra.mxu0 %v11534_v56  ;;  %945 = vmatprep.subr.mxu0 %v497_v5  ;;  %v507_v5 = vld [vmem:[#allocation5 + $0x548] sm:$0xff] }
  0xec   : > { %946 = vmatpush1.msra.mxu0 %v496_v6  ;;  %937 = vmatpush2.msra.mxu1 %v504_v7  ;;  %v506_v6 = vld [vmem:[#allocation5 + $0x540] sm:$0xff] }
  0xed   : > { %947 = vmatprep.subr.mxu0 %v487_v8  ;;  %938 = vmatprep.mubr.f32.mxu1 %v11538_v63 }
  0xee   : > { %948 = vmatpush1.msra.mxu0 %v486_v9  ;;  %939 = vmatmul.mubr.f32.vlgmr.msra.gmra.mxu1 %v11534_v56 }
  0xef   : > { %949 = vmatprep.subr.mxu0 %v477_v10  ;;  %1009 = vmatprep.mubr.f32.mxu0 %v11538_v63  ;;  %v416_v63 = vld [vmem:[#allocation5 + $0x270] sm:$0xff] }
  0xf0   : > { %950 = vmatpush1.msra.mxu0 %v476_v11 }
  0xf1   : > { %951 = vmatprep.subr.mxu0 %v467_v12 }
  0xf2   : > { %952 = vmatpush1.msra.mxu0 %v466_v13 }
  0xf3   : > { %953 = vmatprep.subr.mxu0 %v457_v14 }
  0xf4   : > { %954 = vmatpush1.msra.mxu0 %v456_v15 }
  0xf5   : > { %955 = vmatprep.subr.mxu0 %v447_v16  ;;  %v14152_v16 = vmov 0.0  }
  0xf6   : > { %956 = vmatpush1.msra.mxu0 %v446_v17  ;;  %1186 = vmatprep.mubr.f32.mxu1 %v14152_v16 }
  0xf7   : > { %957 = vmatprep.subr.mxu0 %v437_v18 }
  0xf8   : > { %958 = vmatpush1.msra.mxu0 %v436_v19 }
  0xf9   : > { %959 = vmatprep.subr.mxu0 %v427_v20 }
  0xfa   : > { %960 = vmatpush1.msra.mxu0 %v426_v21 }
  0xfb   : > { %961 = vmatprep.subr.mxu0 %v417_v22 }
  0xfc   : > { %962 = vmatpush1.msra.mxu0 %v416_v63 }
  0xfd   : > { %963 = vmatprep.subr.mxu0 %v407_v23 }
  0xfe   : > { %964 = vmatpush1.msra.mxu0 %v406_v24 }
  0xff   : > { %965 = vmatprep.subr.mxu0 %v397_v25 }
 0x100   : > { %966 = vmatpush1.msra.mxu0 %v396_v26 }
 0x101   : > { %967 = vmatprep.subr.mxu0 %v387_v27 }
 0x102   : > { %968 = vmatpush1.msra.mxu0 %v386_v28 }
 0x103   : > { %969 = vmatprep.subr.mxu0 %v377_v29 }
 0x104   : > { %970 = vmatpush1.msra.mxu0 %v376_v30 }
 0x105   : > { %971 = vmatprep.subr.mxu0 %v367_v31 }
 0x106   : > { %972 = vmatpush1.msra.mxu0 %v366_v32 }
 0x107   : > { %973 = vmatprep.subr.mxu0 %v357_v33 }
 0x108   : > { %974 = vmatpush1.msra.mxu0 %v356_v34 }
 0x109   : > { %975 = vmatprep.subr.mxu0 %v347_v35 }
 0x10a   : > { %976 = vmatpush1.msra.mxu0 %v346_v36 }
 0x10b   : > { %977 = vmatprep.subr.mxu0 %v657_v37 }
 0x10c   : > { %978 = vmatpush2.msra.mxu0 %v656_v38 }
 0x10d   : > { %979 = vmatprep.subr.mxu0 %v647_v39 }
 0x10e   : > { %980 = vmatpush2.msra.mxu0 %v646_v40 }
 0x10f   : > { %981 = vmatprep.subr.mxu0 %v637_v41  ;;  %v10710_v41 = vld [vmem:[%s14142_s2 + $0x8] sm:$0xff] }
 0x110   : > { %982 = vmatpush2.msra.mxu0 %v636_v42 }
 0x111   : > { %983 = vmatprep.subr.mxu0 %v627_v43 }
 0x112   : > { %984 = vmatpush2.msra.mxu0 %v626_v44 }
 0x113   : > { %985 = vmatprep.subr.mxu0 %v617_v45 }
 0x114   : > { %986 = vmatpush2.msra.mxu0 %v616_v46 }
 0x115   : > { %987 = vmatprep.subr.mxu0 %v607_v47 }
 0x116   : > { %988 = vmatpush2.msra.mxu0 %v606_v48 }
 0x117   : > { %989 = vmatprep.subr.mxu0 %v597_v49 }
 0x118   : > { %990 = vmatpush2.msra.mxu0 %v596_v50 }
 0x119   : > { %991 = vmatprep.subr.mxu0 %v587_v51 }
 0x11a   : > { %992 = vmatpush2.msra.mxu0 %v586_v52 }
 0x11b   : > { %993 = vmatprep.subr.mxu0 %v577_v53 }
 0x11c   : > { %994 = vmatpush2.msra.mxu0 %v576_v54 }
 0x11d   : > { %995 = vmatprep.subr.mxu0 %v567_v55 }
 0x11e   : > { %996 = vmatpush2.msra.mxu0 %v566_v57 }
 0x11f   : > { %997 = vmatprep.subr.mxu0 %v557_v58 }
 0x120   : > { %998 = vmatpush2.msra.mxu0 %v556_v59 }
 0x121   : > { %999 = vmatprep.subr.mxu0 %v547_v60 }
 0x122   : > { %1000 = vmatpush2.msra.mxu0 %v546_v61 }
 0x123   : > { %1001 = vmatprep.subr.mxu0 %v537_v62 }
 0x124   : > { %1002 = vmatpush2.msra.mxu0 %v536_v0 }
 0x125   : > { %1003 = vmatprep.subr.mxu0 %v527_v1 }
 0x126   : > { %1004 = vmatpush2.msra.mxu0 %v526_v2  ;;  %v1017_v2 = vld [vmem:[%s14142_s2] sm:$0xff] }
 0x127   : > { %1005 = vmatprep.subr.mxu0 %v517_v3 }
 0x128   : > { %1006 = vmatpush2.msra.mxu0 %v516_v4 }
 0x129   : > { %1007 = vmatprep.subr.mxu0 %v507_v5 }
 0x12a   : > { %1008 = vmatpush2.msra.mxu0 %v506_v6 }
 0x12b   : > { %1010 = vmatmul.mubr.f32.vlgmr.msra.gmra.mxu0 %v11534_v56 }
 0x12c   : > { %2474 = vmatprep.mubr.f32.mxu0 %v14152_v16 }
 0x16a   : > { %v11550_v7 = vpop.f32.mrf.mxu0  ;;  %v11552_v8 = vpop.f32.mrf.mxu1 }
 0x16b   : > { %1070 = vrot.lane.b32.xlu1 %v11552_v8, %s11297_s4  ;;  %1066 = vrot.lane.b32.xlu0 %v11550_v7, %s11297_s4 }
 0x16c   : > { %v11562_v9 = vpop.f32.mrf.mxu0  ;;  %v11568_v56 = vpop.f32.mrf.mxu1 }
 0x16f   : > { %1035 = vrot.lane.b32.xlu1 %v11552_v8, %s11298_s30  ;;  %1031 = vrot.lane.b32.xlu0 %v11550_v7, %s11298_s30 }
 0x173   : > { %1033 = vrot.lane.b32.xlu1 %v11562_v9, %s11298_s30  ;;  %1068 = vrot.lane.b32.xlu0 %v11562_v9, %s11297_s4 }
 0x177   : > { %1072 = vrot.lane.b32.xlu0 %v11568_v56, %s11297_s4 }
 0x17b   : > { %1037 = vrot.lane.b32.xlu0 %v11568_v56, %s11298_s30 }
 0x1ab   : > { %v11574_v10 = vpop.f32.mrf.mxu0 }
 0x1ac   : > { %1074 = vrot.lane.b32.xlu1 %v11574_v10, %s11297_s4 }
 0x1ad   : > { %v11578_v11 = vpop.f32.mrf.mxu0 }
 0x1ae   : > { %1076 = vrot.lane.b32.xlu0 %v11578_v11, %s11297_s4  ;;  %v11582_v12 = vpop.f32.mrf.mxu1 }
 0x1b0   : > { %1078 = vrot.lane.b32.xlu1 %v11582_v12, %s11297_s4  ;;  %v11586_v13 = vpop.f32.mrf.mxu1 }
 0x1b2   : > { %1080 = vrot.lane.b32.xlu0 %v11586_v13, %s11297_s4 }
 0x1b4   : > { %1039 = vrot.lane.b32.xlu1 %v11574_v10, %s11298_s30 }
 0x1b6   : > { %1041 = vrot.lane.b32.xlu0 %v11578_v11, %s11298_s30 }
 0x1b8   : > { %1043 = vrot.lane.b32.xlu1 %v11582_v12, %s11298_s30 }
 0x1ba   : > { %1045 = vrot.lane.b32.xlu0 %v11586_v13, %s11298_s30 }
 0x1be   : > { %1861 = vrot.lane.b32.xlu0 %v11550_v7, %s11299_s9 }
 0x1c2   : > { %1867 = vrot.lane.b32.xlu0 %v11568_v56, %s11299_s9 }
 0x1c6   : > { %1871 = vrot.lane.b32.xlu0 %v11578_v11, %s11299_s9 }
 0x1ca   : > { %1875 = vrot.lane.b32.xlu0 %v11586_v13, %s11299_s9 }
 0x1ce   : > { %2285 = vrot.lane.b32.xlu0 %v11550_v7, %s11300_s23 }
 0x1dd   : > { %v11608_v14 = vpop.permute.xlu0 %1066  ;;  %v1071_v24 = vpop.permute.xlu1 %1070 }
 0x1e1   : > { %v11610_v15 = vpop.permute.xlu0 %1031  ;;  %v11716_v26 = vpop.permute.xlu1 %1035 }
 0x1e5   : > { %v11614_v17 = vpop.permute.xlu0 %1068  ;;  %v11726_v28 = vpop.permute.xlu1 %1033 }
 0x1e6   : > { %v1085_v18 = vsel %vm1084_vm0, %v11608_v14, %v11614_v17  ;;  %v1086_v45 = vsel %vm1084_vm0, %v11614_v17, %v1071_v24  ;;  %v1050_v59 = vsel %vm1049_vm3, %v11610_v15, %v11726_v28  ;;  %v1051_v4 = vsel %vm1049_vm3, %v11726_v28, %v11716_v26  ;;  %v11902_v28 = vld [vmem:[%s14142_s2 + $0x18] sm:$0xff] }
 0x1e7   : > { %10711 = vmatprep.subr.msk.mxu1 %vm1100_vm1, %v1085_v18 }
 0x1e9   : > { %v11678_v21 = vpop.permute.xlu0 %1072 }
 0x1ea   : > { %v1087_v44 = vsel %vm1084_vm0, %v1071_v24, %v11678_v21 }
 0x1eb   : > { %v11620_v19 = vpop.f32.mrf.mxu0 }
 0x1ec   : > { %1082 = vrot.lane.b32.xlu1 %v11620_v19, %s11297_s4 }
 0x1ed   : > { %v11624_v20 = vpop.f32.mrf.mxu0  ;;  %v11686_v22 = vpop.permute.xlu0 %1037 }
 0x1ee   : > { %1019 = vrot.lane.b32.xlu0 %v11624_v20, %s11298_s30  ;;  %v1052_v0 = vsel %vm1049_vm3, %v11716_v26, %v11686_v22 }
 0x1f0   : > { %1063 = vrot.lane.b32.xlu1 %v11624_v20, %s11297_s4 }
 0x1f2   : > { %2289 = vrot.lane.b32.xlu0 %v11552_v8, %s11300_s23 }
 0x1f4   : > { %1047 = vrot.lane.b32.xlu1 %v11620_v19, %s11298_s30 }
 0x1f6   : > { %2295 = vrot.lane.b32.xlu0 %v11578_v11, %s11300_s23 }
 0x1f8   : > { %1863 = vrot.lane.b32.xlu1 %v11562_v9, %s11299_s9 }
 0x1fa   : > { %2299 = vrot.lane.b32.xlu0 %v11586_v13, %s11300_s23 }
 0x1fc   : > { %1865 = vrot.lane.b32.xlu1 %v11552_v8, %s11299_s9 }
 0x1fe   : > { %3098 = vrot.lane.b32.xlu0 %v11562_v9, %s11302_s10 }
 0x200   : > { %1869 = vrot.lane.b32.xlu1 %v11574_v10, %s11299_s9 }
 0x202   : > { %1858 = vrot.lane.b32.xlu0 %v11624_v20, %s11299_s9 }
 0x204   : > { %1873 = vrot.lane.b32.xlu1 %v11582_v12, %s11299_s9 }
 0x206   : > { %3102 = vrot.lane.b32.xlu0 %v11568_v56, %s11302_s10 }
 0x208   : > { %1877 = vrot.lane.b32.xlu1 %v11620_v19, %s11299_s9 }
 0x20a   : > { %3096 = vrot.lane.b32.xlu0 %v11550_v7, %s11302_s10 }
 0x20c   : > { %2287 = vrot.lane.b32.xlu1 %v11562_v9, %s11300_s23 }
 0x20e   : > { %3108 = vrot.lane.b32.xlu0 %v11582_v12, %s11302_s10 }
 0x210   : > { %2291 = vrot.lane.b32.xlu1 %v11568_v56, %s11300_s23 }
 0x212   : > { %3112 = vrot.lane.b32.xlu0 %v11620_v19, %s11302_s10 }
 0x214   : > { %2293 = vrot.lane.b32.xlu1 %v11574_v10, %s11300_s23 }
 0x216   : > { %2282 = vrot.lane.b32.xlu0 %v11624_v20, %s11300_s23 }
 0x218   : > { %2297 = vrot.lane.b32.xlu1 %v11582_v12, %s11300_s23 }
 0x21a   : > { %3522 = vrot.lane.b32.xlu0 %v11562_v9, %s11303_s11 }
 0x21c   : > { %2301 = vrot.lane.b32.xlu1 %v11620_v19, %s11300_s23 }
 0x21e   : > { %3520 = vrot.lane.b32.xlu0 %v11550_v7, %s11303_s11  ;;  %v1075_v30 = vpop.permute.xlu1 %1074 }
 0x21f   : > { %v1088_v49 = vsel %vm1084_vm0, %v11678_v21, %v1075_v30 }
 0x220   : > { %3100 = vrot.lane.b32.xlu1 %v11552_v8, %s11302_s10  ;;  %v11692_v63 = vpop.permute.xlu0 %1076 }
 0x221   : > { %v1089_v47 = vsel %vm1084_vm0, %v1075_v30, %v11692_v63 }
 0x222   : > { %3528 = vrot.lane.b32.xlu0 %v11574_v10, %s11303_s11  ;;  %v1079_v32 = vpop.permute.xlu1 %1078 }
 0x223   : > { %v1090_v53 = vsel %vm1084_vm0, %v11692_v63, %v1079_v32 }
 0x224   : > { %3104 = vrot.lane.b32.xlu1 %v11574_v10, %s11302_s10  ;;  %v11700_v23 = vpop.permute.xlu0 %1080 }
 0x225   : > { %v1091_v50 = vsel %vm1084_vm0, %v1079_v32, %v11700_v23 }
 0x226   : > { %3532 = vrot.lane.b32.xlu0 %v11582_v12, %s11303_s11  ;;  %v11750_v34 = vpop.permute.xlu1 %1039 }
 0x228   : > { %3106 = vrot.lane.b32.xlu1 %v11578_v11, %s11302_s10  ;;  %v11708_v25 = vpop.permute.xlu0 %1041 }
 0x229   : > { %v1054_v5 = vsel %vm1049_vm3, %v11750_v34, %v11708_v25 }
 0x22a   : > { %3536 = vrot.lane.b32.xlu0 %v11620_v19, %s11303_s11  ;;  %v11758_v36 = vpop.permute.xlu1 %1043 }
 0x22c   : > { %3110 = vrot.lane.b32.xlu1 %v11586_v13, %s11302_s10  ;;  %v11718_v27 = vpop.permute.xlu0 %1045 }
 0x22d   : > { %v1056_v17 = vsel %vm1049_vm3, %v11758_v36, %v11718_v27 }
 0x22e   : > { %3946 = vrot.lane.b32.xlu0 %v11562_v9, %s11304_s13 }
 0x230   : > { %3524 = vrot.lane.b32.xlu1 %v11552_v8, %s11303_s11  ;;  %v11728_v29 = vpop.permute.xlu0 %1861 }
 0x232   : > { %3950 = vrot.lane.b32.xlu0 %v11568_v56, %s11304_s13 }
 0x234   : > { %3526 = vrot.lane.b32.xlu1 %v11568_v56, %s11303_s11  ;;  %v11736_v31 = vpop.permute.xlu0 %1867 }
 0x236   : > { %3944 = vrot.lane.b32.xlu0 %v11550_v7, %s11304_s13 }
 0x238   : > { %3530 = vrot.lane.b32.xlu1 %v11578_v11, %s11303_s11  ;;  %v11744_v33 = vpop.permute.xlu0 %1871 }
 0x23a   : > { %3956 = vrot.lane.b32.xlu0 %v11582_v12, %s11304_s13 }
 0x23c   : > { %3534 = vrot.lane.b32.xlu1 %v11586_v13, %s11303_s11  ;;  %v11754_v35 = vpop.permute.xlu0 %1875 }
 0x23e   : > { %3960 = vrot.lane.b32.xlu0 %v11620_v19, %s11304_s13 }
 0x240   : > { %3948 = vrot.lane.b32.xlu1 %v11552_v8, %s11304_s13  ;;  %v11760_v37 = vpop.permute.xlu0 %2285 }
 0x242   : > { %4370 = vrot.lane.b32.xlu0 %v11562_v9, %s11305_s21 }
 0x244   : > { %3952 = vrot.lane.b32.xlu1 %v11574_v10, %s11304_s13 }
 0x246   : > { %4368 = vrot.lane.b32.xlu0 %v11550_v7, %s11305_s21 }
 0x248   : > { %3114 = vrot.lane.b32.xlu1 %v11624_v20, %s11302_s10 }
 0x24a   : > { %4376 = vrot.lane.b32.xlu0 %v11574_v10, %s11305_s21 }
 0x24c   : > { %3954 = vrot.lane.b32.xlu1 %v11578_v11, %s11304_s13 }
 0x24e   : > { %4380 = vrot.lane.b32.xlu0 %v11582_v12, %s11305_s21 }
 0x250   : > { %3538 = vrot.lane.b32.xlu1 %v11624_v20, %s11303_s11 }
 0x252   : > { %4384 = vrot.lane.b32.xlu0 %v11620_v19, %s11305_s21 }
 0x254   : > { %3958 = vrot.lane.b32.xlu1 %v11586_v13, %s11304_s13 }
 0x258   : > { %4372 = vrot.lane.b32.xlu1 %v11552_v8, %s11305_s21 }
 0x25c   : > { %3962 = vrot.lane.b32.xlu1 %v11624_v20, %s11304_s13 }
 0x25e   : > { %v1083_v38 = vpop.permute.xlu1 %1082 }
 0x25f   : > { %v1092_v58 = vsel %vm1084_vm0, %v11700_v23, %v1083_v38 }
 0x260   : > { %v11764_v39 = vpop.permute.xlu0 %1019  ;;  %4374 = vrot.lane.b32.xlu1 %v11568_v56, %s11305_s21 }
 0x261   : > { %v1060_v62 = vsel %vm1049_vm3, %v11764_v39, %v11610_v15  ;;  %v1053_v15 = vsel %vm1049_vm3, %v11686_v22, %v11750_v34  ;;  %v1055_v22 = vsel %vm1049_vm3, %v11708_v25, %v11758_v36 }
 0x262   : > { %v1064_v40 = vpop.permute.xlu1 %1063 }
 0x263   : > { %v1095_v42 = vsel %vm1084_vm0, %v1064_v40, %v11608_v14  ;;  %v1093_v54 = vsel %vm1084_vm0, %v1083_v38, %v1064_v40  ;;  %v10741_v40 = vld [vmem:[%s14142_s2 + $0x10] sm:$0xff] }
 0x264   : > { %v11773_v43 = vpop.permute.xlu0 %2289  ;;  %4378 = vrot.lane.b32.xlu1 %v11578_v11, %s11305_s21  ;;  %10712 = vmatpush1.msk.msra.mxu1 %vm1100_vm1, %v1095_v42 }
 0x265   : > { %10713 = vmatmul.mubr.msk.f32.vlgmr.msra.gmra.mxu1 %vm1096_vm2, %v10710_v41  ;;  %10714 = vmatprep.subr.msk.mxu1 %vm1100_vm1, %v1087_v44 }
 0x266   : > { %10715 = vmatpush1.msk.msra.mxu1 %vm1100_vm1, %v1086_v45  ;;  %v11785_v46 = vpop.permute.xlu1 %1047  ;;  %1257 = vmatprep.mubr.f32.mxu1 %v14152_v16 }
 0x267   : > { %10717 = vmatprep.subr.msk.mxu1 %vm1100_vm1, %v1089_v47  ;;  %v1058_v63 = vsel %vm1049_vm3, %v11785_v46, %v11764_v39  ;;  %v1057_v30 = vsel %vm1049_vm3, %v11718_v27, %v11785_v46  ;;  %v11966_v47 = vld [vmem:[%s14142_s2 + $0x20] sm:$0xff] }
 0x268   : > { %v11791_v48 = vpop.permute.xlu0 %2295  ;;  %4382 = vrot.lane.b32.xlu1 %v11586_v13, %s11305_s21 }
 0x269   : > { %10716 = vmatmul.mubr.msk.f32.vlgmr.msra.gmra.mxu1 %vm1096_vm2, %v10710_v41 }
 0x26a   : > { %10718 = vmatpush1.msk.msra.mxu1 %vm1100_vm1, %v1088_v49  ;;  %v11801_v51 = vpop.permute.xlu1 %1863  ;;  %1328 = vmatprep.mubr.f32.mxu1 %v14152_v16 }
 0x26b   : > { %10720 = vmatprep.subr.msk.mxu1 %vm1100_vm1, %v1091_v50  ;;  %v1880_v32 = vsel %vm1879_vm5, %v11728_v29, %v11801_v51 }
 0x26c   : > { %v11805_v52 = vpop.permute.xlu0 %2299  ;;  %4386 = vrot.lane.b32.xlu1 %v11624_v20, %s11305_s21 }
 0x26d   : > { %10719 = vmatmul.mubr.msk.f32.vlgmr.msra.gmra.mxu1 %vm1096_vm2, %v10710_v41 }
 0x26e   : > { %10721 = vmatpush1.msk.msra.mxu1 %vm1100_vm1, %v1090_v53  ;;  %v11814_v55 = vpop.permute.xlu1 %1865  ;;  %1399 = vmatprep.mubr.f32.mxu1 %v14152_v16 }
 0x26f   : > { %10723 = vmatprep.subr.msk.mxu1 %vm1100_vm1, %v1093_v54  ;;  %v1882_v38 = vsel %vm1879_vm5, %v11814_v55, %v11736_v31 }
 0x270   : > { %v11818_v57 = vpop.permute.xlu0 %3098 }
 0x271   : > { %10722 = vmatmul.mubr.msk.f32.vlgmr.msra.gmra.mxu1 %vm1096_vm2, %v10710_v41 }
 0x272   : > { %10724 = vmatpush1.msk.msra.mxu1 %vm1100_vm1, %v1092_v58  ;;  %v11827_v60 = vpop.permute.xlu1 %1869  ;;  %1470 = vmatprep.mubr.f32.mxu1 %v14152_v16 }
 0x273   : > { %10726 = vmatprep.subr.msk.mxu1 %vm1100_vm1, %v1050_v59  ;;  %v1884_v44 = vsel %vm1879_vm5, %v11827_v60, %v11744_v33  ;;  %v1883_v49 = vsel %vm1879_vm5, %v11736_v31, %v11827_v60 }
 0x274   : > { %v11831_v61 = vpop.permute.xlu0 %1858 }
 0x275   : > { %10725 = vmatmul.mubr.msk.f32.vlgmr.msra.gmra.mxu1 %vm1096_vm2, %v10710_v41  ;;  %v1890_v36 = vsel %vm1879_vm5, %v11831_v61, %v11728_v29 }
 0x276   : > { %10727 = vmatpush1.msk.msra.mxu1 %vm1100_vm1, %v1060_v62  ;;  %v11841_v1 = vpop.permute.xlu1 %1873  ;;  %1565 = vmatprep.mubr.f32.mxu1 %v14152_v16 }
 0x277   : > { %10729 = vmatprep.subr.msk.mxu1 %vm1100_vm1, %v1052_v0  ;;  %v1885_v31 = vsel %vm1879_vm5, %v11744_v33, %v11841_v1 }
 0x278   : > { %v11848_v3 = vpop.permute.xlu0 %3102 }
 0x279   : > { %10728 = vmatmul.mubr.msk.f32.vlgmr.msra.gmra.mxu1 %vm1096_vm2, %v1017_v2 }
 0x27a   : > { %10730 = vmatpush1.msk.msra.mxu1 %vm1100_vm1, %v1051_v4  ;;  %v11858_v6 = vpop.permute.xlu1 %1877  ;;  %1636 = vmatprep.mubr.f32.mxu1 %v14152_v16  ;;  %v12085_v4 = vld [vmem:[%s14142_s2 + $0x30] sm:$0xff] }
 0x27b   : > { %10732 = vmatprep.subr.msk.mxu1 %vm1100_vm1, %v1054_v5 }
 0x27c   : > { %v11862_v14 = vpop.permute.xlu0 %3096 }
 0x27d   : > { %10731 = vmatmul.mubr.msk.f32.vlgmr.msra.gmra.mxu1 %vm1096_vm2, %v1017_v2 }
 0x27e   : > { %10733 = vmatpush1.msk.msra.mxu1 %vm1100_vm1, %v1053_v15  ;;  %v11872_v18 = vpop.permute.xlu1 %2287  ;;  %1707 = vmatprep.mubr.f32.mxu1 %v14152_v16 }
 0x27f   : > { %10735 = vmatprep.subr.msk.mxu1 %vm1100_vm1, %v1056_v17  ;;  %v2305_v25 = vsel %vm2303_vm4, %v11872_v18, %v11773_v43 }
 0x280   : > { %v11876_v21 = vpop.permute.xlu0 %3108 }
 0x281   : > { %10734 = vmatmul.mubr.msk.f32.vlgmr.msra.gmra.mxu1 %vm1096_vm2, %v1017_v2 }
 0x282   : > { %10736 = vmatpush1.msk.msra.mxu1 %vm1100_vm1, %v1055_v22  ;;  %v11886_v23 = vpop.permute.xlu1 %2291  ;;  %1778 = vmatprep.mubr.f32.mxu1 %v14152_v16 }
 0x283   : > { %10738 = vmatprep.subr.msk.mxu1 %vm1100_vm1, %v1058_v63  ;;  %v2306_v24 = vsel %vm2303_vm4, %v11773_v43, %v11886_v23  ;;  %v1881_v43 = vsel %vm1879_vm5, %v11801_v51, %v11814_v55  ;;  %v1887_v51 = vsel %vm1879_vm5, %v11754_v35, %v11858_v6 }
 0x284   : > { %v11896_v26 = vpop.permute.xlu0 %3112  ;;  %10761 = vmatprep.subr.msk.mxu0 %vm1100_vm1, %v2306_v24 }
 0x285   : > { %10737 = vmatmul.mubr.msk.f32.vlgmr.msra.gmra.mxu1 %vm1096_vm2, %v1017_v2  ;;  %10762 = vmatpush1.msk.msra.mxu0 %vm1100_vm1, %v2305_v25 }
 0x286   : > { %10739 = vmatpush1.msk.msra.mxu1 %vm1100_vm1, %v1057_v30  ;;  %v11913_v34 = vpop.permute.xlu1 %2293  ;;  %1849 = vmatprep.mubr.f32.mxu1 %v14152_v16 }
 0x287   : > { %10742 = vmatprep.subr.msk.mxu1 %vm1100_vm1, %v1880_v32  ;;  %10763 = vmatmul.mubr.msk.f32.vlgmr.msra.gmra.mxu0 %vm1096_vm2, %v11902_v28  ;;  %v2308_v59 = vsel %vm2303_vm4, %v11913_v34, %v11791_v48 }
 0x288   : > { %v11919_v27 = vpop.permute.xlu0 %2282  ;;  %2616 = vmatprep.mubr.f32.mxu0 %v14152_v16 }
 0x289   : > { %10740 = vmatmul.mubr.msk.f32.vlgmr.msra.gmra.mxu1 %vm1096_vm2, %v1017_v2  ;;  %v2314_v55 = vsel %vm2303_vm4, %v11919_v27, %v11760_v37 }
 0x28a   : > { %10743 = vmatpush1.msk.msra.mxu1 %vm1100_vm1, %v1890_v36  ;;  %v2298_v39 = vpop.permute.xlu1 %2297  ;;  %1979 = vmatprep.mubr.f32.mxu1 %v14152_v16 }
 0x28b   : > { %10745 = vmatprep.subr.msk.mxu1 %vm1100_vm1, %v1882_v38  ;;  %v2309_v29 = vsel %vm2303_vm4, %v11791_v48, %v2298_v39  ;;  %v2310_v41 = vsel %vm2303_vm4, %v2298_v39, %v11805_v52  ;;  %v2307_v48 = vsel %vm2303_vm4, %v11886_v23, %v11913_v34 }
 0x28c   : > { %v11939_v42 = vpop.permute.xlu0 %3522  ;;  %10767 = vmatprep.subr.msk.mxu0 %vm1100_vm1, %v2310_v41 }
 0x28d   : > { %10744 = vmatmul.mubr.msk.f32.vlgmr.msra.gmra.mxu1 %vm1096_vm2, %v10741_v40  ;;  %10768 = vmatpush1.msk.msra.mxu0 %vm1100_vm1, %v2309_v29 }
 0x28e   : > { %10746 = vmatpush1.msk.msra.mxu1 %vm1100_vm1, %v1881_v43  ;;  %10769 = vmatmul.mubr.msk.f32.vlgmr.msra.gmra.mxu0 %vm1096_vm2, %v11902_v28  ;;  %v11953_v45 = vpop.permute.xlu1 %2301 }
 0x28f   : > { %10748 = vmatprep.subr.msk.mxu1 %vm1100_vm1, %v1884_v44  ;;  %10774 = vmatprep.subr.msk.mxu0 %vm1100_vm1, %v11562_v9  ;;  %v2312_v62 = vsel %vm2303_vm4, %v11953_v45, %v11919_v27  ;;  %v2311_v5 = vsel %vm2303_vm4, %v11805_v52, %v11953_v45 }
 0x290   : > { %10775 = vmatpush1.msk.msra.mxu0 %vm1100_vm1, %v11550_v7  ;;  %v11960_v46 = vpop.permute.xlu0 %3520  ;;  %2050 = vmatprep.mubr.f32.mxu1 %v14152_v16  ;;  %v1886_v7 = vsel %vm1879_vm5, %v11841_v1, %v11754_v35  ;;  %v12036_v35 = vld [vmem:[%s14142_s2 + $0x28] sm:$0xff] }
 0x291   : > { %10780 = vmatprep.subr.msk.mxu0 %vm1100_vm1, %v11578_v11  ;;  %10747 = vmatmul.mubr.msk.f32.vlgmr.msra.gmra.mxu1 %vm1096_vm2, %v10741_v40  ;;  %v3541_v2 = vsel %vm3540_vm7, %v11960_v46, %v11939_v42 }
 0x292   : > { %10749 = vmatpush1.msk.msra.mxu1 %vm1100_vm1, %v1883_v49  ;;  %2793 = vmatprep.mubr.f32.mxu0 %v14152_v16  ;;  %v11979_v9 = vpop.permute.xlu1 %3100 }
 0x293   : > { %10751 = vmatprep.subr.msk.mxu1 %vm1100_vm1, %v1886_v7  ;;  %10776 = vmatmul.mubr.msk.f32.vlgmr.msra.gmra.mxu0 %vm1096_vm2, %v11966_v47  ;;  %v3119_v54 = vsel %vm3116_vm6, %v11979_v9, %v11848_v3 }
 0x294   : > { %10781 = vmatpush1.msk.msra.mxu0 %vm1100_vm1, %v11574_v10  ;;  %v11986_v11 = vpop.permute.xlu0 %3528  ;;  %2121 = vmatprep.mubr.f32.mxu1 %v14152_v16  ;;  %v1888_v10 = vsel %vm1879_vm5, %v11858_v6, %v11831_v61 }
 0x295   : > { %10786 = vmatprep.subr.msk.mxu0 %vm1100_vm1, %v11624_v20  ;;  %10750 = vmatmul.mubr.msk.f32.vlgmr.msra.gmra.mxu1 %vm1096_vm2, %v10741_v40 }
 0x296   : > { %10752 = vmatpush1.msk.msra.mxu1 %vm1100_vm1, %v1885_v31  ;;  %2935 = vmatprep.mubr.f32.mxu0 %v14152_v16  ;;  %v12000_v50 = vpop.permute.xlu1 %3104 }
 0x297   : > { %10754 = vmatprep.subr.msk.mxu1 %vm1100_vm1, %v1888_v10  ;;  %10782 = vmatmul.mubr.msk.f32.vlgmr.msra.gmra.mxu0 %vm1096_vm2, %v11966_v47  ;;  %v3120_v20 = vsel %vm3116_vm6, %v11848_v3, %v12000_v50 }
 0x298   : > { %10787 = vmatpush1.msk.msra.mxu0 %vm1100_vm1, %v11620_v19  ;;  %v12010_v33 = vpop.permute.xlu0 %3532  ;;  %2192 = vmatprep.mubr.f32.mxu1 %v14152_v16  ;;  %v2304_v19 = vsel %vm2303_vm4, %v11760_v37, %v11872_v18 }
 0x299   : > { %10793 = vmatprep.subr.msk.mxu0 %vm1100_vm1, %v3120_v20  ;;  %10753 = vmatmul.mubr.msk.f32.vlgmr.msra.gmra.mxu1 %vm1096_vm2, %v10741_v40 }
 0x29a   : > { %10755 = vmatpush1.msk.msra.mxu1 %vm1100_vm1, %v1887_v51  ;;  %3077 = vmatprep.mubr.f32.mxu0 %v14152_v16  ;;  %v12023_v53 = vpop.permute.xlu1 %3106 }
 0x29b   : > { %10758 = vmatprep.subr.msk.mxu1 %vm1100_vm1, %v2304_v19  ;;  %10788 = vmatmul.mubr.msk.f32.vlgmr.msra.gmra.mxu0 %vm1096_vm2, %v11966_v47  ;;  %v3122_v22 = vsel %vm3116_vm6, %v12023_v53, %v11876_v21  ;;  %v3121_v23 = vsel %vm3116_vm6, %v12000_v50, %v12023_v53  ;;  %v10837_v19 = vld [vmem:[%s14142_s2 + $0x40] sm:$0xff] }
 0x29c   : > { %10794 = vmatpush1.msk.msra.mxu0 %vm1100_vm1, %v3119_v54  ;;  %2263 = vmatprep.mubr.f32.mxu1 %v14152_v16  ;;  %v12043_v58 = vpop.permute.xlu0 %3536 }
 0x29d   : > { %10756 = vmatmul.mubr.msk.f32.vlgmr.msra.gmra.mxu1 %vm1096_vm2, %v10741_v40  ;;  %3288 = vmatprep.mubr.f32.mxu0 %v14152_v16 }
 0x29e   : > { %10759 = vmatpush1.msk.msra.mxu1 %vm1100_vm1, %v2314_v55  ;;  %v3111_v60 = vpop.permute.xlu1 %3110  ;;  %2403 = vmatprep.mubr.f32.mxu1 %v14152_v16 }
 0x29f   : > { %10764 = vmatprep.subr.msk.mxu1 %vm1100_vm1, %v2308_v59  ;;  %v3123_v37 = vsel %vm3116_vm6, %v11876_v21, %v3111_v60  ;;  %v3124_v61 = vsel %vm3116_vm6, %v3111_v60, %v11896_v26  ;;  %10795 = vmatmul.mubr.msk.f32.vlgmr.msra.gmra.mxu0 %vm1096_vm2, %v12036_v35 }
 0x2a0   : > { %10799 = vmatprep.subr.msk.mxu0 %vm1100_vm1, %v3124_v61  ;;  %3430 = vmatprep.mubr.f32.mxu0 %v14152_v16  ;;  %v12078_v3 = vpop.permute.xlu0 %3946 }
 0x2a1   : > { %10760 = vmatmul.mubr.msk.f32.vlgmr.msra.gmra.mxu1 %vm1096_vm2, %v11902_v28  ;;  %10800 = vmatpush1.msk.msra.mxu0 %vm1100_vm1, %v3123_v37 }
 0x2a2   : > { %10765 = vmatpush1.msk.msra.mxu1 %vm1100_vm1, %v2307_v48  ;;  %v3525_v0 = vpop.permute.xlu1 %3524  ;;  %2545 = vmatprep.mubr.f32.mxu1 %v14152_v16 }
 0x2a3   : > { %10770 = vmatprep.subr.msk.mxu1 %vm1100_vm1, %v2312_v62  ;;  %v3542_v1 = vsel %vm3540_vm7, %v11939_v42, %v3525_v0  ;;  %10801 = vmatmul.mubr.msk.f32.vlgmr.msra.gmra.mxu0 %vm1096_vm2, %v12036_v35 }
 0x2a4   : > { %10806 = vmatprep.subr.msk.mxu0 %vm1100_vm1, %v3542_v1  ;;  %3641 = vmatprep.mubr.f32.mxu0 %v14152_v16  ;;  %v12102_v52 = vpop.permute.xlu0 %3950 }
 0x2a5   : > { %10766 = vmatmul.mubr.msk.f32.vlgmr.msra.gmra.mxu1 %vm1096_vm2, %v11902_v28  ;;  %10807 = vmatpush1.msk.msra.mxu0 %vm1100_vm1, %v3541_v2 }
 0x2a6   : > { %10771 = vmatpush1.msk.msra.mxu1 %vm1100_vm1, %v2311_v5  ;;  %v3527_v6 = vpop.permute.xlu1 %3526  ;;  %2687 = vmatprep.mubr.f32.mxu1 %v14152_v16 }
 0x2a7   : > { %10777 = vmatprep.subr.msk.mxu1 %vm1100_vm1, %v11568_v56  ;;  %10808 = vmatmul.mubr.msk.f32.vlgmr.msra.gmra.mxu0 %vm1096_vm2, %v12085_v4  ;;  %v3544_v32 = vsel %vm3540_vm7, %v3527_v6, %v11986_v11  ;;  %v3543_v34 = vsel %vm3540_vm7, %v3525_v0, %v3527_v6 }
 0x2a8   : > { %3783 = vmatprep.mubr.f32.mxu0 %v14152_v16  ;;  %v12126_v18 = vpop.permute.xlu0 %3944 }
 0x2a9   : > { %10772 = vmatmul.mubr.msk.f32.vlgmr.msra.gmra.mxu1 %vm1096_vm2, %v11902_v28  ;;  %v3965_v41 = vsel %vm3964_vm8, %v12126_v18, %v12078_v3 }
 0x2aa   : > { %10778 = vmatpush1.msk.msra.mxu1 %vm1100_vm1, %v11552_v8  ;;  %v3531_v15 = vpop.permute.xlu1 %3530  ;;  %2864 = vmatprep.mubr.f32.mxu1 %v14152_v16  ;;  %v3118_v8 = vsel %vm3116_vm6, %v11818_v57, %v11979_v9 }
 0x2ab   : > { %10783 = vmatprep.subr.msk.mxu1 %vm1100_vm1, %v11586_v13  ;;  %v3545_v56 = vsel %vm3540_vm7, %v11986_v11, %v3531_v15  ;;  %v3546_v17 = vsel %vm3540_vm7, %v3531_v15, %v12010_v33 }
 0x2ac   : > { %10812 = vmatprep.subr.msk.mxu0 %vm1100_vm1, %v3546_v17 }
 0x2ad   : > { %10779 = vmatmul.mubr.msk.f32.vlgmr.msra.gmra.mxu1 %vm1096_vm2, %v11966_v47  ;;  %10813 = vmatpush1.msk.msra.mxu0 %vm1100_vm1, %v3545_v56 }
 0x2ae   : > { %10784 = vmatpush1.msk.msra.mxu1 %vm1100_vm1, %v11582_v12  ;;  %v3535_v13 = vpop.permute.xlu1 %3534  ;;  %3006 = vmatprep.mubr.f32.mxu1 %v14152_v16  ;;  %v3117_v12 = vsel %vm3116_vm6, %v11862_v14, %v11818_v57  ;;  %v3957_v57 = vpop.permute.xlu0 %3956 }
 0x2af   : > { %10790 = vmatprep.subr.msk.mxu1 %vm1100_vm1, %v3118_v8  ;;  %10814 = vmatmul.mubr.msk.f32.vlgmr.msra.gmra.mxu0 %vm1096_vm2, %v12085_v4 }
 0x2b0   : > { %3925 = vmatprep.mubr.f32.mxu0 %v14152_v16 }
 0x2b1   : > { %10785 = vmatmul.mubr.msk.f32.vlgmr.msra.gmra.mxu1 %vm1096_vm2, %v11966_v47  ;;  %v10821_v47 = vld [vmem:[%s14142_s2 + $0x38] sm:$0xff] }
 0x2b2   : > { %10791 = vmatpush1.msk.msra.mxu1 %vm1100_vm1, %v3117_v12  ;;  %v3949_v63 = vpop.permute.xlu1 %3948  ;;  %3217 = vmatprep.mubr.f32.mxu1 %v14152_v16  ;;  %v3961_v30 = vpop.permute.xlu0 %3960 }
 0x2b3   : > { %10796 = vmatprep.subr.msk.mxu1 %vm1100_vm1, %v3122_v22  ;;  %v3966_v40 = vsel %vm3964_vm8, %v12078_v3, %v3949_v63  ;;  %v3967_v44 = vsel %vm3964_vm8, %v3949_v63, %v12102_v52 }
 0x2b5   : > { %10792 = vmatmul.mubr.msk.f32.vlgmr.msra.gmra.mxu1 %vm1096_vm2, %v12036_v35 }
 0x2b6   : > { %10797 = vmatpush1.msk.msra.mxu1 %vm1100_vm1, %v3121_v23  ;;  %v3953_v24 = vpop.permute.xlu1 %3952  ;;  %3359 = vmatprep.mubr.f32.mxu1 %v14152_v16  ;;  %v4371_v36 = vpop.permute.xlu0 %4370 }
 0x2b7   : > { %v3968_v42 = vsel %vm3964_vm8, %v12102_v52, %v3953_v24 }
 0x2b9   : > { %10798 = vmatmul.mubr.msk.f32.vlgmr.msra.gmra.mxu1 %vm1096_vm2, %v12036_v35 }
 0x2ba   : > { %v3115_v21 = vpop.permute.xlu1 %3114  ;;  %3501 = vmatprep.mubr.f32.mxu1 %v14152_v16  ;;  %v4369_v49 = vpop.permute.xlu0 %4368 }
 0x2bb   : > { %v3125_v25 = vsel %vm3116_vm6, %v11896_v26, %v3115_v21  ;;  %v3128_v28 = vsel %vm3116_vm6, %v3115_v21, %v11862_v14  ;;  %v3548_v14 = vsel %vm3540_vm7, %v3535_v13, %v12043_v58  ;;  %v3547_v26 = vsel %vm3540_vm7, %v12010_v33, %v3535_v13 }
 0x2bc   : > { %10802 = vmatprep.subr.msk.mxu1 %vm1100_vm1, %v3128_v28  ;;  %v4389_v20 = vsel %vm4388_vm9, %v4369_v49, %v4371_v36 }
 0x2bd   : > { %10803 = vmatpush1.msk.msra.mxu1 %vm1100_vm1, %v3125_v25 }
 0x2be   : > { %10804 = vmatmul.mubr.msk.f32.vlgmr.msra.gmra.mxu1 %vm1096_vm2, %v12036_v35  ;;  %10809 = vmatprep.subr.msk.mxu1 %vm1100_vm1, %v3544_v32  ;;  %v3955_v27 = vpop.permute.xlu1 %3954  ;;  %v4377_v10 = vpop.permute.xlu0 %4376 }
 0x2bf   : > { %10810 = vmatpush1.msk.msra.mxu1 %vm1100_vm1, %v3543_v34  ;;  %3712 = vmatprep.mubr.f32.mxu1 %v14152_v16  ;;  %v3970_v45 = vsel %vm3964_vm8, %v3955_v27, %v3957_v57  ;;  %v3969_v7 = vsel %vm3964_vm8, %v3953_v24, %v3955_v27 }
 0x2c0   : > { %10815 = vmatprep.subr.msk.mxu1 %vm1100_vm1, %v3548_v14 }
 0x2c2   : > { %10811 = vmatmul.mubr.msk.f32.vlgmr.msra.gmra.mxu1 %vm1096_vm2, %v12085_v4  ;;  %v3539_v38 = vpop.permute.xlu1 %3538  ;;  %v4381_v55 = vpop.permute.xlu0 %4380 }
 0x2c3   : > { %10816 = vmatpush1.msk.msra.mxu1 %vm1100_vm1, %v3547_v26  ;;  %v3549_v39 = vsel %vm3540_vm7, %v12043_v58, %v3539_v38  ;;  %v3552_v29 = vsel %vm3540_vm7, %v3539_v38, %v11960_v46  ;;  %3854 = vmatprep.mubr.f32.mxu1 %v14152_v16 }
 0x2c4   : > { %10822 = vmatprep.subr.msk.mxu1 %vm1100_vm1, %v3966_v40  ;;  %10818 = vmatprep.subr.msk.mxu0 %vm1100_vm1, %v3552_v29 }
 0x2c5   : > { %10819 = vmatpush1.msk.msra.mxu0 %vm1100_vm1, %v3549_v39 }
 0x2c6   : > { %10817 = vmatmul.mubr.msk.f32.vlgmr.msra.gmra.mxu1 %vm1096_vm2, %v12085_v4  ;;  %10820 = vmatmul.mubr.msk.f32.vlgmr.msra.gmra.mxu0 %vm1096_vm2, %v12085_v4  ;;  %v3959_v43 = vpop.permute.xlu1 %3958  ;;  %v4385_v37 = vpop.permute.xlu0 %4384 }
 0x2c7   : > { %10823 = vmatpush1.msk.msra.mxu1 %vm1100_vm1, %v3965_v41  ;;  %10825 = vmatprep.subr.msk.mxu0 %vm1100_vm1, %v3968_v42  ;;  %v3972_v46 = vsel %vm3964_vm8, %v3959_v43, %v3961_v30  ;;  %v3971_v11 = vsel %vm3964_vm8, %v3957_v57, %v3959_v43 }
 0x2c8   : > { %10826 = vmatpush1.msk.msra.mxu0 %vm1100_vm1, %v3967_v44  ;;  %10828 = vmatprep.subr.msk.mxu1 %vm1100_vm1, %v3970_v45 }
 0x2c9   : > { %10831 = vmatprep.subr.msk.mxu0 %vm1100_vm1, %v3972_v46  ;;  %4065 = vmatprep.mubr.f32.mxu1 %v14152_v16 }
 0x2ca   : > { %4136 = vmatprep.mubr.f32.mxu0 %v14152_v16  ;;  %10824 = vmatmul.mubr.msk.f32.vlgmr.msra.gmra.mxu1 %vm1096_vm2, %v10821_v47  ;;  %v4373_v9 = vpop.permute.xlu1 %4372 }
 0x2cb   : > { %10827 = vmatmul.mubr.msk.f32.vlgmr.msra.gmra.mxu0 %vm1096_vm2, %v10821_v47  ;;  %10829 = vmatpush1.msk.msra.mxu1 %vm1100_vm1, %v3969_v7  ;;  %v4390_v31 = vsel %vm4388_vm9, %v4371_v36, %v4373_v9 }
 0x2cc   : > { %10832 = vmatpush1.msk.msra.mxu0 %vm1100_vm1, %v3971_v11  ;;  %4207 = vmatprep.mubr.f32.mxu1 %v14152_v16 }
 0x2cd   : > { %10838 = vmatprep.subr.msk.mxu0 %vm1100_vm1, %v4390_v31  ;;  %4278 = vmatprep.mubr.f32.mxu0 %v14152_v16 }
 0x2ce   : > { %10830 = vmatmul.mubr.msk.f32.vlgmr.msra.gmra.mxu1 %vm1096_vm2, %v10821_v47  ;;  %v3963_v50 = vpop.permute.xlu1 %3962 }
 0x2cf   : > { %10833 = vmatmul.mubr.msk.f32.vlgmr.msra.gmra.mxu0 %vm1096_vm2, %v10821_v47  ;;  %v3973_v33 = vsel %vm3964_vm8, %v3961_v30, %v3963_v50  ;;  %v3976_v51 = vsel %vm3964_vm8, %v3963_v50, %v12126_v18  ;;  %4349 = vmatprep.mubr.f32.mxu1 %v14152_v16 }
 0x2d0   : > { %10839 = vmatpush1.msk.msra.mxu0 %vm1100_vm1, %v4389_v20  ;;  %10834 = vmatprep.subr.msk.mxu1 %vm1100_vm1, %v3976_v51 }
 0x2d1   : > { %10835 = vmatpush1.msk.msra.mxu1 %vm1100_vm1, %v3973_v33  ;;  %4489 = vmatprep.mubr.f32.mxu0 %v14152_v16 }
 0x2d2   : > { %10836 = vmatmul.mubr.msk.f32.vlgmr.msra.gmra.mxu1 %vm1096_vm2, %v10821_v47  ;;  %v4375_v53 = vpop.permute.xlu1 %4374 }
 0x2d3   : > { %10840 = vmatmul.mubr.msk.f32.vlgmr.msra.gmra.mxu0 %vm1096_vm2, %v10837_v19  ;;  %v4391_v54 = vsel %vm4388_vm9, %v4373_v9, %v4375_v53  ;;  %v4392_v35 = vsel %vm4388_vm9, %v4375_v53, %v4377_v10  ;;  %4560 = vmatprep.mubr.f32.mxu1 %v14152_v16 }
 0x2d4   : > { %10841 = vmatprep.subr.msk.mxu1 %vm1100_vm1, %v4392_v35  ;;  %4631 = vmatprep.mubr.f32.mxu0 %v14152_v16 }
 0x2d5   : > { %10842 = vmatpush1.msk.msra.mxu1 %vm1100_vm1, %v4391_v54 }
 0x2d6   : > { %10843 = vmatmul.mubr.msk.f32.vlgmr.msra.gmra.mxu1 %vm1096_vm2, %v10837_v19  ;;  %v4379_v58 = vpop.permute.xlu1 %4378 }
 0x2d7   : > { %v4393_v59 = vsel %vm4388_vm9, %v4377_v10, %v4379_v58  ;;  %v4394_v60 = vsel %vm4388_vm9, %v4379_v58, %v4381_v55  ;;  %4702 = vmatprep.mubr.f32.mxu1 %v14152_v16 }
 0x2d8   : > { %10844 = vmatprep.subr.msk.mxu0 %vm1100_vm1, %v4394_v60 }
 0x2d9   : > { %10845 = vmatpush1.msk.msra.mxu0 %vm1100_vm1, %v4393_v59 }
 0x2da   : > { %10846 = vmatmul.mubr.msk.f32.vlgmr.msra.gmra.mxu0 %vm1096_vm2, %v10837_v19  ;;  %v4383_v61 = vpop.permute.xlu1 %4382 }
 0x2db   : > { %v4395_v48 = vsel %vm4388_vm9, %v4381_v55, %v4383_v61  ;;  %v4396_v62 = vsel %vm4388_vm9, %v4383_v61, %v4385_v37  ;;  %4773 = vmatprep.mubr.f32.mxu0 %v14152_v16 }
 0x2dc   : > { %10847 = vmatprep.subr.msk.mxu1 %vm1100_vm1, %v4396_v62 }
 0x2dd   : > { %10848 = vmatpush1.msk.msra.mxu1 %vm1100_vm1, %v4395_v48 }
 0x2de   : > { %10849 = vmatmul.mubr.msk.f32.vlgmr.msra.gmra.mxu1 %vm1096_vm2, %v10837_v19  ;;  %v4387_v0 = vpop.permute.xlu1 %4386  ;;  %10919 = vmatprep.subr.mxu1 %v14152_v16 }
 0x2df   : > { %v4397_v1 = vsel %vm4388_vm9, %v4385_v37, %v4387_v0  ;;  %v4400_v2 = vsel %vm4388_vm9, %v4387_v0, %v4369_v49 }
 0x2e0   : > { %10850 = vmatprep.subr.msk.mxu0 %vm1100_vm1, %v4400_v2 }
 0x2e1   : > { %10851 = vmatpush1.msk.msra.mxu0 %vm1100_vm1, %v4397_v1  ;;  %vm9037_vm1 = vcmask 162816  }
 0x2e2   : > { %10852 = vmatmul.mubr.msk.f32.vlgmr.msra.gmra.mxu0 %vm1096_vm2, %v10837_v19 }
 0x2e3   : > { %5232 = vmatprep.mubr.f32.mxu0 %v14152_v16 }
 0x325   : > { %v1188_v3 = vpop.f32.mrf.mxu1 }
 0x327   : > { %v1190_v4 = vpop.f32.mrf.mxu1 }
 0x329   : > { %v1259_v5 = vpop.f32.mrf.mxu1 }
 0x32b   : > { %v1261_v6 = vpop.f32.mrf.mxu1 }
 0x32d   : > { %v1330_v52 = vpop.f32.mrf.mxu1 }
 0x32f   : > { %v1332_v15 = vpop.f32.mrf.mxu1 }
 0x331   : > { %v1401_v56 = vpop.f32.mrf.mxu1 }
 0x333   : > { %v1403_v17 = vpop.f32.mrf.mxu1 }
 0x335   : > { %v1472_v8 = vpop.f32.mrf.mxu1 }
 0x337   : > { %v1474_v13 = vpop.f32.mrf.mxu1 }
 0x339   : > { %v1567_v18 = vpop.f32.mrf.mxu1 }
 0x33a   : > { %v12257_v12 = vadd.f32 %v1567_v18, %v1188_v3 }
 0x33b   : > { %v1569_v22 = vpop.f32.mrf.mxu1 }
 0x33c   : > { %v12259_v63 = vadd.f32 %v1569_v22, %v1190_v4 }
 0x33d   : > { %v1638_v23 = vpop.f32.mrf.mxu1 }
 0x33e   : > { %v12261_v57 = vadd.f32 %v1638_v23, %v1259_v5 }
 0x33f   : > { %v1640_v24 = vpop.f32.mrf.mxu1 }
 0x340   : > { %v12263_v21 = vadd.f32 %v1640_v24, %v1261_v6 }
 0x341   : > { %v1709_v25 = vpop.f32.mrf.mxu1 }
 0x342   : > { %v12265_v28 = vadd.f32 %v1709_v25, %v1330_v52 }
 0x343   : > { %v1711_v30 = vpop.f32.mrf.mxu1 }
 0x344   : > { %v12267_v32 = vadd.f32 %v1711_v30, %v1332_v15 }
 0x345   : > { %v1780_v34 = vpop.f32.mrf.mxu1 }
 0x346   : > { %v12269_v27 = vadd.f32 %v1780_v34, %v1401_v56 }
 0x347   : > { %v1782_v14 = vpop.f32.mrf.mxu1  ;;  %v12273_v36 = vpop.f32.mrf.mxu0 }
 0x348   : > { %v12271_v26 = vadd.f32 %v1782_v14, %v1403_v17 }
 0x349   : > { %v1851_v38 = vpop.f32.mrf.mxu1  ;;  %v12279_v41 = vpop.f32.mrf.mxu0 }
 0x34a   : > { %v12275_v39 = vadd.f32 %v1851_v38, %v1472_v8  ;;  %v4792_v8 = vlaneseq }
 0x34b   : > { %v1853_v40 = vpop.f32.mrf.mxu1 }
 0x34c   : > { %v12277_v29 = vadd.f32 %v1853_v40, %v1474_v13  ;;  %v12331_v23 = vshrl.u32 %v4792_v8, 7 }
 0x34d   : > { %v1981_v42 = vpop.f32.mrf.mxu1 }
 0x34e   : > { %v12281_v43 = vpop.f32.mrf.mxu0  ;;  %14201 = vst [vmem:[#allocation19_spill] sm:$0xff] %v12331_v23  ;;  %v2270_v24 = vadd.f32 %v1981_v42, %v12257_v12  ;;  %v14154_v16 = vsub.s32 0, %v12331_v23 }
 0x34f   : > { %v1983_v44 = vpop.f32.mrf.mxu1 }
 0x350   : > { %v12283_v46 = vpop.f32.mrf.mxu0  ;;  %v2271_v34 = vadd.f32 %v1983_v44, %v12259_v63 }
 0x351   : > { %v2052_v45 = vpop.f32.mrf.mxu1 }
 0x353   : > { %v2054_v47 = vpop.f32.mrf.mxu1  ;;  %v2795_v49 = vpop.f32.mrf.mxu0 }
 0x354   : > { %v2273_v63 = vadd.f32 %v2054_v47, %v12263_v21  ;;  %v4810_v47 = vsub.s32 4, %v12331_v23 }
 0x355   : > { %v2123_v7 = vpop.f32.mrf.mxu1  ;;  %v12285_v9 = vpop.f32.mrf.mxu0 }
 0x357   : > { %v2125_v11 = vpop.f32.mrf.mxu1  ;;  %v12287_v31 = vpop.f32.mrf.mxu0 }
 0x359   : > { %v2194_v10 = vpop.f32.mrf.mxu1  ;;  %v12291_v20 = vpop.f32.mrf.mxu0 }
 0x35b   : > { %v12289_v50 = vpop.f32.mrf.mxu1  ;;  %v12297_v19 = vpop.f32.mrf.mxu0 }
 0x35d   : > { %v12293_v33 = vpop.f32.mrf.mxu1  ;;  %v12299_v35 = vpop.f32.mrf.mxu0 }
 0x35f   : > { %v12295_v51 = vpop.f32.mrf.mxu1  ;;  %v12301_v59 = vpop.f32.mrf.mxu0 }
 0x361   : > { %v2405_v53 = vpop.f32.mrf.mxu1  ;;  %v12307_v61 = vpop.f32.mrf.mxu0 }
 0x362   : > { %v2694_v14 = vadd.f32 %v2405_v53, %v2270_v24 }
 0x363   : > { %v2407_v54 = vpop.f32.mrf.mxu1  ;;  %v12309_v0 = vpop.f32.mrf.mxu0 }
 0x364   : > { %14197 = vst [vmem:[#allocation15_spill] sm:$0xff] %v12309_v0  ;;  %v2695_v12 = vadd.f32 %v2407_v54, %v2271_v34  ;;  %v3084_v44 = vadd.f32 %v2795_v49, %v2694_v14  ;;  %v2274_v54 = vadd.f32 %v2123_v7, %v12265_v28  ;;  %v2275_v49 = vadd.f32 %v2125_v11, %v12267_v32 }
 0x365   : > { %v2547_v55 = vpop.f32.mrf.mxu1  ;;  %v12315_v3 = vpop.f32.mrf.mxu0  ;;  %v2276_v14 = vadd.f32 %v2194_v10, %v12269_v27  ;;  %v2277_v28 = vadd.f32 %v12289_v50, %v12271_v26  ;;  %v4814_v26 = vsub.s32 5, %v12331_v23  ;;  %v4818_v11 = vsub.s32 6, %v12331_v23 }
 0x366   : > { %14198 = vst [vmem:[#allocation16_spill] sm:$0xff] %v12315_v3  ;;  %v2698_v7 = vadd.f32 %v2547_v55, %v2274_v54 }
 0x367   : > { %v2549_v58 = vpop.f32.mrf.mxu1  ;;  %v3643_v6 = vpop.f32.mrf.mxu0  ;;  %v2700_v10 = vadd.f32 %v12281_v43, %v2276_v14 }
 0x369   : > { %v12303_v60 = vpop.f32.mrf.mxu1  ;;  %v12321_v56 = vpop.f32.mrf.mxu0 }
 0x36b   : > { %v12305_v37 = vpop.f32.mrf.mxu1 }
 0x36d   : > { %v2866_v48 = vpop.f32.mrf.mxu1 }
 0x36f   : > { %v2868_v62 = vpop.f32.mrf.mxu1  ;;  %v12325_v13 = vpop.f32.mrf.mxu0 }
 0x371   : > { %v12311_v1 = vpop.f32.mrf.mxu1  ;;  %v12334_v25 = vpop.f32.mrf.mxu0 }
 0x372   : > { %14202 = vst [vmem:[#allocation20_spill] sm:$0xff] %v12334_v25 }
 0x373   : > { %v12313_v2 = vpop.f32.mrf.mxu1 }
 0x375   : > { %v3219_v4 = vpop.f32.mrf.mxu1 }
 0x377   : > { %v3221_v5 = vpop.f32.mrf.mxu1 }
 0x379   : > { %v12317_v52 = vpop.f32.mrf.mxu1 }
 0x37b   : > { %v12319_v15 = vpop.f32.mrf.mxu1 }
 0x37e   : > { %v12323_v17 = vpop.f32.mrf.mxu1 }
 0x37f   : > { %14199 = vst [vmem:[#allocation17_spill] sm:$0xff] %v12323_v17  ;;  %v12345_v17 = vld [vmem:[#allocation8] sm:$0xff] }
 0x380   : > { %v12327_v18 = vpop.f32.mrf.mxu1  ;;  %v12356_v24 = vrot.slane %v12345_v17, %v14154_v16  ;;  %v3085_v16 = vadd.f32 %v12285_v9, %v2695_v12 }
 0x381   : > { %14200 = vst [vmem:[#allocation18_spill] sm:$0xff] %v12327_v18  ;;  %v2272_v18 = vadd.f32 %v2052_v45, %v12261_v57  ;;  %v4802_v57 = vsub.s32 2, %v12331_v23  ;;  %v4806_v45 = vsub.s32 3, %v12331_v23 }
 0x382   : > { %v12329_v22 = vpop.f32.mrf.mxu1  ;;  %14207 = vst [vmem:[#allocation25_spill] sm:$0xff] %v12356_v24 }
 0x383   : > { %v2696_v8 = vadd.f32 %v12273_v36, %v2272_v18  ;;  %v2697_v36 = vadd.f32 %v12279_v41, %v2273_v63  ;;  %v12375_v0 = vrot.slane %v12345_v17, %v4802_v57  ;;  %v12378_v32 = vrot.slane %v12345_v17, %v4806_v45 }
 0x384   : > { %v12336_v30 = vpop.f32.mrf.mxu1  ;;  %v12383_v41 = vrot.slane %v12345_v17, %v4810_v47 }
 0x385   : > { %v3086_v18 = vadd.f32 %v2866_v48, %v2696_v8  ;;  %14210 = vst [vmem:[#allocation27_spill] sm:$0xff] %v12375_v0  ;;  %14211 = vst [vmem:[#allocation28_spill] sm:$0xff] %v12378_v32  ;;  %v3087_v27 = vadd.f32 %v2868_v62, %v2697_v36  ;;  %v2701_v48 = vadd.f32 %v12283_v46, %v2277_v28 }
 0x386   : > { %v12339_v38 = vpop.f32.mrf.mxu1  ;;  %v12341_v40 = vpop.f32.mrf.mxu0  ;;  %14212 = vst [vmem:[#allocation29_spill] sm:$0xff] %v12383_v41  ;;  %v2279_v62 = vadd.f32 %v12295_v51, %v12277_v29 }
 0x387   : > { %14203 = vst [vmem:[#allocation21_spill] sm:$0xff] %v12339_v38  ;;  %14204 = vst [vmem:[#allocation22_spill] sm:$0xff] %v12341_v40  ;;  %v3508_v40 = vadd.f32 %v3219_v4, %v3084_v44  ;;  %v3088_v4 = vadd.f32 %v12287_v31, %v2698_v7 }
 0x388   : > { %v12348_v42 = vpop.f32.mrf.mxu1  ;;  %v12350_v25 = vpop.f32.mrf.mxu0  ;;  %v2703_v46 = vadd.f32 %v12305_v37, %v2279_v62 }
 0x389   : > { %14205 = vst [vmem:[#allocation23_spill] sm:$0xff] %v12348_v42  ;;  %14206 = vst [vmem:[#allocation24_spill] sm:$0xff] %v12350_v25  ;;  %v14208_v25 = vsub.s32 1, %v12331_v23  ;;  %v3932_v50 = vadd.f32 %v3643_v6, %v3508_v40  ;;  %v3511_v40 = vadd.f32 %v12307_v61, %v3087_v27  ;;  %v3512_v29 = vadd.f32 %v12317_v52, %v3088_v4 }
 0x38a   : > { %v4067_v53 = vpop.f32.mrf.mxu1  ;;  %v12414_v61 = vrot.slane %v12345_v17, %v4814_v26 }
 0x38b   : > { %v4138_v34 = vpop.f32.mrf.mxu0  ;;  %v12365_v21 = vrot.slane %v12345_v17, %v14208_v25  ;;  %v2699_v25 = vadd.f32 %v2549_v58, %v2275_v49  ;;  %v4822_v58 = vsub.s32 7, %v12331_v23  ;;  %v14217_v49 = vld [vmem:[#allocation16_spill] sm:$0xff] }
 0x38c   : > { %v4069_v42 = vpop.f32.mrf.mxu1  ;;  %14213 = vst [vmem:[#allocation30_spill] sm:$0xff] %v12414_v61 }
 0x38d   : > { %14209 = vst [vmem:[#allocation26_spill] sm:$0xff] %v12365_v21  ;;  %v4140_v38 = vpop.f32.mrf.mxu0  ;;  %v3509_v21 = vadd.f32 %v3221_v5, %v3085_v16  ;;  %v2278_v16 = vadd.f32 %v12293_v33, %v12275_v39  ;;  %v3510_v5 = vadd.f32 %v12301_v59, %v3086_v18  ;;  %v3089_v12 = vadd.f32 %v12291_v20, %v2699_v25  ;;  %v14219_v18 = vld [vmem:[#allocation20_spill] sm:$0xff] }
 0x38e   : > { %v4209_v3 = vpop.f32.mrf.mxu1  ;;  %v4356_v33 = vadd.f32 %v4067_v53, %v3932_v50  ;;  %v3090_v59 = vadd.f32 %v12311_v1, %v2700_v10  ;;  %v3935_v53 = vadd.f32 %v12336_v30, %v3511_v40  ;;  %v3936_v30 = vadd.f32 %v12325_v13, %v3512_v29  ;;  %v14220_v13 = vld [vmem:[#allocation21_spill] sm:$0xff]  ;;  %v336_v29 = vld [vmem:[#allocation8 + $0x8] sm:$0x3] }
 0x38f   : > { %v12380_v9 = vpop.f32.mrf.mxu0  ;;  %v2702_v43 = vadd.f32 %v12303_v60, %v2278_v16  ;;  %v3933_v39 = vadd.f32 %v12321_v56, %v3509_v21  ;;  %v3934_v31 = vadd.f32 %v12329_v22, %v3510_v5  ;;  %v3091_v60 = vadd.f32 %v12313_v2, %v2701_v48  ;;  %v14216_v21 = vld [vmem:[#allocation15_spill] sm:$0xff]  ;;  %v14221_v48 = vld [vmem:[#allocation17_spill] sm:$0xff] }
 0x390   : > { %v4211_v55 = vpop.f32.mrf.mxu1  ;;  %v3513_v56 = vadd.f32 %v12319_v15, %v3089_v12  ;;  %v12420_v2 = vrot.slane %v12345_v17, %v4818_v11  ;;  %v4359_v45 = vadd.f32 %v4140_v38, %v3935_v53  ;;  %v3514_v47 = vadd.f32 %v14216_v21, %v3090_v59  ;;  %v14222_v4 = vld [vmem:[#allocation23_spill] sm:$0xff]  ;;  %v14224_v59 = vld [vmem:[#allocation22_spill] sm:$0xff] }
 0x391   : > { %v12396_v8 = vpop.f32.mrf.mxu0  ;;  %v4357_v63 = vadd.f32 %v4069_v42, %v3933_v39  ;;  %v4358_v37 = vadd.f32 %v4138_v34, %v3934_v31  ;;  %v12423_v42 = vrot.slane %v12345_v17, %v4822_v58  ;;  %v3092_v15 = vadd.f32 %v12297_v19, %v2702_v43  ;;  %v14223_v31 = vld [vmem:[#allocation18_spill] sm:$0xff] }
 0x392   : > { %v12401_v6 = vpop.f32.mrf.mxu1  ;;  %14214 = vst [vmem:[#allocation31_spill] sm:$0xff] %v12420_v2  ;;  %v3093_v34 = vadd.f32 %v12299_v35, %v2703_v46  ;;  %v3515_v14 = vadd.f32 %v14217_v49, %v3091_v60  ;;  %v3937_v25 = vadd.f32 %v14219_v18, %v3513_v56  ;;  %v4360_v17 = vadd.f32 %v4209_v3, %v3936_v30 }
 0x393   : > { %v4491_v51 = vpop.f32.mrf.mxu0  ;;  %14215 = vst [vmem:[#allocation32_spill] sm:$0xff] %v12423_v42  ;;  %v3938_v38 = vadd.f32 %v14220_v13, %v3514_v47  ;;  %v3516_v62 = vadd.f32 %v14221_v48, %v3092_v15 }
 0x394   : > { %v4780_v20 = vadd.f32 %v4491_v51, %v4356_v33  ;;  %v12409_v44 = vpop.f32.mrf.mxu1  ;;  %v14218_v36 = vld [vmem:[#allocation26_spill] sm:$0xff]  ;;  %v4361_v16 = vadd.f32 %v4211_v55, %v3937_v25  ;;  %v3939_v5 = vadd.f32 %v14222_v4, %v3515_v14  ;;  %v3517_v51 = vadd.f32 %v14223_v31, %v3093_v34  ;;  %v4885_v31 = vld [vmem:[#allocation7] sm:$0xff] }
 0x395   : > { %v4493_v57 = vpop.f32.mrf.mxu0  ;;  %v4362_v33 = vadd.f32 %v12380_v9, %v3938_v38  ;;  %v3940_v60 = vadd.f32 %v14224_v59, %v3516_v62  ;;  %v14228_v25 = vsub.s32 1, %v12331_v23 }
 0x396   : > { %v12417_v52 = vmul.f32 %v12356_v24, %v4780_v20  ;;  %v4781_v22 = vadd.f32 %v4493_v57, %v4357_v63  ;;  %v4562_v1 = vpop.f32.mrf.mxu1  ;;  %v4363_v53 = vadd.f32 %v12396_v8, %v3939_v5 }
 0x397   : > { %v4782_v54 = vadd.f32 %v4562_v1, %v4358_v37  ;;  %v4364_v21 = vadd.f32 %v12401_v6, %v3940_v60 }
 0x398   : > { %v12431_v28 = vmul.f32 %v14218_v36, %v4781_v22  ;;  %v4564_v7 = vpop.f32.mrf.mxu1  ;;  %v4863_v35 = vmul.f32 %v12417_v52, %v12417_v52  ;;  %v14225_v22 = vld [vmem:[#allocation24_spill] sm:$0xff] }
 0x399   : > { %v12435_v27 = vmul.f32 %v12375_v0, %v4782_v54  ;;  %v4783_v19 = vadd.f32 %v4564_v7, %v4359_v45  ;;  %v3941_v1 = vadd.f32 %v14225_v22, %v3517_v51  ;;  %v14226_v54 = vsub.s32 0, %v12331_v23 }
 0x39a   : > { %v4852_v26 = vadd.f32 %v12431_v28, %v12417_v52  ;;  %v4864_v11 = vmul.f32 %v12431_v28, %v12431_v28  ;;  %v4633_v10 = vpop.f32.mrf.mxu0 }
 0x39b   : > { %v4865_v3 = vmul.f32 %v12435_v27, %v12435_v27  ;;  %v12447_v50 = vmul.f32 %v12378_v32, %v4783_v19  ;;  %v4784_v58 = vadd.f32 %v4633_v10, %v4360_v17  ;;  %v12471_v34 = vrot.slane %v336_v29, %v14226_v54 }
 0x39c   : > { %v4873_v43 = vadd.f32 %v4864_v11, %v4863_v35  ;;  %v4853_v12 = vadd.f32 %v4852_v26, %v12435_v27  ;;  %v4635_v39 = vpop.f32.mrf.mxu0  ;;  %v12482_v17 = vrot.slane %v336_v29, %v14228_v25  ;;  %v4365_v19 = vadd.f32 %v12409_v44, %v3941_v1 }
 0x39d   : > { %v4866_v55 = vmul.f32 %v12447_v50, %v12447_v50  ;;  %v12456_v46 = vmul.f32 %v12383_v41, %v4784_v58  ;;  %v4785_v40 = vadd.f32 %v4635_v39, %v4361_v16  ;;  %14227 = vst [vmem:[#allocation15_spill] sm:$0xff] %v12471_v34  ;;  %v11308_v1 = vmov 1  }
 0x39e   : > { %v4874_v63 = vadd.f32 %v4873_v43, %v4865_v3  ;;  %v4854_v20 = vadd.f32 %v4853_v12, %v12447_v50  ;;  %v4704_v56 = vpop.f32.mrf.mxu1  ;;  %14229 = vst [vmem:[#allocation16_spill] sm:$0xff] %v12482_v17  ;;  %11060 = vset.pattern.permute.xlu0 %v11308_v1 }
 0x39f   : > { %v4867_v9 = vmul.f32 %v12456_v46, %v12456_v46  ;;  %v12465_v37 = vmul.f32 %v12414_v61, %v4785_v40  ;;  %v4786_v57 = vadd.f32 %v4704_v56, %v4362_v33 }
 0x3a0   : > { %v4875_v15 = vadd.f32 %v4874_v63, %v4866_v55  ;;  %v4855_v30 = vadd.f32 %v4854_v20, %v12456_v46  ;;  %v4706_v45 = vpop.f32.mrf.mxu1  ;;  %v14230_v55 = vmov 0.0  }
 0x3a1   : > { %v4868_v8 = vmul.f32 %v12465_v37, %v12465_v37  ;;  %v12477_v47 = vmul.f32 %v12420_v2, %v4786_v57  ;;  %v4787_v49 = vadd.f32 %v4706_v45, %v4363_v53  ;;  %10921 = vmatprep.mubr.msk.f32.mxu1 %vm11306_vm10, %v14230_v55  ;;  %v11307_v57 = vmov 0  }
 0x3a2   : > { %v4876_v14 = vadd.f32 %v4875_v15, %v4867_v9  ;;  %v4856_v7 = vadd.f32 %v4855_v30, %v12465_v37  ;;  %v4775_v18 = vpop.f32.mrf.mxu0  ;;  %11059 = vset.pattern.permute.xlu1 %v11307_v57  ;;  %v1016_v15 = vld [vmem:[%s14145_s5] sm:$0xff] }
 0x3a3   : > { %v4869_v6 = vmul.f32 %v12477_v47, %v12477_v47  ;;  %v12488_v13 = vmul.f32 %v12423_v42, %v4787_v49  ;;  %v4788_v38 = vadd.f32 %v4775_v18, %v4364_v21 }
 0x3a4   : > { %v4877_v35 = vadd.f32 %v4876_v14, %v4868_v8  ;;  %v4857_v26 = vadd.f32 %v4856_v7, %v12477_v47  ;;  %v4777_v11 = vpop.f32.mrf.mxu0 }
 0x3a5   : > { %v4870_v10 = vmul.f32 %v12488_v13, %v12488_v13  ;;  %v12494_v16 = vmul.f32 %v12471_v34, %v4788_v38  ;;  %v4789_v3 = vadd.f32 %v4777_v11, %v4365_v19 }
 0x3a6   : > { %v4858_v44 = vadd.f32 %v4857_v26, %v12488_v13  ;;  %v4878_v58 = vadd.f32 %v4877_v35, %v4869_v6 }
 0x3a7   : > { %v4851_v48 = vmul.f32 %v12482_v17, %v4789_v3  ;;  %v4871_v62 = vmul.f32 %v12494_v16, %v12494_v16 }
 0x3a8   : > { %v4859_v4 = vadd.f32 %v4858_v44, %v12494_v16  ;;  %v4879_v5 = vadd.f32 %v4878_v58, %v4870_v10 }
 0x3a9   : > { %v4872_v43 = vmul.f32 %v4851_v48, %v4851_v48 }
 0x3aa   : > { %v4860_v12 = vadd.f32 %v4859_v4, %v4851_v48  ;;  %v4880_v39 = vadd.f32 %v4879_v5, %v4871_v62 }
 0x3ac   : > { %4861 = vadd.xlane.f32.xlu0 %v4860_v12  ;;  %v4881_v33 = vadd.f32 %v4880_v39, %v4872_v43 }
 0x3ae   : > { %4882 = vadd.xlane.f32.xlu1 %v4881_v33 }
 0x435   : > { %v4862_v40 = vpop.xlane.xlu0 %4861 }
 0x437   : > { %v4883_v29 = vpop.xlane.xlu1 %4882 }
 0x438   : > { %v4884_v51 = vsel %vm2303_vm4, %v4862_v40, %v4883_v29 }
 0x439   : > { %10920 = vmatpush3.msra.mxu1 %v4884_v51 }
 0x43a   : > { %10922 = vmatmul.mubr.msk.f32.vlgmr.msra.gmra.mxu1 %vm4886_vm11, %v4885_v31 }
 0x43b   : > { %5303 = vmatprep.mubr.f32.mxu1 %v14230_v55 }
 0x4fa   : > { %v4956_v59 = vpop.f32.mrf.mxu1 }
 0x4fb   : > { %v4960_v60 = vmul.f32 %v4956_v59, %v4956_v59 }
 0x4fc   : > { %v10923_v63 = vpop.f32.mrf.mxu1 }
 0x4fd   : > { %4962 = vrot.lane.b32.xlu0 %v4960_v60, %s11300_s23 }
 0x56f   : > { %v4963_v20 = vpop.permute.xlu0 %4962 }
 0x570   : > { %v4965_v56 = vsub.f32 %v4956_v59, %v4963_v20 }
 0x572   : > { %v4966_v53 = vmax.f32 %v4965_v56, 0.0 }
 0x574   : > { %v4967_v9 = vadd.f32 1e-05, %v4966_v53 }
 0x576   : > { %11065 = vrsqrt.f32 %v4967_v9 }
 0x583   : > { %v11066_v22 = vpop.eup %11065 }
 0x584   : > { %4970 = vrot.lane.b32.xlu1 %v11066_v22, %s11302_s10 }
 0x5f6   : > { %v4971_v30 = vpop.permute.xlu1 %4970 }
 0x5f7   : > { %v4973_v45 = vmul.f32 %v4971_v30, %v1016_v15 }
 0x5f9   : > { %v4974_v54 = vmul.f32 %v4973_v45, %v4956_v59  ;;  %4982 = vperm.xlu1 %11059, %v4973_v45  }
 0x5fb   : > { %4976 = vrot.lane.b32.xlu0 %v4974_v54, %s11300_s23 }
 0x66d   : > { %v4977_v21 = vpop.permute.xlu0 %4976 }
 0x66e   : > { %v4979_v8 = vsub.f32 %v1016_v15, %v4977_v21 }
 0x670   : > { %4997 = vperm.xlu0 %11060, %v4979_v8  }
 0x674   : > { %v4983_v49 = vpop.permute.xlu1 %4982 }
 0x675   : > { %v4985_v14 = vmul.f32 %v4983_v49, %v12417_v52  ;;  %v4986_v7 = vmul.f32 %v4983_v49, %v12431_v28  ;;  %v4987_v18 = vmul.f32 %v4983_v49, %v12435_v27  ;;  %v4989_v35 = vmul.f32 %v4983_v49, %v12456_v46 }
 0x676   : > { %v4988_v26 = vmul.f32 %v4983_v49, %v12447_v50  ;;  %v4994_v58 = vmul.f32 %v4983_v49, %v4851_v48  ;;  %v4991_v52 = vmul.f32 %v4983_v49, %v12477_v47  ;;  %v4990_v28 = vmul.f32 %v4983_v49, %v12465_v37 }
 0x677   : > { %v4993_v50 = vmul.f32 %v4983_v49, %v12494_v16  ;;  %v4992_v12 = vmul.f32 %v4983_v49, %v12488_v13 }
 0x6eb   : > { %v4998_v25 = vpop.permute.xlu0 %4997 }
 0x6ec   : > { %v5000_v19 = vadd.f32 %v4998_v25, %v4985_v14  ;;  %v5001_v6 = vadd.f32 %v4998_v25, %v4986_v7  ;;  %v5002_v38 = vadd.f32 %v4998_v25, %v4987_v18  ;;  %v5004_v11 = vadd.f32 %v4998_v25, %v4989_v35 }
 0x6ed   : > { %v5003_v62 = vadd.f32 %v4998_v25, %v4988_v26  ;;  %v5009_v27 = vadd.f32 %v4998_v25, %v4994_v58  ;;  %v5006_v4 = vadd.f32 %v4998_v25, %v4991_v52  ;;  %v5005_v43 = vadd.f32 %v4998_v25, %v4990_v28 }
 0x6ee   : > { %v5020_v10 = vmul.f32 0.70710677, %v5000_v19  ;;  %v5021_v3 = vmul.f32 0.70710677, %v5001_v6  ;;  %v5022_v44 = vmul.f32 0.70710677, %v5002_v38  ;;  %v5008_v33 = vadd.f32 %v4998_v25, %v4993_v50 }
 0x6ef   : > { %v5024_v5 = vmul.f32 0.70710677, %v5004_v11  ;;  %v5023_v46 = vmul.f32 0.70710677, %v5003_v62  ;;  %v5029_v39 = vmul.f32 0.70710677, %v5009_v27  ;;  %v5007_v40 = vadd.f32 %v4998_v25, %v4992_v12 }
 0x6f0   : > { %11067 = verf.f32 %v5020_v10  ;;  %v5026_v48 = vmul.f32 0.70710677, %v5006_v4  ;;  %v5025_v47 = vmul.f32 0.70710677, %v5005_v43  ;;  %v5028_v37 = vmul.f32 0.70710677, %v5008_v33 }
 0x6f1   : > { %11069 = verf.f32 %v5021_v3  ;;  %v5027_v29 = vmul.f32 0.70710677, %v5007_v40  ;;  %v5010_v59 = vmul.f32 0.5, %v5000_v19  ;;  %v5011_v63 = vmul.f32 0.5, %v5001_v6 }
 0x6f2   : > { %11071 = verf.f32 %v5022_v44  ;;  %v5012_v1 = vmul.f32 0.5, %v5002_v38  ;;  %v5019_v8 = vmul.f32 0.5, %v5009_v27  ;;  %v5014_v18 = vmul.f32 0.5, %v5004_v11 }
 0x6f3   : > { %11073 = verf.f32 %v5024_v5  ;;  %v5013_v25 = vmul.f32 0.5, %v5003_v62  ;;  %v5016_v52 = vmul.f32 0.5, %v5006_v4  ;;  %v5015_v11 = vmul.f32 0.5, %v5005_v43 }
 0x6f4   : > { %11075 = verf.f32 %v5023_v46  ;;  %v5018_v12 = vmul.f32 0.5, %v5008_v33  ;;  %v5017_v4 = vmul.f32 0.5, %v5007_v40 }
 0x6f5   : > { %11077 = verf.f32 %v5029_v39 }
 0x6f6   : > { %11079 = verf.f32 %v5026_v48 }
 0x6f7   : > { %11081 = verf.f32 %v5025_v47 }
 0x6f8   : > { %11083 = verf.f32 %v5028_v37 }
 0x6f9   : > { %11085 = verf.f32 %v5027_v29 }
 0x6fd   : > { %v11068_v31 = vpop.eup %11067 }
 0x6fe   : > { %v11070_v51 = vpop.eup %11069  ;;  %v5040_v60 = vadd.f32 1.0, %v11068_v31 }
 0x6ff   : > { %v11072_v16 = vpop.eup %11071  ;;  %v5041_v13 = vadd.f32 1.0, %v11070_v51 }
 0x700   : > { %v5050_v20 = vmul.f32 %v5040_v60, %v5010_v59  ;;  %v5042_v56 = vadd.f32 1.0, %v11072_v16  ;;  %v11074_v57 = vpop.eup %11073  ;;  %v10854_v60 = vld [vmem:[%s14143_s3 + $0x8] sm:$0xff] }
 0x701   : > { %v5051_v53 = vmul.f32 %v5041_v13, %v5011_v63  ;;  %v11076_v22 = vpop.eup %11075  ;;  %v5044_v30 = vadd.f32 1.0, %v11074_v57 }
 0x702   : > { %v12522_v9 = vmul.f32 %v5050_v20, %v12356_v24  ;;  %v11078_v15 = vpop.eup %11077  ;;  %v5052_v45 = vmul.f32 %v5042_v56, %v5012_v1  ;;  %v5043_v49 = vadd.f32 1.0, %v11076_v22 }
 0x703   : > { %v12527_v54 = vmul.f32 %v5051_v53, %v14218_v36  ;;  %v11080_v21 = vpop.eup %11079  ;;  %v5049_v14 = vadd.f32 1.0, %v11078_v15  ;;  %v5054_v38 = vmul.f32 %v5044_v30, %v5014_v18 }
 0x704   : > { %5127 = vrot.lane.b32.xlu1 %v12522_v9, %s11297_s4  ;;  %v11082_v7 = vpop.eup %11081  ;;  %v5046_v6 = vadd.f32 1.0, %v11080_v21  ;;  %v12532_v35 = vmul.f32 %v5052_v45, %v12375_v0  ;;  %v5053_v3 = vmul.f32 %v5043_v49, %v5013_v25 }
 0x705   : > { %v5059_v19 = vmul.f32 %v5049_v14, %v5019_v8  ;;  %v11084_v26 = vpop.eup %11083  ;;  %v5045_v10 = vadd.f32 1.0, %v11082_v7  ;;  %v12542_v27 = vmul.f32 %v5054_v38, %v12383_v41 }
 0x706   : > { %v11086_v58 = vpop.eup %11085  ;;  %v5048_v62 = vadd.f32 1.0, %v11084_v26  ;;  %v5056_v28 = vmul.f32 %v5046_v6, %v5016_v52  ;;  %v12545_v50 = vmul.f32 %v5053_v3, %v12378_v32 }
 0x707   : > { %v12535_v44 = vmul.f32 %v5059_v19, %v12482_v17  ;;  %v5047_v5 = vadd.f32 1.0, %v11086_v58  ;;  %v5055_v46 = vmul.f32 %v5045_v10, %v5015_v11  ;;  %v5070_v10 = vld [vmem:[%s14143_s3] sm:$0xff] }
 0x708   : > { %5129 = vrot.lane.b32.xlu1 %v12527_v54, %s11297_s4  ;;  %v5058_v43 = vmul.f32 %v5048_v62, %v5018_v12  ;;  %v12552_v39 = vmul.f32 %v5056_v28, %v12420_v2 }
 0x709   : > { %5124 = vrot.lane.b32.xlu0 %v12535_v44, %s11297_s4  ;;  %v5057_v48 = vmul.f32 %v5047_v5, %v5017_v4  ;;  %v12555_v47 = vmul.f32 %v5055_v46, %v12414_v61 }
 0x70a   : > { %v12562_v33 = vmul.f32 %v5058_v43, %v12471_v34 }
 0x70b   : > { %v12565_v40 = vmul.f32 %v5057_v48, %v12423_v42 }
 0x70c   : > { %5131 = vrot.lane.b32.xlu1 %v12532_v35, %s11297_s4 }
 0x70d   : > { %5133 = vrot.lane.b32.xlu0 %v12545_v50, %s11297_s4 }
 0x710   : > { %5135 = vrot.lane.b32.xlu1 %v12542_v27, %s11297_s4 }
 0x711   : > { %5137 = vrot.lane.b32.xlu0 %v12555_v47, %s11297_s4 }
 0x714   : > { %5139 = vrot.lane.b32.xlu1 %v12552_v39, %s11297_s4 }
 0x715   : > { %5141 = vrot.lane.b32.xlu0 %v12565_v40, %s11297_s4 }
 0x718   : > { %5143 = vrot.lane.b32.xlu1 %v12562_v33, %s11297_s4  ;;  %s11316_s4 = smov 2  }
 0x719   : > { %5084 = vrot.lane.b32.xlu0 %v12522_v9, %s11298_s30 }
 0x71c   : > { %5086 = vrot.lane.b32.xlu1 %v12527_v54, %s11298_s30 }
 0x71d   : > { %5088 = vrot.lane.b32.xlu0 %v12532_v35, %s11298_s30 }
 0x720   : > { %5090 = vrot.lane.b32.xlu1 %v12545_v50, %s11298_s30 }
 0x721   : > { %5072 = vrot.lane.b32.xlu0 %v12535_v44, %s11298_s30 }
 0x724   : > { %5092 = vrot.lane.b32.xlu1 %v12542_v27, %s11298_s30 }
 0x725   : > { %5094 = vrot.lane.b32.xlu0 %v12555_v47, %s11298_s30 }
 0x728   : > { %5096 = vrot.lane.b32.xlu1 %v12552_v39, %s11298_s30 }
 0x729   : > { %5098 = vrot.lane.b32.xlu0 %v12565_v40, %s11298_s30 }
 0x72c   : > { %5100 = vrot.lane.b32.xlu1 %v12562_v33, %s11298_s30  ;;  %s11317_s30 = smov 28  }
 0x72d   : > { %5886 = vrot.lane.b32.xlu0 %v12522_v9, %s11299_s9 }
 0x730   : > { %5888 = vrot.lane.b32.xlu1 %v12527_v54, %s11299_s9 }
 0x731   : > { %5883 = vrot.lane.b32.xlu0 %v12535_v44, %s11299_s9 }
 0x734   : > { %5890 = vrot.lane.b32.xlu1 %v12532_v35, %s11299_s9 }
 0x735   : > { %5892 = vrot.lane.b32.xlu0 %v12545_v50, %s11299_s9 }
 0x738   : > { %5894 = vrot.lane.b32.xlu1 %v12542_v27, %s11299_s9 }
 0x739   : > { %5896 = vrot.lane.b32.xlu0 %v12555_v47, %s11299_s9 }
 0x73c   : > { %5898 = vrot.lane.b32.xlu1 %v12552_v39, %s11299_s9 }
 0x73d   : > { %5900 = vrot.lane.b32.xlu0 %v12565_v40, %s11299_s9 }
 0x740   : > { %5902 = vrot.lane.b32.xlu1 %v12562_v33, %s11299_s9  ;;  %s11318_s9 = smov 20  }
 0x741   : > { %6297 = vrot.lane.b32.xlu0 %v12522_v9, %s11300_s23 }
 0x744   : > { %6299 = vrot.lane.b32.xlu1 %v12527_v54, %s11300_s23 }
 0x745   : > { %6301 = vrot.lane.b32.xlu0 %v12532_v35, %s11300_s23 }
 0x748   : > { %6303 = vrot.lane.b32.xlu1 %v12545_v50, %s11300_s23 }
 0x749   : > { %6294 = vrot.lane.b32.xlu0 %v12535_v44, %s11300_s23 }
 0x74c   : > { %6305 = vrot.lane.b32.xlu1 %v12542_v27, %s11300_s23 }
 0x74d   : > { %6307 = vrot.lane.b32.xlu0 %v12555_v47, %s11300_s23 }
 0x750   : > { %6309 = vrot.lane.b32.xlu1 %v12552_v39, %s11300_s23 }
 0x751   : > { %6311 = vrot.lane.b32.xlu0 %v12565_v40, %s11300_s23 }
 0x754   : > { %6313 = vrot.lane.b32.xlu1 %v12562_v33, %s11300_s23 }
 0x755   : > { %7077 = vrot.lane.b32.xlu0 %v12527_v54, %s11302_s10 }
 0x758   : > { %7079 = vrot.lane.b32.xlu1 %v12532_v35, %s11302_s10 }
 0x759   : > { %7081 = vrot.lane.b32.xlu0 %v12545_v50, %s11302_s10 }
 0x75c   : > { %7083 = vrot.lane.b32.xlu1 %v12542_v27, %s11302_s10 }
 0x75d   : > { %7075 = vrot.lane.b32.xlu0 %v12522_v9, %s11302_s10 }
 0x760   : > { %7085 = vrot.lane.b32.xlu1 %v12555_v47, %s11302_s10 }
 0x761   : > { %7087 = vrot.lane.b32.xlu0 %v12552_v39, %s11302_s10 }
 0x764   : > { %7089 = vrot.lane.b32.xlu1 %v12565_v40, %s11302_s10 }
 0x765   : > { %7091 = vrot.lane.b32.xlu0 %v12562_v33, %s11302_s10 }
 0x768   : > { %7093 = vrot.lane.b32.xlu1 %v12535_v44, %s11302_s10 }
 0x769   : > { %7488 = vrot.lane.b32.xlu0 %v12527_v54, %s11303_s11 }
 0x76c   : > { %7490 = vrot.lane.b32.xlu1 %v12532_v35, %s11303_s11 }
 0x76d   : > { %7486 = vrot.lane.b32.xlu0 %v12522_v9, %s11303_s11 }
 0x770   : > { %7492 = vrot.lane.b32.xlu1 %v12545_v50, %s11303_s11 }
 0x771   : > { %7494 = vrot.lane.b32.xlu0 %v12542_v27, %s11303_s11 }
 0x774   : > { %7496 = vrot.lane.b32.xlu1 %v12555_v47, %s11303_s11 }
 0x775   : > { %7498 = vrot.lane.b32.xlu0 %v12552_v39, %s11303_s11 }
 0x776   : > { %v5128_v37 = vpop.permute.xlu1 %5127 }
 0x778   : > { %7500 = vrot.lane.b32.xlu1 %v12565_v40, %s11303_s11 }
 0x779   : > { %7502 = vrot.lane.b32.xlu0 %v12562_v33, %s11303_s11 }
 0x77a   : > { %v5130_v29 = vpop.permute.xlu1 %5129 }
 0x77b   : > { %v5145_v31 = vsel %vm1084_vm0, %v5128_v37, %v5130_v29  ;;  %v5125_v59 = vpop.permute.xlu0 %5124 }
 0x77c   : > { %7504 = vrot.lane.b32.xlu1 %v12535_v44, %s11303_s11  ;;  %5198 = vmatprep.subr.mxu0 %v5145_v31  ;;  %v5164_v16 = vsel %vm1084_vm0, %v5125_v59, %v5128_v37  ;;  %s11319_s11 = smov 12  }
 0x77d   : > { %7899 = vrot.lane.b32.xlu0 %v12527_v54, %s11304_s13  ;;  %5199 = vmatpush1.msra.mxu0 %v5164_v16 }
 0x77e   : > { %v5132_v51 = vpop.permute.xlu1 %5131  ;;  %10855 = vmatmul.mubr.msk.f32.vlgmr.msra.gmra.mxu0 %vm4886_vm11, %v10854_v60 }
 0x77f   : > { %v5134_v63 = vpop.permute.xlu0 %5133  ;;  %v5146_v20 = vsel %vm1084_vm0, %v5130_v29, %v5132_v51  ;;  %5374 = vmatprep.mubr.f32.mxu0 %v14230_v55 }
 0x780   : > { %7901 = vrot.lane.b32.xlu1 %v12532_v35, %s11304_s13  ;;  %v5147_v56 = vsel %vm1084_vm0, %v5132_v51, %v5134_v63 }
 0x781   : > { %7903 = vrot.lane.b32.xlu0 %v12545_v50, %s11304_s13  ;;  %5269 = vmatprep.subr.mxu1 %v5147_v56 }
 0x782   : > { %v5136_v13 = vpop.permute.xlu1 %5135  ;;  %5270 = vmatpush1.msra.mxu1 %v5146_v20 }
 0x783   : > { %v5138_v57 = vpop.permute.xlu0 %5137  ;;  %v5148_v22 = vsel %vm1084_vm0, %v5134_v63, %v5136_v13  ;;  %10856 = vmatmul.mubr.msk.f32.vlgmr.msra.gmra.mxu1 %vm4886_vm11, %v10854_v60 }
 0x784   : > { %7905 = vrot.lane.b32.xlu1 %v12542_v27, %s11304_s13  ;;  %v5149_v1 = vsel %vm1084_vm0, %v5136_v13, %v5138_v57  ;;  %5445 = vmatprep.mubr.f32.mxu1 %v14230_v55 }
 0x785   : > { %7897 = vrot.lane.b32.xlu0 %v12522_v9, %s11304_s13  ;;  %5340 = vmatprep.subr.mxu0 %v5149_v1 }
 0x786   : > { %v5140_v53 = vpop.permute.xlu1 %5139  ;;  %5341 = vmatpush1.msra.mxu0 %v5148_v22 }
 0x787   : > { %v5142_v30 = vpop.permute.xlu0 %5141  ;;  %v5150_v45 = vsel %vm1084_vm0, %v5138_v57, %v5140_v53  ;;  %10857 = vmatmul.mubr.msk.f32.vlgmr.msra.gmra.mxu0 %vm4886_vm11, %v10854_v60 }
 0x788   : > { %7907 = vrot.lane.b32.xlu1 %v12555_v47, %s11304_s13  ;;  %v5151_v8 = vsel %vm1084_vm0, %v5140_v53, %v5142_v30  ;;  %5516 = vmatprep.mubr.f32.mxu0 %v14230_v55 }
 0x789   : > { %7909 = vrot.lane.b32.xlu0 %v12552_v39, %s11304_s13  ;;  %5411 = vmatprep.subr.mxu1 %v5151_v8 }
 0x78a   : > { %v5144_v15 = vpop.permute.xlu1 %5143  ;;  %5412 = vmatpush1.msra.mxu1 %v5150_v45 }
 0x78b   : > { %v5153_v21 = vsel %vm1084_vm0, %v5144_v15, %v5125_v59  ;;  %v5152_v49 = vsel %vm1084_vm0, %v5142_v30, %v5144_v15  ;;  %v5085_v7 = vpop.permute.xlu0 %5084  ;;  %10858 = vmatmul.mubr.msk.f32.vlgmr.msra.gmra.mxu1 %vm4886_vm11, %v10854_v60  ;;  %vm9020_vm0 = vcmask 228352  }
 0x78c   : > { %7911 = vrot.lane.b32.xlu1 %v12565_v40, %s11304_s13  ;;  %5482 = vmatprep.subr.mxu0 %v5153_v21 }
 0x78d   : > { %5483 = vmatpush1.msra.mxu0 %v5152_v49  ;;  %7913 = vrot.lane.b32.xlu0 %v12562_v33, %s11304_s13 }
 0x78e   : > { %v5087_v14 = vpop.permute.xlu1 %5086  ;;  %10859 = vmatmul.mubr.msk.f32.vlgmr.msra.gmra.mxu0 %vm4886_vm11, %v10854_v60  ;;  %5590 = vmatprep.mubr.f32.mxu1 %v14230_v55  ;;  %v10865_v60 = vld [vmem:[%s14143_s3 + $0x10] sm:$0xff] }
 0x78f   : > { %v5102_v18 = vsel %vm1049_vm3, %v5085_v7, %v5087_v14  ;;  %5661 = vmatprep.mubr.f32.mxu0 %v14230_v55  ;;  %v5089_v19 = vpop.permute.xlu0 %5088 }
 0x790   : > { %7915 = vrot.lane.b32.xlu1 %v12535_v44, %s11304_s13  ;;  %5556 = vmatprep.subr.mxu1 %v5102_v18  ;;  %v5103_v38 = vsel %vm1049_vm3, %v5087_v14, %v5089_v19 }
 0x791   : > { %8310 = vrot.lane.b32.xlu0 %v12527_v54, %s11305_s21 }
 0x792   : > { %v5091_v25 = vpop.permute.xlu1 %5090 }
 0x793   : > { %v5104_v6 = vsel %vm1049_vm3, %v5089_v19, %v5091_v25  ;;  %v5073_v3 = vpop.permute.xlu0 %5072 }
 0x794   : > { %8312 = vrot.lane.b32.xlu1 %v12532_v35, %s11305_s21  ;;  %5627 = vmatprep.subr.mxu0 %v5104_v6  ;;  %v5121_v58 = vsel %vm1049_vm3, %v5073_v3, %v5085_v7 }
 0x795   : > { %5628 = vmatpush1.msra.mxu0 %v5103_v38  ;;  %8308 = vrot.lane.b32.xlu0 %v12522_v9, %s11305_s21 }
 0x796   : > { %v5093_v26 = vpop.permute.xlu1 %5092  ;;  %10861 = vmatmul.mubr.msk.f32.vlgmr.msra.gmra.mxu0 %vm4886_vm11, %v5070_v10  ;;  %5557 = vmatpush1.msra.mxu1 %v5121_v58 }
 0x797   : > { %5803 = vmatprep.mubr.f32.mxu0 %v14230_v55  ;;  %10860 = vmatmul.mubr.msk.f32.vlgmr.msra.gmra.mxu1 %vm4886_vm11, %v5070_v10  ;;  %v5095_v11 = vpop.permute.xlu0 %5094  ;;  %v5105_v62 = vsel %vm1049_vm3, %v5091_v25, %v5093_v26 }
 0x798   : > { %8314 = vrot.lane.b32.xlu1 %v12545_v50, %s11305_s21  ;;  %5732 = vmatprep.mubr.f32.mxu1 %v14230_v55  ;;  %v5106_v28 = vsel %vm1049_vm3, %v5093_v26, %v5095_v11  ;;  %v10871_v26 = vld [vmem:[%s14143_s3 + $0x18] sm:$0xff] }
 0x799   : > { %8316 = vrot.lane.b32.xlu0 %v12542_v27, %s11305_s21  ;;  %5698 = vmatprep.subr.mxu1 %v5106_v28 }
 0x79a   : > { %v5097_v52 = vpop.permute.xlu1 %5096  ;;  %5699 = vmatpush1.msra.mxu1 %v5105_v62 }
 0x79b   : > { %v5099_v46 = vpop.permute.xlu0 %5098  ;;  %v5107_v12 = vsel %vm1049_vm3, %v5095_v11, %v5097_v52  ;;  %10862 = vmatmul.mubr.msk.f32.vlgmr.msra.gmra.mxu1 %vm4886_vm11, %v5070_v10 }
 0x79c   : > { %8318 = vrot.lane.b32.xlu1 %v12555_v47, %s11305_s21  ;;  %v5108_v43 = vsel %vm1049_vm3, %v5097_v52, %v5099_v46  ;;  %5874 = vmatprep.mubr.f32.mxu1 %v14230_v55 }
 0x79d   : > { %8320 = vrot.lane.b32.xlu0 %v12552_v39, %s11305_s21  ;;  %5769 = vmatprep.subr.mxu0 %v5108_v43 }
 0x79e   : > { %v5101_v5 = vpop.permute.xlu1 %5100  ;;  %5770 = vmatpush1.msra.mxu0 %v5107_v12 }
 0x79f   : > { %v5110_v4 = vsel %vm1049_vm3, %v5101_v5, %v5073_v3  ;;  %v5109_v48 = vsel %vm1049_vm3, %v5099_v46, %v5101_v5  ;;  %v5887_v29 = vpop.permute.xlu0 %5886  ;;  %10863 = vmatmul.mubr.msk.f32.vlgmr.msra.gmra.mxu0 %vm4886_vm11, %v5070_v10  ;;  %vm9737_vm3 = vcmask 1046528  }
 0x7a0   : > { %8322 = vrot.lane.b32.xlu1 %v12565_v40, %s11305_s21  ;;  %5840 = vmatprep.subr.mxu1 %v5110_v4 }
 0x7a1   : > { %5841 = vmatpush1.msra.mxu1 %v5109_v48  ;;  %8324 = vrot.lane.b32.xlu0 %v12562_v33, %s11305_s21 }
 0x7a2   : > { %v5889_v37 = vpop.permute.xlu1 %5888  ;;  %10864 = vmatmul.mubr.msk.f32.vlgmr.msra.gmra.mxu1 %vm4886_vm11, %v5070_v10  ;;  %5991 = vmatprep.mubr.f32.mxu0 %v14230_v55 }
 0x7a3   : > { %v5904_v31 = vsel %vm1879_vm5, %v5887_v29, %v5889_v37  ;;  %6062 = vmatprep.mubr.f32.mxu1 %v14230_v55  ;;  %v5884_v59 = vpop.permute.xlu0 %5883 }
 0x7a4   : > { %8326 = vrot.lane.b32.xlu1 %v12535_v44, %s11305_s21  ;;  %5957 = vmatprep.subr.mxu0 %v5904_v31  ;;  %v5923_v16 = vsel %vm1879_vm5, %v5884_v59, %v5887_v29  ;;  %v10877_v31 = vld [vmem:[%s14143_s3 + $0x20] sm:$0xff]  ;;  %s11322_s21 = smov 60  }
 0x7a5   : > { %5958 = vmatpush1.msra.mxu0 %v5923_v16 }
 0x7a6   : > { %v5891_v51 = vpop.permute.xlu1 %5890  ;;  %10866 = vmatmul.mubr.msk.f32.vlgmr.msra.gmra.mxu0 %vm4886_vm11, %v10865_v60 }
 0x7a7   : > { %v5893_v63 = vpop.permute.xlu0 %5892  ;;  %v5905_v20 = vsel %vm1879_vm5, %v5889_v37, %v5891_v51  ;;  %6133 = vmatprep.mubr.f32.mxu0 %v14230_v55 }
 0x7a8   : > { %v5906_v56 = vsel %vm1879_vm5, %v5891_v51, %v5893_v63 }
 0x7a9   : > { %6028 = vmatprep.subr.mxu1 %v5906_v56 }
 0x7aa   : > { %v5895_v13 = vpop.permute.xlu1 %5894  ;;  %6029 = vmatpush1.msra.mxu1 %v5905_v20 }
 0x7ab   : > { %v5897_v57 = vpop.permute.xlu0 %5896  ;;  %v5907_v22 = vsel %vm1879_vm5, %v5893_v63, %v5895_v13  ;;  %10867 = vmatmul.mubr.msk.f32.vlgmr.msra.gmra.mxu1 %vm4886_vm11, %v10865_v60 }
 0x7ac   : > { %v5908_v1 = vsel %vm1879_vm5, %v5895_v13, %v5897_v57  ;;  %6204 = vmatprep.mubr.f32.mxu1 %v14230_v55 }
 0x7ad   : > { %6099 = vmatprep.subr.mxu0 %v5908_v1 }
 0x7ae   : > { %v5899_v53 = vpop.permute.xlu1 %5898  ;;  %6100 = vmatpush1.msra.mxu0 %v5907_v22 }
 0x7af   : > { %v5901_v30 = vpop.permute.xlu0 %5900  ;;  %v5909_v45 = vsel %vm1879_vm5, %v5897_v57, %v5899_v53  ;;  %10868 = vmatmul.mubr.msk.f32.vlgmr.msra.gmra.mxu0 %vm4886_vm11, %v10865_v60 }
 0x7b0   : > { %v5910_v8 = vsel %vm1879_vm5, %v5899_v53, %v5901_v30  ;;  %6275 = vmatprep.mubr.f32.mxu0 %v14230_v55 }
 0x7b1   : > { %6170 = vmatprep.subr.mxu1 %v5910_v8 }
 0x7b2   : > { %v5903_v15 = vpop.permute.xlu1 %5902  ;;  %6171 = vmatpush1.msra.mxu1 %v5909_v45  ;;  %v10889_v45 = vld [vmem:[%s14143_s3 + $0x30] sm:$0xff] }
 0x7b3   : > { %v5912_v21 = vsel %vm1879_vm5, %v5903_v15, %v5884_v59  ;;  %v5911_v49 = vsel %vm1879_vm5, %v5901_v30, %v5903_v15  ;;  %v6298_v7 = vpop.permute.xlu0 %6297  ;;  %10869 = vmatmul.mubr.msk.f32.vlgmr.msra.gmra.mxu1 %vm4886_vm11, %v10865_v60  ;;  %vm9084_vm5 = vcmask 244736  }
 0x7b4   : > { %6241 = vmatprep.subr.mxu0 %v5912_v21  ;;  %6402 = vmatprep.mubr.f32.mxu1 %v14230_v55 }
 0x7b5   : > { %6242 = vmatpush1.msra.mxu0 %v5911_v49 }
 0x7b6   : > { %v6300_v14 = vpop.permute.xlu1 %6299  ;;  %10870 = vmatmul.mubr.msk.f32.vlgmr.msra.gmra.mxu0 %vm4886_vm11, %v10865_v60 }
 0x7b7   : > { %v6315_v18 = vsel %vm2303_vm4, %v6298_v7, %v6300_v14  ;;  %6473 = vmatprep.mubr.f32.mxu0 %v14230_v55  ;;  %v6302_v19 = vpop.permute.xlu0 %6301 }
 0x7b8   : > { %6368 = vmatprep.subr.mxu1 %v6315_v18  ;;  %v6316_v38 = vsel %vm2303_vm4, %v6300_v14, %v6302_v19 }
 0x7ba   : > { %v6304_v25 = vpop.permute.xlu1 %6303 }
 0x7bb   : > { %v6317_v6 = vsel %vm2303_vm4, %v6302_v19, %v6304_v25  ;;  %v6295_v3 = vpop.permute.xlu0 %6294 }
 0x7bc   : > { %6439 = vmatprep.subr.mxu0 %v6317_v6  ;;  %v6334_v58 = vsel %vm2303_vm4, %v6295_v3, %v6298_v7 }
 0x7bd   : > { %6440 = vmatpush1.msra.mxu0 %v6316_v38  ;;  %6369 = vmatpush1.msra.mxu1 %v6334_v58 }
 0x7be   : > { %v6306_v10 = vpop.permute.xlu1 %6305  ;;  %10873 = vmatmul.mubr.msk.f32.vlgmr.msra.gmra.mxu0 %vm4886_vm11, %v10871_v26  ;;  %10872 = vmatmul.mubr.msk.f32.vlgmr.msra.gmra.mxu1 %vm4886_vm11, %v10871_v26 }
 0x7bf   : > { %6615 = vmatprep.mubr.f32.mxu0 %v14230_v55  ;;  %v6308_v11 = vpop.permute.xlu0 %6307  ;;  %v6318_v62 = vsel %vm2303_vm4, %v6304_v25, %v6306_v10  ;;  %6544 = vmatprep.mubr.f32.mxu1 %v14230_v55 }
 0x7c0   : > { %v6319_v28 = vsel %vm2303_vm4, %v6306_v10, %v6308_v11 }
 0x7c1   : > { %6510 = vmatprep.subr.mxu1 %v6319_v28 }
 0x7c2   : > { %v6310_v52 = vpop.permute.xlu1 %6309  ;;  %6511 = vmatpush1.msra.mxu1 %v6318_v62 }
 0x7c3   : > { %v6312_v46 = vpop.permute.xlu0 %6311  ;;  %10874 = vmatmul.mubr.msk.f32.vlgmr.msra.gmra.mxu1 %vm4886_vm11, %v10871_v26  ;;  %v6320_v12 = vsel %vm2303_vm4, %v6308_v11, %v6310_v52 }
 0x7c4   : > { %v6321_v43 = vsel %vm2303_vm4, %v6310_v52, %v6312_v46  ;;  %6686 = vmatprep.mubr.f32.mxu1 %v14230_v55 }
 0x7c5   : > { %6581 = vmatprep.subr.mxu0 %v6321_v43  ;;  %v10895_v43 = vld [vmem:[%s14143_s3 + $0x38] sm:$0xff] }
 0x7c6   : > { %v6314_v5 = vpop.permute.xlu1 %6313  ;;  %6582 = vmatpush1.msra.mxu0 %v6320_v12 }
 0x7c7   : > { %v6323_v4 = vsel %vm2303_vm4, %v6314_v5, %v6295_v3  ;;  %v6322_v48 = vsel %vm2303_vm4, %v6312_v46, %v6314_v5  ;;  %v7078_v29 = vpop.permute.xlu0 %7077  ;;  %10875 = vmatmul.mubr.msk.f32.vlgmr.msra.gmra.mxu0 %vm4886_vm11, %v10871_v26  ;;  %6738 = vmatprep.subr.mxu0 %v12527_v54 }
 0x7c8   : > { %6652 = vmatprep.subr.mxu1 %v6323_v4  ;;  %6739 = vmatpush1.msra.mxu0 %v12522_v9 }
 0x7c9   : > { %6653 = vmatpush1.msra.mxu1 %v6322_v48  ;;  %6772 = vmatprep.mubr.f32.mxu0 %v14230_v55 }
 0x7ca   : > { %6809 = vmatprep.subr.mxu1 %v12545_v50  ;;  %v7080_v37 = vpop.permute.xlu1 %7079  ;;  %6880 = vmatprep.subr.mxu0 %v12555_v47 }
 0x7cb   : > { %10876 = vmatmul.mubr.msk.f32.vlgmr.msra.gmra.mxu1 %vm4886_vm11, %v10871_v26  ;;  %v7082_v51 = vpop.permute.xlu0 %7081  ;;  %10878 = vmatmul.mubr.msk.f32.vlgmr.msra.gmra.mxu0 %vm4886_vm11, %v10877_v31  ;;  %v7096_v9 = vsel %vm3116_vm6, %v7078_v29, %v7080_v37 }
 0x7cc   : > { %6810 = vmatpush1.msra.mxu1 %v12532_v35  ;;  %6843 = vmatprep.mubr.f32.mxu1 %v14230_v55 }
 0x7cd   : > { %6951 = vmatprep.subr.mxu1 %v12565_v40  ;;  %6881 = vmatpush1.msra.mxu0 %v12542_v27  ;;  %v10883_v27 = vld [vmem:[%s14143_s3 + $0x28] sm:$0xff] }
 0x7ce   : > { %v7084_v50 = vpop.permute.xlu1 %7083  ;;  %6914 = vmatprep.mubr.f32.mxu0 %v14230_v55  ;;  %7022 = vmatprep.subr.mxu0 %v12535_v44 }
 0x7cf   : > { %10879 = vmatmul.mubr.msk.f32.vlgmr.msra.gmra.mxu1 %vm4886_vm11, %v10877_v31  ;;  %v7098_v54 = vsel %vm3116_vm6, %v7082_v51, %v7084_v50  ;;  %v7076_v47 = vpop.permute.xlu0 %7075  ;;  %10880 = vmatmul.mubr.msk.f32.vlgmr.msra.gmra.mxu0 %vm4886_vm11, %v10877_v31 }
 0x7d0   : > { %6952 = vmatpush1.msra.mxu1 %v12552_v39  ;;  %6985 = vmatprep.mubr.f32.mxu1 %v14230_v55  ;;  %v7095_v44 = vsel %vm3116_vm6, %v7076_v47, %v7078_v29 }
 0x7d1   : > { %7149 = vmatprep.subr.mxu1 %v7096_v9  ;;  %7023 = vmatpush1.msra.mxu0 %v12562_v33  ;;  %v7097_v33 = vsel %vm3116_vm6, %v7080_v37, %v7082_v51 }
 0x7d2   : > { %v7086_v35 = vpop.permute.xlu1 %7085  ;;  %7056 = vmatprep.mubr.f32.mxu0 %v14230_v55  ;;  %7220 = vmatprep.subr.mxu0 %v7098_v54 }
 0x7d3   : > { %10881 = vmatmul.mubr.msk.f32.vlgmr.msra.gmra.mxu1 %vm4886_vm11, %v10877_v31  ;;  %v7088_v40 = vpop.permute.xlu0 %7087  ;;  %10882 = vmatmul.mubr.msk.f32.vlgmr.msra.gmra.mxu0 %vm4886_vm11, %v10877_v31  ;;  %v7099_v60 = vsel %vm3116_vm6, %v7084_v50, %v7086_v35 }
 0x7d4   : > { %7150 = vmatpush1.msra.mxu1 %v7095_v44  ;;  %7183 = vmatprep.mubr.f32.mxu1 %v14230_v55  ;;  %v7100_v59 = vsel %vm3116_vm6, %v7086_v35, %v7088_v40 }
 0x7d5   : > { %7221 = vmatpush1.msra.mxu0 %v7097_v33  ;;  %7254 = vmatprep.mubr.f32.mxu0 %v14230_v55 }
 0x7d6   : > { %v7090_v39 = vpop.permute.xlu1 %7089  ;;  %7291 = vmatprep.subr.mxu1 %v7100_v59 }
 0x7d7   : > { %10884 = vmatmul.mubr.msk.f32.vlgmr.msra.gmra.mxu1 %vm4886_vm11, %v10883_v27  ;;  %v7092_v13 = vpop.permute.xlu0 %7091  ;;  %10885 = vmatmul.mubr.msk.f32.vlgmr.msra.gmra.mxu0 %vm4886_vm11, %v10883_v27  ;;  %v7101_v63 = vsel %vm3116_vm6, %v7088_v40, %v7090_v39 }
 0x7d8   : > { %7292 = vmatpush1.msra.mxu1 %v7099_v60  ;;  %7325 = vmatprep.mubr.f32.mxu1 %v14230_v55  ;;  %v7102_v56 = vsel %vm3116_vm6, %v7090_v39, %v7092_v13 }
 0x7d9   : > { %7396 = vmatprep.mubr.f32.mxu0 %v14230_v55  ;;  %7362 = vmatprep.subr.mxu0 %v7102_v56 }
 0x7da   : > { %v7094_v16 = vpop.permute.xlu1 %7093  ;;  %7363 = vmatpush1.msra.mxu0 %v7101_v63 }
 0x7db   : > { %v7115_v20 = vsel %vm3116_vm6, %v7094_v16, %v7076_v47  ;;  %v7103_v53 = vsel %vm3116_vm6, %v7092_v13, %v7094_v16  ;;  %10886 = vmatmul.mubr.msk.f32.vlgmr.msra.gmra.mxu1 %vm4886_vm11, %v10883_v27  ;;  %v7489_v22 = vpop.permute.xlu0 %7488  ;;  %10887 = vmatmul.mubr.msk.f32.vlgmr.msra.gmra.mxu0 %vm4886_vm11, %v10883_v27  ;;  %v10901_v13 = vld [vmem:[%s14143_s3 + $0x40] sm:$0xff]  ;;  %vm10548_vm6 = vcmask 523264  }
 0x7dc   : > { %7433 = vmatprep.subr.mxu1 %v7115_v20  ;;  %7467 = vmatprep.mubr.f32.mxu1 %v14230_v55 }
 0x7dd   : > { %7434 = vmatpush1.msra.mxu1 %v7103_v53  ;;  %7594 = vmatprep.mubr.f32.mxu0 %v14230_v55 }
 0x7de   : > { %v7491_v57 = vpop.permute.xlu1 %7490 }
 0x7df   : > { %v7507_v1 = vsel %vm3540_vm7, %v7489_v22, %v7491_v57  ;;  %10888 = vmatmul.mubr.msk.f32.vlgmr.msra.gmra.mxu1 %vm4886_vm11, %v10883_v27  ;;  %v7487_v30 = vpop.permute.xlu0 %7486 }
 0x7e0   : > { %7560 = vmatprep.subr.mxu0 %v7507_v1  ;;  %7665 = vmatprep.mubr.f32.mxu1 %v14230_v55  ;;  %v7506_v21 = vsel %vm3540_vm7, %v7487_v30, %v7489_v22 }
 0x7e1   : > { %7561 = vmatpush1.msra.mxu0 %v7506_v21 }
 0x7e2   : > { %v7493_v15 = vpop.permute.xlu1 %7492  ;;  %10890 = vmatmul.mubr.msk.f32.vlgmr.msra.gmra.mxu0 %vm4886_vm11, %v10889_v45 }
 0x7e3   : > { %v7495_v49 = vpop.permute.xlu0 %7494  ;;  %v7508_v14 = vsel %vm3540_vm7, %v7491_v57, %v7493_v15  ;;  %7736 = vmatprep.mubr.f32.mxu0 %v14230_v55 }
 0x7e4   : > { %v7509_v7 = vsel %vm3540_vm7, %v7493_v15, %v7495_v49 }
 0x7e5   : > { %7631 = vmatprep.subr.mxu1 %v7509_v7 }
 0x7e6   : > { %v7497_v8 = vpop.permute.xlu1 %7496  ;;  %7632 = vmatpush1.msra.mxu1 %v7508_v14 }
 0x7e7   : > { %v7499_v25 = vpop.permute.xlu0 %7498  ;;  %10891 = vmatmul.mubr.msk.f32.vlgmr.msra.gmra.mxu1 %vm4886_vm11, %v10889_v45  ;;  %v7510_v19 = vsel %vm3540_vm7, %v7495_v49, %v7497_v8 }
 0x7e8   : > { %v7511_v6 = vsel %vm3540_vm7, %v7497_v8, %v7499_v25  ;;  %7807 = vmatprep.mubr.f32.mxu1 %v14230_v55 }
 0x7e9   : > { %7702 = vmatprep.subr.mxu0 %v7511_v6 }
 0x7ea   : > { %v7501_v18 = vpop.permute.xlu1 %7500  ;;  %7703 = vmatpush1.msra.mxu0 %v7510_v19 }
 0x7eb   : > { %v7503_v26 = vpop.permute.xlu0 %7502  ;;  %10892 = vmatmul.mubr.msk.f32.vlgmr.msra.gmra.mxu0 %vm4886_vm11, %v10889_v45  ;;  %v7512_v10 = vsel %vm3540_vm7, %v7499_v25, %v7501_v18 }
 0x7ec   : > { %v7513_v58 = vsel %vm3540_vm7, %v7501_v18, %v7503_v26  ;;  %7878 = vmatprep.mubr.f32.mxu0 %v14230_v55 }
 0x7ed   : > { %7773 = vmatprep.subr.mxu1 %v7513_v58 }
 0x7ee   : > { %v7505_v38 = vpop.permute.xlu1 %7504  ;;  %7774 = vmatpush1.msra.mxu1 %v7512_v10 }
 0x7ef   : > { %v7526_v3 = vsel %vm3540_vm7, %v7505_v38, %v7487_v30  ;;  %v7514_v52 = vsel %vm3540_vm7, %v7503_v26, %v7505_v38  ;;  %v7900_v62 = vpop.permute.xlu0 %7899  ;;  %10893 = vmatmul.mubr.msk.f32.vlgmr.msra.gmra.mxu1 %vm4886_vm11, %v10889_v45  ;;  %vm10550_vm7 = vcmask 785408  }
 0x7f0   : > { %7844 = vmatprep.subr.mxu0 %v7526_v3  ;;  %8005 = vmatprep.mubr.f32.mxu1 %v14230_v55 }
 0x7f1   : > { %7845 = vmatpush1.msra.mxu0 %v7514_v52 }
 0x7f2   : > { %v7902_v11 = vpop.permute.xlu1 %7901  ;;  %10894 = vmatmul.mubr.msk.f32.vlgmr.msra.gmra.mxu0 %vm4886_vm11, %v10889_v45 }
 0x7f3   : > { %v7918_v28 = vsel %vm3964_vm8, %v7900_v62, %v7902_v11  ;;  %8076 = vmatprep.mubr.f32.mxu0 %v14230_v55  ;;  %v7904_v46 = vpop.permute.xlu0 %7903 }
 0x7f4   : > { %7971 = vmatprep.subr.mxu1 %v7918_v28  ;;  %v7919_v4 = vsel %vm3964_vm8, %v7902_v11, %v7904_v46 }
 0x7f6   : > { %v7906_v5 = vpop.permute.xlu1 %7905 }
 0x7f7   : > { %v7920_v12 = vsel %vm3964_vm8, %v7904_v46, %v7906_v5  ;;  %v7898_v37 = vpop.permute.xlu0 %7897 }
 0x7f8   : > { %8042 = vmatprep.subr.mxu0 %v7920_v12  ;;  %v7917_v29 = vsel %vm3964_vm8, %v7898_v37, %v7900_v62 }
 0x7f9   : > { %8043 = vmatpush1.msra.mxu0 %v7919_v4  ;;  %7972 = vmatpush1.msra.mxu1 %v7917_v29 }
 0x7fa   : > { %v7908_v48 = vpop.permute.xlu1 %7907  ;;  %10897 = vmatmul.mubr.msk.f32.vlgmr.msra.gmra.mxu0 %vm4886_vm11, %v10895_v43  ;;  %10896 = vmatmul.mubr.msk.f32.vlgmr.msra.gmra.mxu1 %vm4886_vm11, %v10895_v43 }
 0x7fb   : > { %8218 = vmatprep.mubr.f32.mxu0 %v14230_v55  ;;  %v7910_v50 = vpop.permute.xlu0 %7909  ;;  %v7921_v51 = vsel %vm3964_vm8, %v7906_v5, %v7908_v48  ;;  %8147 = vmatprep.mubr.f32.mxu1 %v14230_v55 }
 0x7fc   : > { %v7922_v9 = vsel %vm3964_vm8, %v7908_v48, %v7910_v50 }
 0x7fd   : > { %8113 = vmatprep.subr.mxu1 %v7922_v9 }
 0x7fe   : > { %v7912_v31 = vpop.permute.xlu1 %7911  ;;  %8114 = vmatpush1.msra.mxu1 %v7921_v51 }
 0x7ff   : > { %v7914_v35 = vpop.permute.xlu0 %7913  ;;  %10898 = vmatmul.mubr.msk.f32.vlgmr.msra.gmra.mxu1 %vm4886_vm11, %v10895_v43  ;;  %v7923_v47 = vsel %vm3964_vm8, %v7910_v50, %v7912_v31 }
 0x800   : > { %v7924_v27 = vsel %vm3964_vm8, %v7912_v31, %v7914_v35  ;;  %8289 = vmatprep.mubr.f32.mxu1 %v14230_v55 }
 0x801   : > { %8184 = vmatprep.subr.mxu0 %v7924_v27 }
 0x802   : > { %v7916_v54 = vpop.permute.xlu1 %7915  ;;  %8185 = vmatpush1.msra.mxu0 %v7923_v47 }
 0x803   : > { %v7937_v44 = vsel %vm3964_vm8, %v7916_v54, %v7898_v37  ;;  %v7925_v39 = vsel %vm3964_vm8, %v7914_v35, %v7916_v54  ;;  %v8311_v33 = vpop.permute.xlu0 %8310  ;;  %10899 = vmatmul.mubr.msk.f32.vlgmr.msra.gmra.mxu0 %vm4886_vm11, %v10895_v43 }
 0x804   : > { %8255 = vmatprep.subr.mxu1 %v7937_v44  ;;  %8416 = vmatprep.mubr.f32.mxu0 %v14230_v55 }
 0x805   : > { %8256 = vmatpush1.msra.mxu1 %v7925_v39 }
 0x806   : > { %v8313_v40 = vpop.permute.xlu1 %8312  ;;  %10900 = vmatmul.mubr.msk.f32.vlgmr.msra.gmra.mxu1 %vm4886_vm11, %v10895_v43 }
 0x807   : > { %v8329_v59 = vsel %vm4388_vm9, %v8311_v33, %v8313_v40  ;;  %8487 = vmatprep.mubr.f32.mxu1 %v14230_v55  ;;  %v8309_v16 = vpop.permute.xlu0 %8308 }
 0x808   : > { %8382 = vmatprep.subr.mxu0 %v8329_v59  ;;  %v8328_v63 = vsel %vm4388_vm9, %v8309_v16, %v8311_v33 }
 0x809   : > { %8383 = vmatpush1.msra.mxu0 %v8328_v63 }
 0x80a   : > { %v8315_v60 = vpop.permute.xlu1 %8314  ;;  %10902 = vmatmul.mubr.msk.f32.vlgmr.msra.gmra.mxu0 %vm4886_vm11, %v10901_v13 }
 0x80b   : > { %v8317_v56 = vpop.permute.xlu0 %8316  ;;  %v8330_v53 = vsel %vm4388_vm9, %v8313_v40, %v8315_v60  ;;  %8558 = vmatprep.mubr.f32.mxu0 %v14230_v55 }
 0x80c   : > { %v8331_v57 = vsel %vm4388_vm9, %v8315_v60, %v8317_v56 }
 0x80d   : > { %8453 = vmatprep.subr.mxu1 %v8331_v57 }
 0x80e   : > { %v8319_v20 = vpop.permute.xlu1 %8318  ;;  %8454 = vmatpush1.msra.mxu1 %v8330_v53 }
 0x80f   : > { %v8321_v1 = vpop.permute.xlu0 %8320  ;;  %10903 = vmatmul.mubr.msk.f32.vlgmr.msra.gmra.mxu1 %vm4886_vm11, %v10901_v13  ;;  %v8332_v15 = vsel %vm4388_vm9, %v8317_v56, %v8319_v20 }
 0x810   : > { %v8333_v30 = vsel %vm4388_vm9, %v8319_v20, %v8321_v1  ;;  %8629 = vmatprep.mubr.f32.mxu1 %v14230_v55 }
 0x811   : > { %8524 = vmatprep.subr.mxu0 %v8333_v30 }
 0x812   : > { %v8323_v22 = vpop.permute.xlu1 %8322  ;;  %8525 = vmatpush1.msra.mxu0 %v8332_v15 }
 0x813   : > { %v8325_v21 = vpop.permute.xlu0 %8324  ;;  %10904 = vmatmul.mubr.msk.f32.vlgmr.msra.gmra.mxu0 %vm4886_vm11, %v10901_v13  ;;  %v8334_v8 = vsel %vm4388_vm9, %v8321_v1, %v8323_v22 }
 0x814   : > { %v8335_v14 = vsel %vm4388_vm9, %v8323_v22, %v8325_v21  ;;  %8700 = vmatprep.mubr.f32.mxu0 %v14230_v55 }
 0x815   : > { %8595 = vmatprep.subr.mxu1 %v8335_v14 }
 0x816   : > { %v8327_v45 = vpop.permute.xlu1 %8326  ;;  %8596 = vmatpush1.msra.mxu1 %v8334_v8 }
 0x817   : > { %v8348_v49 = vsel %vm4388_vm9, %v8327_v45, %v8309_v16  ;;  %v8336_v7 = vsel %vm4388_vm9, %v8325_v21, %v8327_v45  ;;  %10905 = vmatmul.mubr.msk.f32.vlgmr.msra.gmra.mxu1 %vm4886_vm11, %v10901_v13  ;;  %10924 = vmatprep.subr.mxu1 %v14230_v55 }
 0x818   : > { %8666 = vmatprep.subr.mxu0 %v8348_v49  ;;  %10926 = vmatprep.mubr.msk.f32.mxu1 %vm11306_vm10, %v14230_v55 }
 0x819   : > { %8667 = vmatpush1.msra.mxu0 %v8336_v7 }
 0x81a   : > { %10906 = vmatmul.mubr.msk.f32.vlgmr.msra.gmra.mxu0 %vm4886_vm11, %v10901_v13 }
 0x83e   : > { %v12919_v18 = vpop.f32.mrf.mxu0 }
 0x840   : > { %v12921_v25 = vpop.f32.mrf.mxu0 }
 0x843   : > { %v12923_v19 = vpop.f32.mrf.mxu1 }
 0x845   : > { %v12927_v38 = vpop.f32.mrf.mxu1 }
 0x847   : > { %v12925_v6 = vpop.f32.mrf.mxu0 }
 0x849   : > { %v12929_v26 = vpop.f32.mrf.mxu0 }
 0x84b   : > { %v12931_v10 = vpop.f32.mrf.mxu1 }
 0x84d   : > { %v12935_v58 = vpop.f32.mrf.mxu1 }
 0x84e   : > { %v12933_v3 = vpop.f32.mrf.mxu0 }
 0x850   : > { %v12937_v52 = vpop.f32.mrf.mxu0 }
 0x856   : > { %v12939_v62 = vpop.f32.mrf.mxu0 }
 0x857   : > { %v5592_v11 = vpop.f32.mrf.mxu1 }
 0x858   : > { %v12941_v5 = vpop.f32.mrf.mxu0 }
 0x859   : > { %v5594_v28 = vpop.f32.mrf.mxu1 }
 0x85b   : > { %v12943_v46 = vpop.f32.mrf.mxu1 }
 0x85d   : > { %v12947_v4 = vpop.f32.mrf.mxu1 }
 0x85f   : > { %v12945_v12 = vpop.f32.mrf.mxu0 }
 0x861   : > { %v12949_v43 = vpop.f32.mrf.mxu0 }
 0x862   : > { %v12951_v48 = vpop.f32.mrf.mxu1 }
 0x864   : > { %v12953_v29 = vpop.f32.mrf.mxu1 }
 0x866   : > { %v5993_v37 = vpop.f32.mrf.mxu0 }
 0x868   : > { %v5995_v31 = vpop.f32.mrf.mxu0 }
 0x86b   : > { %v6064_v50 = vpop.f32.mrf.mxu1 }
 0x86d   : > { %v12957_v9 = vpop.f32.mrf.mxu1 }
 0x86f   : > { %v12955_v51 = vpop.f32.mrf.mxu0 }
 0x871   : > { %v12959_v54 = vpop.f32.mrf.mxu0 }
 0x873   : > { %v12961_v35 = vpop.f32.mrf.mxu1 }
 0x875   : > { %v12965_v44 = vpop.f32.mrf.mxu1 }
 0x876   : > { %v12963_v47 = vpop.f32.mrf.mxu0 }
 0x878   : > { %v12967_v27 = vpop.f32.mrf.mxu0 }
 0x87e   : > { %v6404_v39 = vpop.f32.mrf.mxu1  ;;  %v12969_v33 = vpop.f32.mrf.mxu0 }
 0x880   : > { %v6406_v40 = vpop.f32.mrf.mxu1  ;;  %v12973_v60 = vpop.f32.mrf.mxu0 }
 0x883   : > { %v12971_v59 = vpop.f32.mrf.mxu1 }
 0x885   : > { %v12975_v16 = vpop.f32.mrf.mxu1 }
 0x887   : > { %v12977_v13 = vpop.f32.mrf.mxu0 }
 0x889   : > { %v12979_v63 = vpop.f32.mrf.mxu0 }
 0x88b   : > { %v12981_v20 = vpop.f32.mrf.mxu1  ;;  %v6774_v56 = vpop.f32.mrf.mxu0 }
 0x88d   : > { %v12983_v53 = vpop.f32.mrf.mxu1  ;;  %v6776_v57 = vpop.f32.mrf.mxu0 }
 0x88f   : > { %v12985_v22 = vpop.f32.mrf.mxu1  ;;  %v12987_v1 = vpop.f32.mrf.mxu0 }
 0x891   : > { %v12989_v15 = vpop.f32.mrf.mxu1  ;;  %v12991_v30 = vpop.f32.mrf.mxu0 }
 0x893   : > { %v12993_v45 = vpop.f32.mrf.mxu1  ;;  %v12995_v21 = vpop.f32.mrf.mxu0 }
 0x894   : > { %14231 = vst [vmem:[#allocation20_spill] sm:$0xff] %v12993_v45  ;;  %14232 = vst [vmem:[#allocation21_spill] sm:$0xff] %v12995_v21 }
 0x895   : > { %v12997_v8 = vpop.f32.mrf.mxu1  ;;  %v12999_v49 = vpop.f32.mrf.mxu0 }
 0x896   : > { %14233 = vst [vmem:[#allocation17_spill] sm:$0xff] %v12997_v8  ;;  %14234 = vst [vmem:[#allocation23_spill] sm:$0xff] %v12999_v49 }
 0x897   : > { %v7185_v14 = vpop.f32.mrf.mxu1  ;;  %v13001_v7 = vpop.f32.mrf.mxu0 }
 0x899   : > { %v7187_v55 = vpop.f32.mrf.mxu1  ;;  %v13003_v23 = vpop.f32.mrf.mxu0 }
 0x89b   : > { %v13005_v17 = vpop.f32.mrf.mxu1  ;;  %v13007_v42 = vpop.f32.mrf.mxu0 }
 0x89c   : > { %14235 = vst [vmem:[#allocation18_spill] sm:$0xff] %v13005_v17  ;;  %14236 = vst [vmem:[#allocation22_spill] sm:$0xff] %v13007_v42 }
 0x89d   : > { %v13009_v34 = vpop.f32.mrf.mxu1  ;;  %v13011_v2 = vpop.f32.mrf.mxu0 }
 0x89e   : > { %14237 = vst [vmem:[#allocation24_spill] sm:$0xff] %v13009_v34  ;;  %14238 = vst [vmem:[#allocation33_spill] sm:$0xff] %v13011_v2  ;;  %v5593_v2 = vadd.f32 %v5592_v11, %v12919_v18 }
 0x89f   : > { %v13013_v61 = vpop.f32.mrf.mxu1 }
 0x8a0   : > { %14239 = vst [vmem:[#allocation34_spill] sm:$0xff] %v13013_v61  ;;  %v5595_v61 = vadd.f32 %v5594_v28, %v12921_v25  ;;  %v6282_v21 = vadd.f32 %v5993_v37, %v5593_v2  ;;  %v5806_v25 = vadd.f32 %v12945_v12, %v12931_v10  ;;  %v5737_v2 = vadd.f32 %v12947_v4, %v12929_v26 }
 0x8a1   : > { %v13015_v32 = vpop.f32.mrf.mxu1 }
 0x8a2   : > { %v7596_v41 = vpop.f32.mrf.mxu0  ;;  %14240 = vst [vmem:[#allocation35_spill] sm:$0xff] %v13015_v32  ;;  %v6693_v18 = vadd.f32 %v6404_v39, %v6282_v21  ;;  %v6287_v4 = vadd.f32 %v12959_v54, %v5737_v2 }
 0x8a4   : > { %v7598_v0 = vpop.f32.mrf.mxu0 }
 0x8a7   : > { %v13017_v36 = vpop.f32.mrf.mxu1 }
 0x8a8   : > { %14241 = vst [vmem:[#allocation36_spill] sm:$0xff] %v13017_v36  ;;  %v6283_v36 = vadd.f32 %v5995_v31, %v5595_v61 }
 0x8a9   : > { %v13021_v8 = vpop.f32.mrf.mxu1 }
 0x8aa   : > { %14243 = vst [vmem:[#allocation38_spill] sm:$0xff] %v13021_v8  ;;  %v6694_v61 = vadd.f32 %v6406_v40, %v6283_v36 }
 0x8ab   : > { %v13019_v49 = vpop.f32.mrf.mxu0 }
 0x8ac   : > { %14242 = vst [vmem:[#allocation37_spill] sm:$0xff] %v13019_v49  ;;  %v5664_v49 = vadd.f32 %v12939_v62, %v12923_v19  ;;  %v5877_v19 = vadd.f32 %v12951_v48, %v12933_v3  ;;  %v7063_v62 = vadd.f32 %v6774_v56, %v6693_v18  ;;  %v7064_v26 = vadd.f32 %v6776_v57, %v6694_v61 }
 0x8ad   : > { %v13023_v24 = vpop.f32.mrf.mxu0  ;;  %v6288_v3 = vadd.f32 %v12961_v35, %v5806_v25 }
 0x8ae   : > { %v6284_v28 = vadd.f32 %v6064_v50, %v5664_v49  ;;  %v7474_v12 = vadd.f32 %v7185_v14, %v7063_v62  ;;  %v6290_v48 = vadd.f32 %v12963_v47, %v5877_v19  ;;  %v14250_v14 = vld [vmem:[#allocation25_spill] sm:$0xff]  ;;  %v14255_v19 = vld [vmem:[#allocation22_spill] sm:$0xff]  ;;  %v14256_v62 = vld [vmem:[#allocation24_spill] sm:$0xff] }
 0x8af   : > { %v13025_v17 = vpop.f32.mrf.mxu1 }
 0x8b0   : > { %14244 = vst [vmem:[#allocation39_spill] sm:$0xff] %v13025_v17  ;;  %v5666_v17 = vadd.f32 %v12941_v5, %v12927_v38  ;;  %v5879_v38 = vadd.f32 %v12953_v29, %v12937_v52  ;;  %v6695_v36 = vadd.f32 %v12969_v33, %v6284_v28  ;;  %v6701_v40 = vadd.f32 %v12981_v20, %v6290_v48 }
 0x8b1   : > { %v13031_v34 = vpop.f32.mrf.mxu1  ;;  %v14253_v25 = vld [vmem:[#allocation38_spill] sm:$0xff] }
 0x8b2   : > { %v13027_v42 = vpop.f32.mrf.mxu0  ;;  %v6285_v10 = vadd.f32 %v12957_v9, %v5666_v17  ;;  %v6291_v52 = vadd.f32 %v12967_v27, %v5879_v38  ;;  %v7065_v29 = vadd.f32 %v12985_v22, %v6695_v36  ;;  %v6698_v9 = vadd.f32 %v12975_v16, %v6287_v4  ;;  %v14248_v22 = vld [vmem:[#allocation20_spill] sm:$0xff]  ;;  %v14257_v38 = vld [vmem:[#allocation26_spill] sm:$0xff] }
 0x8b3   : > { %14245 = vst [vmem:[#allocation40_spill] sm:$0xff] %v13027_v42  ;;  %v5735_v42 = vadd.f32 %v12943_v46, %v12925_v6  ;;  %v5808_v6 = vadd.f32 %v12949_v43, %v12935_v58  ;;  %v7475_v58 = vadd.f32 %v7187_v55, %v7064_v26  ;;  %v7885_v43 = vadd.f32 %v7596_v41, %v7474_v12  ;;  %v14258_v26 = vld [vmem:[#allocation33_spill] sm:$0xff] }
 0x8b4   : > { %v13033_v32 = vpop.f32.mrf.mxu0  ;;  %v6699_v41 = vadd.f32 %v12977_v13, %v6288_v3  ;;  %v7476_v27 = vadd.f32 %v13001_v7, %v7065_v29  ;;  %v6702_v33 = vadd.f32 %v12983_v53, %v6291_v52  ;;  %v14247_v13 = vld [vmem:[#allocation36_spill] sm:$0xff]  ;;  %v14251_v7 = vld [vmem:[#allocation17_spill] sm:$0xff]  ;;  %v14261_v29 = vld [vmem:[#allocation35_spill] sm:$0xff] }
 0x8b5   : > { %14246 = vst [vmem:[#allocation41_spill] sm:$0xff] %v13033_v32  ;;  %v6286_v46 = vadd.f32 %v12955_v51, %v5735_v42  ;;  %v6289_v17 = vadd.f32 %v12965_v44, %v5808_v6  ;;  %v6696_v42 = vadd.f32 %v12973_v60, %v6285_v10  ;;  %v7886_v54 = vadd.f32 %v7598_v0, %v7475_v58  ;;  %v14259_v3 = vld [vmem:[#allocation37_spill] sm:$0xff]  ;;  %v14260_v58 = vld [vmem:[#allocation34_spill] sm:$0xff] }
 0x8b6   : > { %v7068_v0 = vadd.f32 %v12991_v30, %v6698_v9  ;;  %v7887_v57 = vadd.f32 %v14247_v13, %v7476_v27 }
 0x8b7   : > { %v6697_v51 = vadd.f32 %v12971_v59, %v6286_v46  ;;  %v6700_v47 = vadd.f32 %v12979_v63, %v6289_v17  ;;  %v7066_v44 = vadd.f32 %v12989_v15, %v6696_v42  ;;  %v7069_v15 = vadd.f32 %v14248_v22, %v6699_v41 }
 0x8b8   : > { %v7479_v6 = vadd.f32 %v14256_v62, %v7068_v0 }
 0x8b9   : > { %v7067_v16 = vadd.f32 %v12987_v1, %v6697_v51  ;;  %v7477_v56 = vadd.f32 %v13003_v23, %v7066_v44  ;;  %v7070_v18 = vadd.f32 %v14251_v7, %v6700_v47  ;;  %v14254_v23 = vld [vmem:[#allocation23_spill] sm:$0xff]  ;;  %v7480_v61 = vadd.f32 %v14255_v19, %v7069_v15 }
 0x8ba   : > { %v8007_v45 = vpop.f32.mrf.mxu1  ;;  %v8078_v8 = vpop.f32.mrf.mxu0  ;;  %v7072_v2 = vadd.f32 %v14254_v23, %v6702_v33  ;;  %v7890_v41 = vadd.f32 %v13023_v24, %v7479_v6  ;;  %v14263_v47 = vld [vmem:[#allocation39_spill] sm:$0xff]  ;;  %v14264_v27 = vld [vmem:[#allocation40_spill] sm:$0xff] }
 0x8bb   : > { %v8296_v35 = vadd.f32 %v8007_v45, %v7885_v43  ;;  %v14249_v45 = vld [vmem:[#allocation21_spill] sm:$0xff]  ;;  %v7888_v30 = vadd.f32 %v14253_v25, %v7477_v56  ;;  %v8298_v28 = vadd.f32 %v8078_v8, %v7887_v57  ;;  %v7481_v12 = vadd.f32 %v14258_v26, %v7070_v18 }
 0x8bc   : > { %v8009_v11 = vpop.f32.mrf.mxu1  ;;  %v8080_v32 = vpop.f32.mrf.mxu0  ;;  %v7071_v21 = vadd.f32 %v14249_v45, %v6701_v40  ;;  %v7483_v51 = vadd.f32 %v14261_v29, %v7072_v2  ;;  %v7891_v44 = vadd.f32 %v14263_v47, %v7480_v61  ;;  %v14266_v13 = vld [vmem:[#allocation41_spill] sm:$0xff]  ;;  %v14268_v2 = vld [vmem:[#allocation30_spill] sm:$0xff] }
 0x8bd   : > { %v8297_v60 = vadd.f32 %v8009_v11, %v7886_v54  ;;  %v14252_v11 = vld [vmem:[#allocation18_spill] sm:$0xff]  ;;  %v8299_v4 = vadd.f32 %v8080_v32, %v7888_v30  ;;  %v14262_v54 = vld [vmem:[#allocation27_spill] sm:$0xff]  ;;  %v7892_v56 = vadd.f32 %v13031_v34, %v7481_v12 }
 0x8be   : > { %v7478_v1 = vadd.f32 %v14252_v11, %v7067_v16  ;;  %v7482_v43 = vadd.f32 %v14260_v58, %v7071_v21  ;;  %v14265_v16 = vld [vmem:[#allocation28_spill] sm:$0xff]  ;;  %v7894_v57 = vadd.f32 %v14266_v13, %v7483_v51 }
 0x8bf   : > { %v13047_v37 = vpop.f32.mrf.mxu1  ;;  %v14271_v58 = vld [vmem:[#allocation32_spill] sm:$0xff] }
 0x8c0   : > { %v7889_v36 = vadd.f32 %v14259_v3, %v7478_v1 }
 0x8c1   : > { %v13061_v31 = vpop.f32.mrf.mxu1 }
 0x8c2   : > { %v8300_v9 = vadd.f32 %v13047_v37, %v7889_v36  ;;  %v8301_v24 = vadd.f32 %v13061_v31, %v7890_v41  ;;  %v14270_v36 = vld [vmem:[#allocation15_spill] sm:$0xff] }
 0x8c3   : > { %v13054_v5 = vpop.f32.mrf.mxu0 }
 0x8c5   : > { %v13067_v50 = vpop.f32.mrf.mxu0 }
 0x8c6   : > { %v8291_v55 = vpop.f32.mrf.mxu1  ;;  %v8303_v18 = vadd.f32 %v13067_v50, %v7892_v56  ;;  %v14269_v50 = vld [vmem:[#allocation31_spill] sm:$0xff] }
 0x8c8   : > { %v8293_v49 = vpop.f32.mrf.mxu1 }
 0x8c9   : > { %v8305_v34 = vadd.f32 %v8293_v49, %v7894_v57 }
 0x8ca   : > { %v8418_v39 = vpop.f32.mrf.mxu0 }
 0x8cb   : > { %v8707_v59 = vadd.f32 %v8418_v39, %v8296_v35  ;;  %v7893_v39 = vadd.f32 %v14264_v27, %v7482_v43 }
 0x8cc   : > { %v8420_v63 = vpop.f32.mrf.mxu0 }
 0x8cd   : > { %v13084_v20 = vmul.f32 %v8707_v59, %v14250_v14  ;;  %v8708_v53 = vadd.f32 %v8420_v63, %v8297_v60  ;;  %v8302_v63 = vadd.f32 %v13054_v5, %v7891_v44  ;;  %v8304_v11 = vadd.f32 %v8291_v55, %v7893_v39 }
 0x8cf   : > { %v13093_v10 = vmul.f32 %v8708_v53, %v14257_v38  ;;  %v8489_v46 = vpop.f32.mrf.mxu1  ;;  %v8738_v8 = vmul.f32 %v13084_v20, %v13084_v20  ;;  %v14267_v53 = vld [vmem:[#allocation29_spill] sm:$0xff] }
 0x8d0   : > { %v8709_v48 = vadd.f32 %v8489_v46, %v8298_v28 }
 0x8d1   : > { %v8727_v17 = vadd.f32 %v13093_v10, %v13084_v20  ;;  %v8739_v52 = vmul.f32 %v13093_v10, %v13093_v10  ;;  %v8491_v42 = vpop.f32.mrf.mxu1 }
 0x8d2   : > { %v13107_v35 = vmul.f32 %v8709_v48, %v14262_v54  ;;  %v8710_v32 = vadd.f32 %v8491_v42, %v8299_v4 }
 0x8d3   : > { %v8748_v40 = vadd.f32 %v8739_v52, %v8738_v8  ;;  %v8560_v33 = vpop.f32.mrf.mxu0  ;;  %v14272_v52 = vld [vmem:[#allocation16_spill] sm:$0xff] }
 0x8d4   : > { %v8728_v60 = vadd.f32 %v8727_v17, %v13107_v35  ;;  %v8740_v59 = vmul.f32 %v13107_v35, %v13107_v35  ;;  %v13116_v0 = vmul.f32 %v8710_v32, %v14265_v16  ;;  %v8711_v37 = vadd.f32 %v8560_v33, %v8300_v9 }
 0x8d5   : > { %v8562_v22 = vpop.f32.mrf.mxu0 }
 0x8d6   : > { %v8749_v15 = vadd.f32 %v8748_v40, %v8740_v59  ;;  %v8729_v45 = vadd.f32 %v8728_v60, %v13116_v0  ;;  %v8741_v21 = vmul.f32 %v13116_v0, %v13116_v0  ;;  %v13126_v7 = vmul.f32 %v8711_v37, %v14267_v53  ;;  %v11109_v37 = vld [vmem:[#allocation7] sm:$0xff] }
 0x8d7   : > { %v8712_v1 = vadd.f32 %v8562_v22, %v8301_v24  ;;  %v8631_v25 = vpop.f32.mrf.mxu1 }
 0x8d8   : > { %v8750_v31 = vadd.f32 %v8749_v15, %v8741_v21  ;;  %v8730_v5 = vadd.f32 %v8729_v45, %v13126_v7  ;;  %v8742_v28 = vmul.f32 %v13126_v7, %v13126_v7  ;;  %v8713_v23 = vadd.f32 %v8631_v25, %v8302_v63 }
 0x8d9   : > { %v13133_v19 = vmul.f32 %v8712_v1, %v14268_v2  ;;  %v8633_v61 = vpop.f32.mrf.mxu1  ;;  %v11309_v45 = vmov 2   ;;  %v11311_v1 = vmov 3  }
 0x8da   : > { %v8702_v30 = vpop.f32.mrf.mxu0  ;;  %v8751_v46 = vadd.f32 %v8750_v31, %v8742_v28  ;;  %v13136_v55 = vmul.f32 %v8713_v23, %v14269_v50  ;;  %v8714_v49 = vadd.f32 %v8633_v61, %v8303_v18  ;;  %11061 = vset.pattern.permute.xlu0 %v11309_v45  ;;  %11062 = vset.pattern.permute.xlu1 %v11311_v1 }
 0x8db   : > { %v8715_v62 = vadd.f32 %v8702_v30, %v8304_v11  ;;  %v8731_v12 = vadd.f32 %v8730_v5, %v13133_v19  ;;  %v8743_v3 = vmul.f32 %v13133_v19, %v13133_v19  ;;  %v11110_v11 = vld [vmem:[%s14145_s5] sm:$0xff] }
 0x8dc   : > { %v8704_v6 = vpop.f32.mrf.mxu0  ;;  %v8744_v48 = vmul.f32 %v13136_v55, %v13136_v55  ;;  %v13147_v43 = vmul.f32 %v8714_v49, %v14271_v58 }
 0x8dd   : > { %v8716_v26 = vadd.f32 %v8704_v6, %v8305_v34  ;;  %v13142_v4 = vmul.f32 %v8715_v62, %v14270_v36  ;;  %v8752_v8 = vadd.f32 %v8751_v46, %v8743_v3  ;;  %v8732_v17 = vadd.f32 %v8731_v12, %v13136_v55 }
 0x8de   : > { %v8745_v29 = vmul.f32 %v13147_v43, %v13147_v43 }
 0x8df   : > { %v13151_v42 = vmul.f32 %v8716_v26, %v14272_v52  ;;  %v8753_v51 = vadd.f32 %v8752_v8, %v8744_v48  ;;  %v8733_v9 = vadd.f32 %v8732_v17, %v13147_v43  ;;  %v8746_v32 = vmul.f32 %v13142_v4, %v13142_v4 }
 0x8e1   : > { %v8734_v41 = vadd.f32 %v8733_v9, %v13142_v4  ;;  %v8747_v47 = vmul.f32 %v13151_v42, %v13151_v42  ;;  %v8754_v44 = vadd.f32 %v8753_v51, %v8745_v29 }
 0x8e3   : > { %v8735_v27 = vadd.f32 %v8734_v41, %v13151_v42  ;;  %v8755_v39 = vadd.f32 %v8754_v44, %v8746_v32 }
 0x8e5   : > { %8736 = vadd.xlane.f32.xlu0 %v8735_v27  ;;  %v8756_v40 = vadd.f32 %v8755_v39, %v8747_v47 }
 0x8e7   : > { %8757 = vadd.xlane.f32.xlu1 %v8756_v40 }
 0x96e   : > { %v8737_v33 = vpop.xlane.xlu0 %8736 }
 0x970   : > { %v8758_v60 = vpop.xlane.xlu1 %8757 }
 0x971   : > { %v8759_v59 = vsel %vm2303_vm4, %v8737_v33, %v8758_v60  ;;  %vm9054_vm4 = vcmask 97280  }
 0x972   : > { %10925 = vmatpush3.msra.mxu1 %v8759_v59 }
 0x973   : > { %10927 = vmatmul.mubr.msk.f32.vlgmr.msra.gmra.mxu1 %vm4886_vm11, %v11109_v37 }
 0xa33   : > { %v8826_v56 = vpop.f32.mrf.mxu1 }
 0xa34   : > { %v8830_v13 = vmul.f32 %v8826_v56, %v8826_v56 }
 0xa35   : > { %v10928_v57 = vpop.f32.mrf.mxu1 }
 0xa36   : > { %8832 = vrot.lane.b32.xlu0 %v8830_v13, %s11300_s23 }
 0xaa8   : > { %v8833_v24 = vpop.permute.xlu0 %8832 }
 0xaa9   : > { %v8835_v63 = vsub.f32 %v8826_v56, %v8833_v24 }
 0xaab   : > { %v8836_v22 = vmax.f32 %v8835_v63, 0.0 }
 0xaad   : > { %v8837_v15 = vadd.f32 1e-05, %v8836_v22 }
 0xaaf   : > { %11087 = vrsqrt.f32 %v8837_v15 }
 0xabc   : > { %v11088_v21 = vpop.eup %11087 }
 0xabd   : > { %8840 = vrot.lane.b32.xlu1 %v11088_v21, %s11300_s23  ;;  %s11313_s23 = smov 26  }
 0xb2f   : > { %v8841_v18 = vpop.permute.xlu1 %8840 }
 0xb30   : > { %v8843_v34 = vmul.f32 %v11110_v11, %v8841_v18 }
 0xb32   : > { %8845 = vrot.lane.b32.xlu0 %v8843_v34, %s11310_s29  ;;  %s11324_s29 = smov 120  }
 0xb36   : > { %8855 = vperm.xlu0 %11061, %v8843_v34  }
 0xb3a   : > { %11063 = vset.pattern.permute.xlu0 %v11311_v1 }
 0xba4   : > { %v8846_v25 = vpop.permute.xlu0 %8845 }
 0xba5   : > { %v8848_v30 = vmul.f32 %v8846_v25, %v8826_v56 }
 0xba7   : > { %8850 = vrot.lane.b32.xlu1 %v8848_v30, %s11312_s19  ;;  %s11325_s19 = smov 112  }
 0xbb1   : > { %v8856_v28 = vpop.permute.xlu0 %8855 }
 0xbb2   : > { %v8859_v23 = vmul.f32 %v8856_v28, %v13093_v10  ;;  %v8858_v61 = vmul.f32 %v8856_v28, %v13084_v20  ;;  %v8860_v62 = vmul.f32 %v8856_v28, %v13107_v35  ;;  %v8861_v6 = vmul.f32 %v8856_v28, %v13116_v0 }
 0xbb3   : > { %v8862_v49 = vmul.f32 %v8856_v28, %v13126_v7  ;;  %v8863_v10 = vmul.f32 %v8856_v28, %v13133_v19  ;;  %v8864_v0 = vmul.f32 %v8856_v28, %v13136_v55  ;;  %v8865_v41 = vmul.f32 %v8856_v28, %v13147_v43 }
 0xbb4   : > { %v8866_v27 = vmul.f32 %v8856_v28, %v13142_v4  ;;  %v8867_v13 = vmul.f32 %v8856_v28, %v13151_v42 }
 0xc19   : > { %v8851_v31 = vpop.permute.xlu1 %8850 }
 0xc1a   : > { %v8853_v5 = vsub.f32 %v11110_v11, %v8851_v31 }
 0xc1c   : > { %8870 = vperm.xlu1 %11062, %v8853_v5  }
 0xc97   : > { %v8871_v46 = vpop.permute.xlu1 %8870 }
 0xc98   : > { %v8874_v26 = vadd.f32 %v8871_v46, %v8859_v23  ;;  %v8873_v12 = vadd.f32 %v8871_v46, %v8858_v61  ;;  %v8875_v3 = vadd.f32 %v8871_v46, %v8860_v62  ;;  %v8876_v48 = vadd.f32 %v8871_v46, %v8861_v6 }
 0xc99   : > { %v8877_v29 = vadd.f32 %v8871_v46, %v8862_v49  ;;  %v8878_v35 = vadd.f32 %v8871_v46, %v8863_v10  ;;  %v8879_v32 = vadd.f32 %v8871_v46, %v8864_v0  ;;  %v8880_v44 = vadd.f32 %v8871_v46, %v8865_v41 }
 0xc9a   : > { %v8894_v8 = vmul.f32 0.70710677, %v8874_v26  ;;  %v8893_v17 = vmul.f32 0.70710677, %v8873_v12  ;;  %v8895_v51 = vmul.f32 0.70710677, %v8875_v3  ;;  %v13178_v40 = vadd.f32 %v8871_v46, %v8866_v27 }
 0xc9b   : > { %v8896_v9 = vmul.f32 0.70710677, %v8876_v48  ;;  %v8897_v20 = vmul.f32 0.70710677, %v8877_v29  ;;  %v8898_v7 = vmul.f32 0.70710677, %v8878_v35  ;;  %v8882_v15 = vadd.f32 %v8871_v46, %v8867_v13 }
 0xc9c   : > { %11089 = verf.f32 %v8894_v8  ;;  %v8899_v47 = vmul.f32 0.70710677, %v8879_v32  ;;  %v8884_v33 = vmul.f32 0.5, %v8874_v26  ;;  %v8900_v59 = vmul.f32 0.70710677, %v8880_v44 }
 0xc9d   : > { %11091 = verf.f32 %v8893_v17  ;;  %v8883_v55 = vmul.f32 0.5, %v8873_v12  ;;  %v8885_v24 = vmul.f32 0.5, %v8875_v3  ;;  %v8901_v4 = vmul.f32 0.70710677, %v13178_v40 }
 0xc9e   : > { %11093 = verf.f32 %v8895_v51  ;;  %v8886_v42 = vmul.f32 0.5, %v8876_v48  ;;  %v8902_v1 = vmul.f32 0.70710677, %v8882_v15  ;;  %v8887_v5 = vmul.f32 0.5, %v8877_v29 }
 0xc9f   : > { %11095 = verf.f32 %v8896_v9  ;;  %v8890_v8 = vmul.f32 0.5, %v8880_v44  ;;  %v8891_v9 = vmul.f32 0.5, %v13178_v40 }
 0xca0   : > { %11097 = verf.f32 %v8897_v20 }
 0xca1   : > { %11099 = verf.f32 %v8898_v7 }
 0xca2   : > { %11101 = verf.f32 %v8899_v47 }
 0xca3   : > { %11103 = verf.f32 %v8900_v59 }
 0xca4   : > { %11105 = verf.f32 %v8901_v4 }
 0xca5   : > { %11107 = verf.f32 %v8902_v1 }
 0xca9   : > { %v11090_v39 = vpop.eup %11089 }
 0xcaa   : > { %v11092_v19 = vpop.eup %11091  ;;  %v8914_v60 = vadd.f32 1.0, %v11090_v39 }
 0xcab   : > { %v11094_v37 = vpop.eup %11093  ;;  %v8913_v56 = vadd.f32 1.0, %v11092_v19 }
 0xcac   : > { %v11096_v57 = vpop.eup %11095  ;;  %v8924_v43 = vmul.f32 %v8914_v60, %v8884_v33  ;;  %v8915_v63 = vadd.f32 1.0, %v11094_v37 }
 0xcad   : > { %v8923_v22 = vmul.f32 %v8913_v56, %v8883_v55  ;;  %v8916_v18 = vadd.f32 1.0, %v11096_v57  ;;  %v11098_v11 = vpop.eup %11097  ;;  %v11345_v55 = vmov 1983009808  }
 0xcae   : > { %v13183_v45 = vmul.f32 %v8924_v43, %v14257_v38  ;;  %v8925_v21 = vmul.f32 %v8915_v63, %v8885_v24  ;;  %v8917_v38 = vadd.f32 1.0, %v11098_v11  ;;  %v11100_v31 = vpop.eup %11099  ;;  %v9090_v56 = vunpack.c.l.s4 %v11345_v55 }
 0xcaf   : > { %v13186_v34 = vmul.f32 %v8923_v22, %v14250_v14  ;;  %v8926_v30 = vmul.f32 %v8916_v18, %v8886_v42  ;;  %v8918_v23 = vadd.f32 1.0, %v11100_v31  ;;  %v11102_v61 = vpop.eup %11101  ;;  %v14273_v22 = vld [vmem:[#allocation19_spill] sm:$0xff] }
 0xcb0   : > { %8953 = vrot.lane.b32.xlu0 %v13183_v45, %s11313_s23  ;;  %v13191_v25 = vmul.f32 %v8925_v21, %v14262_v54  ;;  %v8927_v28 = vmul.f32 %v8917_v38, %v8887_v5  ;;  %v8888_v54 = vmul.f32 0.5, %v8878_v35  ;;  %v8919_v46 = vadd.f32 1.0, %v11102_v61  ;;  %v11104_v49 = vpop.eup %11103 }
 0xcb1   : > { %8951 = vrot.lane.b32.xlu1 %v13186_v34, %s11313_s23  ;;  %v13196_v14 = vmul.f32 %v8926_v30, %v14265_v16  ;;  %v8889_v16 = vmul.f32 0.5, %v8879_v32  ;;  %v8920_v3 = vadd.f32 1.0, %v11104_v49  ;;  %v11106_v48 = vpop.eup %11105  ;;  %v8892_v35 = vmul.f32 0.5, %v8882_v15  ;;  %s11326_s23 = smov 52  }
 0xcb2   : > { %v13201_v62 = vmul.f32 %v8927_v28, %v14267_v53  ;;  %v8928_v6 = vmul.f32 %v8918_v23, %v8888_v54  ;;  %v8921_v29 = vadd.f32 1.0, %v11106_v48  ;;  %v11108_v51 = vpop.eup %11107  ;;  %v9091_v43 = vunpack.c.0.s8 %v9090_v56 }
 0xcb3   : > { %v8929_v12 = vmul.f32 %v8919_v46, %v8889_v16  ;;  %v8930_v17 = vmul.f32 %v8920_v3, %v8890_v8  ;;  %v8922_v20 = vadd.f32 1.0, %v11108_v51  ;;  %v11346_v28 = vmov 1934713408  }
 0xcb4   : > { %8970 = vrot.lane.b32.xlu0 %v13191_v25, %s11314_s12  ;;  %v8938_v26 = vmul.f32 %v8928_v6, %v14268_v2  ;;  %v8931_v10 = vmul.f32 %v8921_v29, %v8891_v9  ;;  %v13249_v4 = vsub.s32 %v9091_v43, %v14273_v22  ;;  %v9154_v23 = vunpack.c.l.s4 %v11346_v28 }
 0xcb5   : > { %8968 = vrot.lane.b32.xlu1 %v13183_v45, %s11314_s12  ;;  %v8939_v53 = vmul.f32 %v8929_v12, %v14269_v50  ;;  %v8940_v2 = vmul.f32 %v8930_v17, %v14271_v58  ;;  %v8932_v7 = vmul.f32 %v8922_v20, %v8892_v35  ;;  %s11327_s12 = smov 44  }
 0xcb6   : > { %v8941_v0 = vmul.f32 %v8931_v10, %v14270_v36  ;;  %v9155_v49 = vunpack.c.0.s8 %v9154_v23 }
 0xcb7   : > { %v8942_v50 = vmul.f32 %v8932_v7, %v14272_v52 }
 0xcb8   : > { %8987 = vrot.lane.b32.xlu0 %v13196_v14, %s11315_s20 }
 0xcb9   : > { %8985 = vrot.lane.b32.xlu1 %v13191_v25, %s11315_s20  ;;  %s11328_s20 = smov 78  }
 0xcbc   : > { %9004 = vrot.lane.b32.xlu0 %v13201_v62, %s11316_s4 }
 0xcbd   : > { %9002 = vrot.lane.b32.xlu1 %v13196_v14, %s11316_s4  ;;  %s11329_s4 = smov 70  }
 0xcc0   : > { %9018 = vrot.lane.b32.xlu0 %v8938_v26, %s11317_s30 }
 0xcc1   : > { %9016 = vrot.lane.b32.xlu1 %v13201_v62, %s11317_s30  ;;  %s11331_s30 = smov 96  }
 0xcc4   : > { %9035 = vrot.lane.b32.xlu0 %v8939_v53, %s11318_s9 }
 0xcc5   : > { %9033 = vrot.lane.b32.xlu1 %v8938_v26, %s11318_s9  ;;  %s11332_s9 = smov 36  }
 0xcc8   : > { %9052 = vrot.lane.b32.xlu0 %v8940_v2, %s11319_s11 }
 0xcc9   : > { %9050 = vrot.lane.b32.xlu1 %v8939_v53, %s11319_s11  ;;  %s11333_s11 = smov 122  }
 0xccc   : > { %9069 = vrot.lane.b32.xlu0 %v8941_v0, %s11320_s1 }
 0xccd   : > { %9067 = vrot.lane.b32.xlu1 %v8940_v2, %s11320_s1  ;;  %s11334_s1 = smov 62  }
 0xcd0   : > { %9082 = vrot.lane.b32.xlu0 %v8942_v50, %s11321_s22 }
 0xcd1   : > { %9080 = vrot.lane.b32.xlu1 %v8941_v0, %s11321_s22  ;;  %s11335_s22 = smov 54  }
 0xcd4   : > { %8947 = vrot.lane.b32.xlu0 %v13186_v34, %s11322_s21  ;;  %s11336_s21 = smov 88  }
 0xcd5   : > { %8944 = vrot.lane.b32.xlu1 %v13186_v34, %s11304_s13  ;;  %s11330_s13 = smov 104  }
 0xcd8   : > { %8961 = vrot.lane.b32.xlu0 %v13183_v45, %s11323_s16  ;;  %s11337_s16 = smov 80  }
 0xcd9   : > { %8958 = vrot.lane.b32.xlu1 %v13183_v45, %s11324_s29  ;;  %s11338_s29 = smov 114  }
 0xcdc   : > { %8975 = vrot.lane.b32.xlu0 %v13191_v25, %s11325_s19  ;;  %s11339_s19 = smov 106  }
 0xcdd   : > { %8964 = vrot.lane.b32.xlu1 %v13183_v45, %s11326_s23  ;;  %s11340_s23 = smov 46  }
 0xce0   : > { %8981 = vrot.lane.b32.xlu0 %v13191_v25, %s11327_s12  ;;  %s11341_s12 = smov 38  }
 0xce1   : > { %8978 = vrot.lane.b32.xlu1 %v13191_v25, %s11328_s20  ;;  %s11342_s20 = smov 72  }
 0xce4   : > { %8995 = vrot.lane.b32.xlu0 %v13196_v14, %s11329_s4  ;;  %s11343_s4 = smov 64  }
 0xce5   : > { %8992 = vrot.lane.b32.xlu1 %v13196_v14, %s11330_s13  ;;  %s11344_s13 = smov 98  }
 0xce8   : > { %9009 = vrot.lane.b32.xlu0 %v13201_v62, %s11331_s30 }
 0xce9   : > { %8998 = vrot.lane.b32.xlu1 %v13196_v14, %s11332_s9  ;;  %s10709_s9 = sshll.u32 %s11515_s15, 6 }
 0xcec   : > { %9023 = vrot.lane.b32.xlu0 %v8938_v26, %s11333_s11  ;;  %s10914_s11 = sshll.u32 %s11410_s28, 10 }
 0xced   : > { %9012 = vrot.lane.b32.xlu1 %v13201_v62, %s11334_s1 }
 0xcf0   : > { %9029 = vrot.lane.b32.xlu0 %v8938_v26, %s11335_s22 }
 0xcf1   : > { %9026 = vrot.lane.b32.xlu1 %v8938_v26, %s11336_s21  ;;  %s14094_s21 = scalar_lea.hbm %s14147_s7, %s10914_s11 }
 0xcf4   : > { %9043 = vrot.lane.b32.xlu0 %v8939_v53, %s11337_s16  ;;  %s10582_s16 = scalar_lea.sflag [#allocation4], %s11515_s15 }
 0xcf5   : > { %9040 = vrot.lane.b32.xlu1 %v8939_v53, %s11338_s29 }
 0xcf8   : > { %9057 = vrot.lane.b32.xlu0 %v8940_v2, %s11339_s19  ;;  %s11348_s19 = smov [#allocation10]  }
 0xcf9   : > { %9046 = vrot.lane.b32.xlu1 %v8939_v53, %s11340_s23  ;;  %s11221_s23 = sshll.u32 %s11348_s19, 4  ;;  %s11222_s23 = int_to_ptr.vmem [resolvable:$false] %s11221_s23 }
 0xcfc   : > { %9063 = vrot.lane.b32.xlu0 %v8940_v2, %s11341_s12  ;;  %s11223_s12 = scalar_lea.vmem %s11222_s23, 2048 }
 0xcfd   : > { %9060 = vrot.lane.b32.xlu1 %v8940_v2, %s11342_s20  ;;  %v13272_v2 = vsub.s32 %v9155_v49, %v14273_v22 }
 0xd00   : > { %9076 = vrot.lane.b32.xlu0 %v8941_v0, %s11343_s4 }
 0xd01   : > { %9073 = vrot.lane.b32.xlu1 %v8941_v0, %s11344_s13 }
 0xd22   : > { %v8954_v36 = vpop.permute.xlu0 %8953 }
 0xd23   : > { %v8952_v58 = vpop.permute.xlu1 %8951 }
 0xd24   : > { %v8956_v15 = vsel %vm8955_vm12, %v8952_v58, %v8954_v36 }
 0xd26   : > { %v8971_v52 = vpop.permute.xlu0 %8970 }
 0xd27   : > { %v8969_v32 = vpop.permute.xlu1 %8968 }
 0xd28   : > { %v8973_v31 = vsel %vm8972_vm13, %v8969_v32, %v8971_v52 }
 0xd2a   : > { %v8988_v41 = vpop.permute.xlu0 %8987 }
 0xd2b   : > { %v8986_v47 = vpop.permute.xlu1 %8985 }
 0xd2c   : > { %v13262_v48 = vsel %vm8989_vm14, %v8986_v47, %v8988_v41 }
 0xd2e   : > { %v9005_v44 = vpop.permute.xlu0 %9004 }
 0xd2f   : > { %v9003_v27 = vpop.permute.xlu1 %9002 }
 0xd30   : > { %v13279_v35 = vsel %vm9006_vm15, %v9003_v27, %v9005_v44 }
 0xd32   : > { %v13228_v39 = vpop.permute.xlu0 %9018 }
 0xd33   : > { %v13230_v40 = vpop.permute.xlu1 %9016 }
 0xd36   : > { %v13232_v19 = vpop.permute.xlu0 %9035 }
 0xd37   : > { %v13234_v33 = vpop.permute.xlu1 %9033 }
 0xd3a   : > { %v13236_v60 = vpop.permute.xlu0 %9052 }
 0xd3b   : > { %v13238_v59 = vpop.permute.xlu1 %9050 }
 0xd3e   : > { %v13240_v37 = vpop.permute.xlu0 %9069 }
 0xd3f   : > { %v13242_v13 = vpop.permute.xlu1 %9067 }
 0xd42   : > { %v13244_v57 = vpop.permute.xlu0 %9082 }
 0xd43   : > { %v13246_v24 = vpop.permute.xlu1 %9080 }
 0xd46   : > { %v8948_v63 = vpop.permute.xlu0 %8947 }
 0xd47   : > { %v9088_v45 = vcombine.high %v13186_v34, %v8948_v63  ;;  %v8945_v21 = vpop.permute.xlu1 %8944  ;;  %v9087_v8 = vcombine.low %v13186_v34, %v8948_v63 }
 0xd48   : > { %v9104_v18 = vcombine.high %v8945_v21, %v8956_v15  ;;  %v9103_v53 = vcombine.low %v8945_v21, %v8956_v15 }
 0xd49   : > { %v9102_v11 = vrot.slane %v9088_v45, %v13249_v4  ;;  %v13282_v34 = vrot.slane %v9087_v8, %v13249_v4 }
 0xd4a   : > { %v9118_v42 = vrot.slane %v9104_v18, %v13249_v4  ;;  %v8962_v1 = vpop.permute.xlu0 %8961  ;;  %v13285_v0 = vrot.slane %v9103_v53, %v13249_v4 }
 0xd4b   : > { %v8959_v25 = vpop.permute.xlu1 %8958  ;;  %v9136_v5 = vcombine.high %v8962_v1, %v8973_v31  ;;  %v9135_v17 = vcombine.low %v8962_v1, %v8973_v31 }
 0xd4c   : > { %v9167_v30 = vcombine.low %v9102_v11, %v9118_v42  ;;  %v9168_v38 = vcombine.high %v9102_v11, %v9118_v42  ;;  %v9151_v56 = vcombine.low %v13282_v34, %v13285_v0 }
 0xd4d   : > { %v9150_v62 = vrot.slane %v9136_v5, %v13249_v4  ;;  %v13288_v7 = vrot.slane %v9135_v17, %v13249_v4 }
 0xd4e   : > { %v13254_v14 = vpop.permute.xlu0 %8975  ;;  %v13304_v41 = vrot.slane %v9167_v30, %v13272_v2  ;;  %v13318_v43 = vrot.slane %v9168_v38, %v13272_v2  ;;  %v13346_v38 = vrot.slane %v9151_v56, %v13272_v2 }
 0xd4f   : > { %v8965_v61 = vpop.permute.xlu1 %8964 }
 0xd50   : > { %v9120_v54 = vcombine.high %v8959_v25, %v8965_v61  ;;  %v9119_v16 = vcombine.low %v8959_v25, %v8965_v61  ;;  %v13360_v61 = vsel %vm9020_vm0, %v13230_v40, %v13228_v39 }
 0xd52   : > { %v9134_v6 = vrot.slane %v9120_v54, %v13249_v4  ;;  %v13258_v46 = vpop.permute.xlu0 %8981  ;;  %v13275_v10 = vrot.slane %v9119_v16, %v13249_v4  ;;  %v13372_v16 = vsel %vm9037_vm1, %v13234_v33, %v13232_v19 }
 0xd53   : > { %v13260_v26 = vpop.permute.xlu1 %8978  ;;  %v9223_v29 = vcombine.low %v13254_v14, %v13258_v46 }
 0xd54   : > { %v9199_v12 = vcombine.low %v9134_v6, %v9150_v62  ;;  %v9200_v3 = vcombine.high %v9134_v6, %v9150_v62  ;;  %v9239_v51 = vcombine.low %v13260_v26, %v13262_v48  ;;  %v9183_v47 = vcombine.low %v13275_v10, %v13288_v7 }
 0xd55   : > { %v13294_v36 = vrot.slane %v9223_v29, %v13249_v4 }
 0xd56   : > { %v13269_v9 = vpop.permute.xlu0 %8995  ;;  %v13291_v50 = vrot.slane %v9199_v12, %v13272_v2  ;;  %v13297_v58 = vrot.slane %v9239_v51, %v13249_v4  ;;  %v13309_v44 = vrot.slane %v9200_v3, %v13272_v2  ;;  %v13335_v11 = vrot.slane %v9183_v47, %v13272_v2 }
 0xd57   : > { %v13277_v20 = vpop.permute.xlu1 %8992  ;;  %v9271_v52 = vcombine.low %v13269_v9, %v13279_v35  ;;  %v9272_v63 = vcombine.high %v13269_v9, %v13279_v35 }
 0xd58   : > { %14274 = vst [vmem:[#allocation36_spill] sm:$0xff] %v13291_v50  ;;  %v9287_v15 = vcombine.low %v13294_v36, %v13297_v58  ;;  %v9215_v62 = vcombine.low %v13346_v38, %v13335_v11  ;;  %v9288_v35 = vcombine.high %v13294_v36, %v13297_v58 }
 0xd59   : > { %v13327_v45 = vrot.slane %v9271_v52, %v13249_v4 }
 0xd5a   : > { %v13301_v32 = vpop.permute.xlu0 %9009  ;;  %v13349_v31 = vrot.slane %v9287_v15, %v13272_v2  ;;  %v9738_v53 = vrot.slane %v9215_v62, 1 }
 0xd5b   : > { %v13311_v27 = vpop.permute.xlu1 %8998  ;;  %v9359_v6 = vcombine.low %v13301_v32, %v13360_v61 }
 0xd5c   : > { %v9255_v55 = vcombine.low %v13277_v20, %v13311_v27 }
 0xd5d   : > { %v13384_v17 = vrot.slane %v9359_v6, %v13249_v4 }
 0xd5e   : > { %v13330_v21 = vrot.slane %v9255_v55, %v13249_v4  ;;  %v13332_v18 = vpop.permute.xlu0 %9023 }
 0xd5f   : > { %v13337_v42 = vpop.permute.xlu1 %9012 }
 0xd60   : > { %v9319_v30 = vcombine.low %v13330_v21, %v13327_v45  ;;  %v9375_v28 = vcombine.low %v13337_v42, %v13332_v18 }
 0xd62   : > { %v13352_v5 = vrot.slane %v9319_v30, %v13272_v2  ;;  %v13356_v23 = vpop.permute.xlu0 %9029  ;;  %v13375_v12 = vrot.slane %v9375_v28, %v13249_v4 }
 0xd63   : > { %v13362_v54 = vpop.permute.xlu1 %9026 }
 0xd64   : > { %v9351_v49 = vcombine.low %v13349_v31, %v13352_v5  ;;  %v9391_v39 = vcombine.low %v13362_v54, %v13372_v16  ;;  %v9423_v29 = vcombine.low %v13384_v17, %v13375_v12  ;;  %v9352_v58 = vcombine.high %v13349_v31, %v13352_v5 }
 0xd65   : > { %v9424_v5 = vcombine.high %v13384_v17, %v13375_v12  ;;  %v9376_v17 = vcombine.high %v13337_v42, %v13332_v18 }
 0xd66   : > { %v13379_v40 = vpop.permute.xlu0 %9043  ;;  %v9739_v3 = vrot.slane %v9351_v49, 1  ;;  %v13392_v51 = vrot.slane %v9391_v39, %v13249_v4  ;;  %v9431_v15 = vrot.slane %v9423_v29, %v13272_v2  ;;  %v13414_v49 = vsel %vm9054_vm4, %v13238_v59, %v13236_v60 }
 0xd67   : > { %v13381_v8 = vpop.permute.xlu1 %9040  ;;  %v9224_v29 = vcombine.high %v13254_v14, %v13258_v46 }
 0xd68   : > { %v9407_v19 = vcombine.low %v13356_v23, %v13381_v8  ;;  %v9740_v33 = vsel %vm9737_vm3, %v9738_v53, %v9739_v3  ;;  %v9085_v53 = vsel %vm9084_vm5, %v13246_v24, %v13244_v57 }
 0xd69   : > { %9810 = vrot.lane.b32.xlu1 %v9740_v33, %s11302_s10  ;;  %v13423_v33 = vsel %vm1096_vm2, %v13242_v13, %v13240_v37  ;;  %v13439_v37 = vrot.slane %v9085_v53, %v13249_v4  ;;  %v9256_v13 = vcombine.high %v13277_v20, %v13311_v27  ;;  %v13458_v20 = vrot.slane %v9224_v29, %v13249_v4 }
 0xd6a   : > { %v13395_v52 = vrot.slane %v9407_v19, %v13249_v4  ;;  %v13398_v47 = vpop.permute.xlu0 %9057  ;;  %v9495_v19 = vcombine.low %v13379_v40, %v13414_v49  ;;  %vm10546_vm2 = vcmask 261120  }
 0xd6b   : > { %v13400_v55 = vpop.permute.xlu1 %9046 }
 0xd6c   : > { %v9455_v56 = vcombine.low %v13392_v51, %v13395_v52  ;;  %v9511_v62 = vcombine.low %v13400_v55, %v13398_v47  ;;  %v9456_v36 = vcombine.high %v13392_v51, %v13395_v52 }
 0xd6e   : > { %v9463_v30 = vrot.slane %v9455_v56, %v13272_v2  ;;  %v13406_v28 = vpop.permute.xlu0 %9063  ;;  %v9240_v56 = vcombine.high %v13260_v26, %v13262_v48  ;;  %v13432_v22 = vrot.slane %v9511_v62, %v13249_v4  ;;  %v9152_v26 = vcombine.high %v13282_v34, %v13285_v0 }
 0xd6f   : > { %v13410_v6 = vpop.permute.xlu1 %9060  ;;  %v9184_v48 = vcombine.high %v13275_v10, %v13288_v7  ;;  %v13454_v62 = vrot.slane %v9495_v19, %v13249_v4  ;;  %v13473_v7 = vrot.slane %v9256_v13, %v13249_v4 }
 0xd70   : > { %v9487_v39 = vcombine.low %v9431_v15, %v9463_v30  ;;  %v9527_v57 = vcombine.low %v13410_v6, %v13423_v33  ;;  %v13461_v27 = vrot.slane %v9240_v56, %v13249_v4  ;;  %v13486_v56 = vrot.slane %v9272_v63, %v13249_v4 }
 0xd71   : > { %v9559_v10 = vcombine.low %v13454_v62, %v13432_v22  ;;  %v13479_v9 = vrot.slane %v9184_v48, %v13272_v2  ;;  %v9488_v63 = vcombine.high %v9431_v15, %v9463_v30  ;;  %v9748_v30 = vrot.slane %v9352_v58, 1 }
 0xd72   : > { %v13429_v60 = vpop.permute.xlu0 %9076  ;;  %v9741_v59 = vrot.slane %v9487_v39, 1  ;;  %v9535_v34 = vrot.slane %v9527_v57, %v13249_v4  ;;  %v9304_v29 = vcombine.high %v13458_v20, %v13461_v27  ;;  %v9320_v57 = vcombine.high %v13330_v21, %v13327_v45 }
 0xd73   : > { %v13436_v24 = vpop.permute.xlu1 %9073  ;;  %v13445_v14 = vrot.slane %v13429_v60, %v13249_v4  ;;  %v9567_v13 = vrot.slane %v9559_v10, %v13272_v2  ;;  %v9336_v48 = vcombine.high %v13473_v7, %v13486_v56  ;;  %v9216_v21 = vcombine.high %v13346_v38, %v13335_v11 }
 0xd74   : > { %v9543_v46 = vcombine.low %v13406_v28, %v13436_v24  ;;  %v9742_v39 = vsel %vm9737_vm3, %v9739_v3, %v9741_v59  ;;  %v13476_v3 = vrot.slane %v9152_v26, %v13272_v2  ;;  %v13505_v10 = vrot.slane %v9288_v35, %v13272_v2 }
 0xd75   : > { %9812 = vrot.lane.b32.xlu0 %v9742_v39, %s11302_s10  ;;  %v9661_v0 = vcombine.low %v13445_v14, %v13439_v37  ;;  %v14275_v39 = vmov 0.0   ;;  %v13513_v31 = vrot.slane %v9320_v57, %v13272_v2  ;;  %v9350_v11 = vrot.slane %v9336_v48, %v13272_v2 }
 0xd76   : > { %v9551_v25 = vrot.slane %v9543_v46, %v13249_v4  ;;  %v13500_v1 = vcombine.high %v9085_v53, %v14275_v39  ;;  %v13519_v38 = vrot.slane %v9456_v36, %v13272_v2  ;;  %v9750_v53 = vrot.slane %v9488_v63, 1 }
 0xd77   : > { %v9669_v46 = vrot.slane %v9661_v0, %v13272_v2  ;;  %v9318_v0 = vrot.slane %v9304_v29, %v13272_v2  ;;  %v9360_v57 = vcombine.high %v13301_v32, %v13360_v61  ;;  %v9335_v12 = vcombine.low %v13473_v7, %v13486_v56 }
 0xd78   : > { %v9591_v19 = vcombine.low %v9535_v34, %v9551_v25  ;;  %v9592_v35 = vcombine.high %v9535_v34, %v9551_v25  ;;  %v9747_v48 = vrot.slane %v9216_v21, 1  ;;  %v9438_v25 = vrot.slane %v9424_v5, %v13272_v2 }
 0xd79   : > { %v9745_v52 = vrot.slane %v9669_v46, 1  ;;  %v9560_v34 = vcombine.high %v13454_v62, %v13432_v22  ;;  %v9693_v32 = vcombine.high %v9669_v46, %v14275_v39  ;;  %v9353_v18 = vcombine.low %v13505_v10, %v13513_v31 }
 0xd7a   : > { %v9599_v26 = vrot.slane %v9591_v19, %v13272_v2  ;;  %v9217_v19 = vcombine.low %v13476_v3, %v13479_v9  ;;  %v9749_v61 = vsel %vm9737_vm3, %v9747_v48, %v9748_v30  ;;  %v9357_v42 = vcombine.low %v9318_v0, %v9350_v11 }
 0xd7b   : > { %v14276_v7 = vcombine.low %v13318_v43, %v13309_v44  ;;  %v9489_v22 = vcombine.low %v9438_v25, %v13519_v38  ;;  %v9392_v62 = vcombine.high %v13362_v54, %v13372_v16  ;;  %v14277_v36 = vcombine.high %v13318_v43, %v13309_v44 }
 0xd7c   : > { %v9623_v45 = vcombine.low %v9567_v13, %v9599_v26  ;;  %v9624_v50 = vcombine.high %v9567_v13, %v9599_v26  ;;  %v13544_v13 = vrot.slane %v9592_v35, %v13272_v2  ;;  %v13552_v46 = vrot.slane %v9357_v42, 1 }
 0xd7d   : > { %v9792_v56 = vrot.slane %v14276_v7, 1  ;;  %v9358_v26 = vcombine.high %v9318_v0, %v9350_v11  ;;  %v9801_v58 = vrot.slane %v14277_v36, 1  ;;  %v9754_v54 = vrot.slane %v9693_v32, 1 }
 0xd7e   : > { %v9743_v15 = vrot.slane %v9623_v45, 1  ;;  %v9662_v45 = vcombine.high %v13445_v14, %v13439_v37  ;;  %v9544_v16 = vcombine.high %v13406_v28, %v13436_v24  ;;  %v9757_v21 = vrot.slane %v9353_v18, 1 }
 0xd7f   : > { %v13567_v0 = vsel %vm9737_vm3, %v9792_v56, %v13552_v46  ;;  %v9759_v5 = vrot.slane %v9489_v22, 1  ;;  %v13575_v37 = vrot.slane %v9376_v17, %v13249_v4  ;;  %v13578_v14 = vrot.slane %v9392_v62, %v13249_v4 }
 0xd80   : > { %v9746_v29 = vsel %vm9737_vm3, %v9743_v15, %v9745_v52  ;;  %v9744_v51 = vsel %vm9737_vm3, %v9741_v59, %v9743_v15  ;;  %v9408_v59 = vcombine.high %v13356_v23, %v13381_v8  ;;  %v9751_v23 = vsel %vm9737_vm3, %v9748_v30, %v9750_v53 }
 0xd81   : > { %9816 = vrot.lane.b32.xlu0 %v9746_v29, %s11302_s10  ;;  %9814 = vrot.lane.b32.xlu1 %v9744_v51, %s11302_s10  ;;  %v9752_v8 = vrot.slane %v9624_v50, 1  ;;  %v9574_v50 = vrot.slane %v9560_v34, %v13272_v2  ;;  %v13569_v51 = vrot.slane %v9358_v26, 1  ;;  %v9756_v28 = vrot.slane %v9217_v19, 1 }
 0xd82   : > { %v13558_v63 = vrot.slane %v9408_v59, %v13249_v4  ;;  %v13587_v15 = vrot.slane %v9360_v57, %v13249_v4  ;;  %v9512_v11 = vcombine.high %v13400_v55, %v13398_v47  ;;  %v9528_v30 = vcombine.high %v13410_v6, %v13423_v33 }
 0xd83   : > { %v9755_v44 = vsel %vm9737_vm3, %v9752_v8, %v9754_v54  ;;  %v9753_v43 = vsel %vm9737_vm3, %v9750_v53, %v9752_v8  ;;  %v9625_v52 = vcombine.low %v9574_v50, %v13544_v13  ;;  %v13584_v24 = vsel %vm9737_vm3, %v9801_v58, %v13569_v51 }
 0xd84   : > { %v9676_v53 = vrot.slane %v9662_v45, %v13272_v2  ;;  %v9496_v35 = vcombine.high %v13379_v40, %v13414_v49  ;;  %v9471_v19 = vcombine.low %v13578_v14, %v13558_v63  ;;  %v9354_v29 = vcombine.high %v13505_v10, %v13513_v31 }
 0xd85   : > { %9820 = vrot.lane.b32.xlu0 %v9751_v23, %s11302_s10  ;;  %9818 = vrot.lane.b32.xlu1 %v9749_v61, %s11302_s10  ;;  %v9490_v57 = vcombine.high %v9438_v25, %v13519_v38  ;;  %v13602_v17 = vrot.slane %v9544_v16, %v13249_v4  ;;  %v9760_v47 = vsel %vm9737_vm3, %v9757_v21, %v9759_v5  ;;  %v9761_v6 = vrot.slane %v9625_v52, 1 }
 0xd86   : > { %v9758_v55 = vsel %vm9737_vm3, %v9756_v28, %v9757_v21  ;;  %v9303_v33 = vcombine.low %v13458_v20, %v13461_v27  ;;  %v9343_v40 = vrot.slane %v9335_v12, %v13272_v2  ;;  %v9439_v49 = vcombine.low %v13587_v15, %v13575_v37 }
 0xd87   : > { %v13614_v10 = vrot.slane %v9512_v11, %v13249_v4  ;;  %v13617_v31 = vrot.slane %v9528_v30, %v13249_v4  ;;  %v9631_v38 = vcombine.high %v13429_v60, %v14275_v39  ;;  %v9763_v48 = vrot.slane %v9676_v53, 1 }
 0xd88   : > { %v13622_v20 = vrot.slane %v9496_v35, %v13249_v4  ;;  %v9479_v27 = vrot.slane %v9471_v19, %v13272_v2  ;;  %v9766_v12 = vrot.slane %v9354_v29, 1  ;;  %v9768_v25 = vrot.slane %v9490_v57, 1 }
 0xd89   : > { %9824 = vrot.lane.b32.xlu0 %v9755_v44, %s11302_s10  ;;  %9822 = vrot.lane.b32.xlu1 %v9753_v43, %s11302_s10  ;;  %v9607_v59 = vcombine.low %v13617_v31, %v13602_v17  ;;  %v9764_v34 = vsel %vm9737_vm3, %v9761_v6, %v9763_v48  ;;  %v9762_v32 = vsel %vm9737_vm3, %v9759_v5, %v9761_v6  ;;  %v14279_v5 = vld [vmem:[#allocation36_spill] sm:$0xff] }
 0xd8a   : > { %v9626_v61 = vcombine.high %v9574_v50, %v13544_v13  ;;  %v9311_v18 = vrot.slane %v9303_v33, %v13272_v2  ;;  %v14278_v60 = vcombine.high %v13476_v3, %v13479_v9  ;;  %v9447_v7 = vrot.slane %v9439_v49, %v13272_v2 }
 0xd8b   : > { %v9575_v56 = vcombine.low %v13622_v20, %v13614_v10  ;;  %v13640_v23 = vrot.slane %v9631_v38, %v13249_v4  ;;  %v9694_v13 = vcombine.high %v9676_v53, %v14275_v39  ;;  %v9660_v8 = vrot.slane %v13500_v1, %v13249_v4 }
 0xd8c   : > { %v9765_v42 = vrot.slane %v14278_v60, 1  ;;  %v9355_v62 = vcombine.low %v9311_v18, %v9343_v40  ;;  %v9615_v26 = vrot.slane %v9607_v59, %v13272_v2  ;;  %v9769_v3 = vsel %vm9737_vm3, %v9766_v12, %v9768_v25 }
 0xd8d   : > { %9828 = vrot.lane.b32.xlu0 %v9760_v47, %s11302_s10  ;;  %9826 = vrot.lane.b32.xlu1 %v9758_v55, %s11302_s10  ;;  %v9770_v9 = vrot.slane %v9626_v61, 1  ;;  %v9491_v36 = vcombine.low %v9447_v7, %v9479_v27  ;;  %v9583_v58 = vrot.slane %v9575_v56, %v13272_v2  ;;  %v9677_v50 = vcombine.low %v13640_v23, %v9660_v8 }
 0xd8e   : > { %v9767_v22 = vsel %vm9737_vm3, %v9765_v42, %v9766_v12  ;;  %v9772_v45 = vrot.slane %v9694_v13, 1  ;;  %v9775_v54 = vrot.slane %v9355_v62, 1  ;;  %v14280_v52 = vcombine.low %v13304_v41, %v14279_v5 }
 0xd8f   : > { %v9771_v16 = vsel %vm9737_vm3, %v9768_v25, %v9770_v9  ;;  %v9777_v21 = vrot.slane %v9491_v36, 1  ;;  %v9627_v44 = vcombine.low %v9583_v58, %v9615_v26  ;;  %v9685_v43 = vrot.slane %v9677_v50, %v13272_v2 }
 0xd90   : > { %v9773_v1 = vsel %vm9737_vm3, %v9770_v9, %v9772_v45  ;;  %v9774_v28 = vrot.slane %v14280_v52, 1  ;;  %v9472_v11 = vcombine.high %v13578_v14, %v13558_v63  ;;  %v9356_v30 = vcombine.high %v9311_v18, %v9343_v40 }
 0xd91   : > { %9832 = vrot.lane.b32.xlu0 %v9764_v34, %s11302_s10  ;;  %9830 = vrot.lane.b32.xlu1 %v9762_v32, %s11302_s10  ;;  %v9492_v53 = vcombine.high %v9447_v7, %v9479_v27  ;;  %v9778_v35 = vsel %vm9737_vm3, %v9775_v54, %v9777_v21  ;;  %v9779_v29 = vrot.slane %v9627_v44, 1  ;;  %v9440_v57 = vcombine.high %v13587_v15, %v13575_v37 }
 0xd92   : > { %v9776_v19 = vsel %vm9737_vm3, %v9774_v28, %v9775_v54  ;;  %v9781_v47 = vrot.slane %v9685_v43, 1  ;;  %v9486_v55 = vrot.slane %v9472_v11, %v13272_v2  ;;  %v9608_v63 = vcombine.high %v13617_v31, %v13602_v17 }
 0xd93   : > { %v9784_v14 = vrot.slane %v9356_v30, 1  ;;  %v9786_v6 = vrot.slane %v9492_v53, 1  ;;  %v9780_v40 = vsel %vm9737_vm3, %v9777_v21, %v9779_v29  ;;  %v9628_v49 = vcombine.high %v9583_v58, %v9615_v26 }
 0xd94   : > { %v9782_v33 = vsel %vm9737_vm3, %v9779_v29, %v9781_v47  ;;  %v9695_v38 = vcombine.high %v9685_v43, %v14275_v39  ;;  %v14281_v37 = vcombine.high %v13304_v41, %v14279_v5  ;;  %v9454_v48 = vrot.slane %v9440_v57, %v13272_v2 }
 0xd95   : > { %9836 = vrot.lane.b32.xlu0 %v9769_v3, %s11302_s10  ;;  %9834 = vrot.lane.b32.xlu1 %v9767_v22, %s11302_s10  ;;  %v9576_v17 = vcombine.high %v13622_v20, %v13614_v10  ;;  %v9622_v31 = vrot.slane %v9608_v63, %v13272_v2  ;;  %v9787_v12 = vsel %vm9737_vm3, %v9784_v14, %v9786_v6  ;;  %v9788_v25 = vrot.slane %v9628_v49, 1 }
 0xd96   : > { %v9783_v15 = vrot.slane %v14281_v37, 1  ;;  %v9790_v59 = vrot.slane %v9695_v38, 1  ;;  %v9493_v34 = vcombine.low %v9454_v48, %v9486_v55  ;;  %v9678_v32 = vcombine.high %v13640_v23, %v9660_v8 }
 0xd97   : > { %v9590_v41 = vrot.slane %v9576_v17, %v13272_v2  ;;  %v9789_v10 = vsel %vm9737_vm3, %v9786_v6, %v9788_v25  ;;  %v9494_v56 = vcombine.high %v9454_v48, %v9486_v55 }
 0xd98   : > { %v9785_v27 = vsel %vm9737_vm3, %v9783_v15, %v9784_v14  ;;  %v9791_v61 = vsel %vm9737_vm3, %v9788_v25, %v9790_v59  ;;  %v9795_v20 = vrot.slane %v9493_v34, 1  ;;  %v9692_v60 = vrot.slane %v9678_v32, %v13272_v2 }
 0xd99   : > { %9840 = vrot.lane.b32.xlu0 %v9773_v1, %s11302_s10  ;;  %9838 = vrot.lane.b32.xlu1 %v9771_v16, %s11302_s10  ;;  %v9629_v18 = vcombine.low %v9590_v41, %v9622_v31  ;;  %v9630_v13 = vcombine.high %v9590_v41, %v9622_v31  ;;  %v9804_v62 = vrot.slane %v9494_v56, 1 }
 0xd9a   : > { %v9796_v42 = vsel %vm9737_vm3, %v13552_v46, %v9795_v20  ;;  %v9799_v23 = vrot.slane %v9692_v60, 1  ;;  %v9696_v26 = vcombine.high %v9692_v60, %v14275_v39 }
 0xd9b   : > { %v9797_v7 = vrot.slane %v9629_v18, 1  ;;  %v9805_v46 = vsel %vm9737_vm3, %v13569_v51, %v9804_v62  ;;  %v9806_v3 = vrot.slane %v9630_v13, 1 }
 0xd9c   : > { %v9808_v9 = vrot.slane %v9696_v26, 1 }
 0xd9d   : > { %9844 = vrot.lane.b32.xlu0 %v9778_v35, %s11302_s10  ;;  %9842 = vrot.lane.b32.xlu1 %v9776_v19, %s11302_s10  ;;  %v9800_v8 = vsel %vm9737_vm3, %v9797_v7, %v9799_v23  ;;  %v9798_v22 = vsel %vm9737_vm3, %v9795_v20, %v9797_v7  ;;  %v9807_v36 = vsel %vm9737_vm3, %v9804_v62, %v9806_v3 }
 0xda1   : > { %9848 = vrot.lane.b32.xlu0 %v9782_v33, %s11302_s10  ;;  %9846 = vrot.lane.b32.xlu1 %v9780_v40, %s11302_s10 }
 0xda5   : > { %9852 = vrot.lane.b32.xlu0 %v9787_v12, %s11302_s10  ;;  %9850 = vrot.lane.b32.xlu1 %v9785_v27, %s11302_s10 }
 0xda9   : > { %9856 = vrot.lane.b32.xlu0 %v9791_v61, %s11302_s10  ;;  %9854 = vrot.lane.b32.xlu1 %v9789_v10, %s11302_s10 }
 0xdad   : > { %9860 = vrot.lane.b32.xlu0 %v9796_v42, %s11302_s10  ;;  %9858 = vrot.lane.b32.xlu1 %v13567_v0, %s11302_s10  ;;  %v9809_v0 = vsel %vm9737_vm3, %v9806_v3, %v9808_v9 }
 0xdb1   : > { %9864 = vrot.lane.b32.xlu0 %v9800_v8, %s11302_s10  ;;  %9862 = vrot.lane.b32.xlu1 %v9798_v22, %s11302_s10 }
 0xdb5   : > { %9868 = vrot.lane.b32.xlu0 %v9805_v46, %s11302_s10  ;;  %9866 = vrot.lane.b32.xlu1 %v13584_v24, %s11302_s10 }
 0xdb9   : > { %9872 = vrot.lane.b32.xlu0 %v9809_v0, %s11302_s10  ;;  %9870 = vrot.lane.b32.xlu1 %v9807_v36, %s11302_s10  ;;  %s11347_s10 = smov 32  }
 0xddb   : > { %v9811_v39 = vpop.permute.xlu1 %9810 }
 0xde7   : > { %v9813_v58 = vpop.permute.xlu0 %9812 }
 0xdf3   : > { %v9817_v50 = vpop.permute.xlu0 %9816  ;;  %v9815_v45 = vpop.permute.xlu1 %9814 }
 0xdf7   : > { %v9821_v51 = vpop.permute.xlu0 %9820  ;;  %v9819_v54 = vpop.permute.xlu1 %9818 }
 0xdfb   : > { %v13713_v1 = vpop.permute.xlu0 %9824  ;;  %v13715_v16 = vpop.permute.xlu1 %9822 }
 0xdff   : > { %v9829_v21 = vpop.permute.xlu0 %9828  ;;  %v9827_v24 = vpop.permute.xlu1 %9826 }
 0xe00   : > { %v10042_v40 = vcombine.low %v9813_v58, %v9829_v21  ;;  %v10043_v49 = vcombine.high %v9813_v58, %v9829_v21  ;;  %v9906_v15 = vcombine.low %v9811_v39, %v9827_v24  ;;  %v9907_v48 = vcombine.high %v9811_v39, %v9827_v24 }
 0xe02   : > { %v13742_v32 = vrot.slane %v10042_v40, %v13249_v4  ;;  %v13745_v61 = vrot.slane %v10043_v49, %v13249_v4  ;;  %v13752_v18 = vrot.slane %v9906_v15, %v13249_v4  ;;  %v13755_v60 = vrot.slane %v9907_v48, %v13249_v4 }
 0xe03   : > { %v9833_v44 = vpop.permute.xlu0 %9832  ;;  %v9831_v43 = vpop.permute.xlu1 %9830 }
 0xe04   : > { %v10314_v17 = vcombine.low %v9817_v50, %v9833_v44  ;;  %v10315_v31 = vcombine.high %v9817_v50, %v9833_v44  ;;  %v10178_v27 = vcombine.low %v9815_v45, %v9831_v43  ;;  %v10179_v12 = vcombine.high %v9815_v45, %v9831_v43 }
 0xe06   : > { %v13758_v42 = vrot.slane %v10314_v17, %v13249_v4  ;;  %v13761_v7 = vrot.slane %v10315_v31, %v13249_v4  ;;  %v13764_v56 = vrot.slane %v10178_v27, %v13249_v4  ;;  %v13767_v23 = vrot.slane %v10179_v12, %v13249_v4 }
 0xe07   : > { %v9837_v5 = vpop.permute.xlu0 %9836  ;;  %v9835_v52 = vpop.permute.xlu1 %9834 }
 0xe08   : > { %v10059_v63 = vcombine.high %v9821_v51, %v9837_v5  ;;  %v10058_v14 = vcombine.low %v9821_v51, %v9837_v5  ;;  %v9922_v6 = vcombine.low %v9819_v54, %v9835_v52  ;;  %v9923_v33 = vcombine.high %v9819_v54, %v9835_v52 }
 0xe0a   : > { %v13730_v25 = vrot.slane %v10059_v63, %v13249_v4  ;;  %v13733_v59 = vrot.slane %v10058_v14, %v13249_v4  ;;  %v13736_v34 = vrot.slane %v9922_v6, %v13249_v4  ;;  %v13739_v41 = vrot.slane %v9923_v33, %v13249_v4 }
 0xe0b   : > { %v13717_v28 = vpop.permute.xlu0 %9840  ;;  %v13719_v11 = vpop.permute.xlu1 %9838 }
 0xe0c   : > { %v10122_v13 = vcombine.low %v13745_v61, %v13730_v25  ;;  %v10106_v22 = vcombine.low %v13742_v32, %v13733_v59  ;;  %v9970_v62 = vcombine.low %v13752_v18, %v13736_v34  ;;  %v9986_v26 = vcombine.low %v13755_v60, %v13739_v41 }
 0xe0d   : > { %v10330_v46 = vcombine.low %v13713_v1, %v13717_v28  ;;  %v10331_v3 = vcombine.high %v13713_v1, %v13717_v28  ;;  %v10194_v24 = vcombine.low %v13715_v16, %v13719_v11  ;;  %v10195_v44 = vcombine.high %v13715_v16, %v13719_v11 }
 0xe0e   : > { %v13782_v21 = vrot.slane %v10122_v13, %v13272_v2 }
 0xe0f   : > { %v9845_v30 = vpop.permute.xlu0 %9844  ;;  %v9843_v53 = vpop.permute.xlu1 %9842  ;;  %v13821_v63 = vrot.slane %v10330_v46, %v13249_v4  ;;  %v13824_v14 = vrot.slane %v10331_v3, %v13249_v4  ;;  %v13835_v15 = vrot.slane %v10194_v24, %v13249_v4  ;;  %v13838_v48 = vrot.slane %v10195_v44, %v13249_v4 }
 0xe13   : > { %v13721_v35 = vpop.permute.xlu0 %9848  ;;  %v13723_v19 = vpop.permute.xlu1 %9846 }
 0xe17   : > { %v9853_v29 = vpop.permute.xlu0 %9852  ;;  %v9851_v57 = vpop.permute.xlu1 %9850 }
 0xe1b   : > { %v13725_v47 = vpop.permute.xlu0 %9856  ;;  %v13727_v55 = vpop.permute.xlu1 %9854 }
 0xe1f   : > { %v9861_v38 = vpop.permute.xlu0 %9860  ;;  %v9859_v37 = vpop.permute.xlu1 %9858 }
 0xe20   : > { %v10074_v8 = vcombine.low %v9845_v30, %v9861_v38  ;;  %v10075_v9 = vcombine.high %v9845_v30, %v9861_v38  ;;  %v9938_v0 = vcombine.low %v9843_v53, %v9859_v37  ;;  %v9939_v36 = vcombine.high %v9843_v53, %v9859_v37 }
 0xe22   : > { %v13789_v1 = vrot.slane %v10074_v8, %v13249_v4  ;;  %v13804_v30 = vrot.slane %v10075_v9, %v13249_v4  ;;  %v13807_v16 = vrot.slane %v9938_v0, %v13249_v4  ;;  %v13810_v11 = vrot.slane %v9939_v36, %v13249_v4 }
 0xe23   : > { %v13747_v10 = vpop.permute.xlu0 %9864  ;;  %v13749_v20 = vpop.permute.xlu1 %9862  ;;  %v10258_v36 = vcombine.low %v13767_v23, %v13838_v48 }
 0xe24   : > { %v10347_v53 = vcombine.high %v13721_v35, %v13747_v10  ;;  %v10346_v17 = vcombine.low %v13721_v35, %v13747_v10  ;;  %v10210_v31 = vcombine.low %v13723_v19, %v13749_v20  ;;  %v10211_v12 = vcombine.high %v13723_v19, %v13749_v20 }
 0xe26   : > { %v13845_v27 = vrot.slane %v10347_v53, %v13249_v4 }
 0xe27   : > { %v9869_v39 = vpop.permute.xlu0 %9868  ;;  %v9867_v58 = vpop.permute.xlu1 %9866 }
 0xe28   : > { %v10090_v50 = vcombine.low %v9853_v29, %v9869_v39  ;;  %v10091_v45 = vcombine.high %v9853_v29, %v9869_v39  ;;  %v9954_v51 = vcombine.low %v9851_v57, %v9867_v58  ;;  %v9955_v54 = vcombine.high %v9851_v57, %v9867_v58 }
 0xe29   : > { %v13815_v29 = vrot.slane %v9970_v62, %v13272_v2  ;;  %v13818_v57 = vrot.slane %v9986_v26, %v13272_v2  ;;  %v13884_v39 = vrot.slane %v10210_v31, %v13249_v4  ;;  %v13887_v58 = vrot.slane %v10211_v12, %v13249_v4 }
 0xe2a   : > { %v13792_v43 = vrot.slane %v10090_v50, %v13249_v4  ;;  %v13795_v5 = vrot.slane %v10091_v45, %v13249_v4  ;;  %v13798_v52 = vrot.slane %v9954_v51, %v13249_v4  ;;  %v13801_v28 = vrot.slane %v9955_v54, %v13249_v4 }
 0xe2b   : > { %v9873_v38 = vpop.permute.xlu0 %9872  ;;  %v9871_v37 = vpop.permute.xlu1 %9870  ;;  %v13892_v50 = vrot.slane %v10106_v22, %v13272_v2  ;;  %v10242_v45 = vcombine.low %v13764_v56, %v13835_v15  ;;  %v13897_v51 = vrot.slane %v10346_v17, %v13249_v4  ;;  %v10378_v22 = vcombine.low %v13758_v42, %v13821_v63 }
 0xe2c   : > { %v10138_v6 = vcombine.low %v13789_v1, %v13792_v43  ;;  %v10154_v33 = vcombine.low %v13804_v30, %v13795_v5  ;;  %v10002_v40 = vcombine.low %v13807_v16, %v13798_v52  ;;  %v10018_v49 = vcombine.low %v13810_v11, %v13801_v28 }
 0xe2d   : > { %v10362_v62 = vcombine.low %v13725_v47, %v9873_v38  ;;  %v10363_v26 = vcombine.high %v13725_v47, %v9873_v38  ;;  %v10226_v35 = vcombine.low %v13727_v55, %v9871_v37  ;;  %v10227_v10 = vcombine.high %v13727_v55, %v9871_v37 }
 0xe2e   : > { %v13850_v13 = vrot.slane %v10002_v40, %v13272_v2  ;;  %v13853_v8 = vrot.slane %v10018_v49, %v13272_v2  ;;  %v13860_v46 = vrot.slane %v10138_v6, %v13272_v2  ;;  %v13863_v3 = vrot.slane %v10154_v33, %v13272_v2 }
 0xe2f   : > { %v13870_v9 = vrot.slane %v10362_v62, %v13249_v4  ;;  %v13873_v47 = vrot.slane %v10363_v26, %v13249_v4  ;;  %v13876_v55 = vrot.slane %v10226_v35, %v13249_v4  ;;  %v13879_v0 = vrot.slane %v10227_v10, %v13249_v4 }
 0xe30   : > { %v10039_v19 = vcombine.high %v13818_v57, %v13853_v8  ;;  %v10035_v20 = vcombine.high %v13815_v29, %v13850_v13  ;;  %v10175_v53 = vcombine.high %v13782_v21, %v13863_v3  ;;  %v10394_v6 = vcombine.low %v13761_v7, %v13824_v14 }
 0xe31   : > { %v10426_v54 = vcombine.low %v13845_v27, %v13873_v47  ;;  %v10274_v24 = vcombine.low %v13884_v39, %v13876_v55  ;;  %v10290_v44 = vcombine.low %v13887_v58, %v13879_v0  ;;  %v10410_v4 = vcombine.low %v13897_v51, %v13870_v9 }
 0xe32   : > { %10463 = vrot.lane.b32.xlu0 %v10039_v19, %s11347_s10  ;;  %10451 = vrot.lane.b32.xlu1 %v10035_v20, %s11347_s10  ;;  %v10171_v33 = vcombine.high %v13892_v50, %v13860_v46  ;;  %v13916_v40 = vrot.slane %v10258_v36, %v13272_v2  ;;  %v10019_v49 = vcombine.high %v13810_v11, %v13801_v28 }
 0xe33   : > { %v13921_v38 = vrot.slane %v10274_v24, %v13272_v2  ;;  %v13924_v37 = vrot.slane %v10290_v44, %v13272_v2  ;;  %v13928_v17 = vrot.slane %v10242_v45, %v13272_v2  ;;  %v13931_v31 = vrot.slane %v10426_v54, %v13272_v2 }
 0xe34   : > { %v9971_v12 = vcombine.high %v13752_v18, %v13736_v34  ;;  %v13939_v11 = vrot.slane %v10394_v6, %v13272_v2  ;;  %v10003_v62 = vcombine.high %v13807_v16, %v13798_v52  ;;  %v13944_v26 = vrot.slane %v10410_v4, %v13272_v2 }
 0xe35   : > { %v10311_v28 = vcombine.high %v13916_v40, %v13924_v37  ;;  %v10307_v35 = vcombine.high %v13928_v17, %v13921_v38  ;;  %v9987_v10 = vcombine.high %v13755_v60, %v13739_v41  ;;  %v13951_v34 = vrot.slane %v10378_v22, %v13272_v2 }
 0xe36   : > { %10487 = vrot.lane.b32.xlu0 %v10175_v53, %s11347_s10  ;;  %10475 = vrot.lane.b32.xlu1 %v10171_v33, %s11347_s10  ;;  %v10155_v18 = vcombine.high %v13804_v30, %v13795_v5  ;;  %v10033_v19 = vrot.slane %v10019_v49, %v13272_v2  ;;  %v10447_v52 = vcombine.high %v13939_v11, %v13931_v31 }
 0xe37   : > { %v10038_v16 = vcombine.low %v13818_v57, %v13853_v8  ;;  %v10034_v41 = vcombine.low %v13815_v29, %v13850_v13  ;;  %v10174_v60 = vcombine.low %v13782_v21, %v13863_v3  ;;  %v10170_v5 = vcombine.low %v13892_v50, %v13860_v46 }
 0xe38   : > { %v10310_v30 = vcombine.low %v13916_v40, %v13924_v37  ;;  %v10306_v20 = vcombine.low %v13928_v17, %v13921_v38  ;;  %v10446_v36 = vcombine.low %v13939_v11, %v13931_v31  ;;  %v10139_v45 = vcombine.high %v13789_v1, %v13792_v43 }
 0xe39   : > { %v10017_v54 = vrot.slane %v10003_v62, %v13272_v2  ;;  %v10443_v24 = vcombine.high %v13951_v34, %v13944_v26  ;;  %v10442_v44 = vcombine.low %v13951_v34, %v13944_v26  ;;  %v10123_v53 = vcombine.high %v13745_v61, %v13730_v25 }
 0xe3a   : > { %10511 = vrot.lane.b32.xlu0 %v10311_v28, %s11347_s10  ;;  %10499 = vrot.lane.b32.xlu1 %v10307_v35, %s11347_s10  ;;  %v10001_v22 = vrot.slane %v9987_v10, %v13272_v2  ;;  %v10107_v6 = vcombine.high %v13742_v32, %v13733_v59  ;;  %v9985_v1 = vrot.slane %v9971_v12, %v13272_v2 }
 0xe3b   : > { %v10169_v43 = vrot.slane %v10155_v18, %v13272_v2  ;;  %v10291_v4 = vcombine.high %v13887_v58, %v13879_v0  ;;  %v10153_v49 = vrot.slane %v10139_v45, %v13272_v2  ;;  %v10275_v25 = vcombine.high %v13884_v39, %v13876_v55 }
 0xe3c   : > { %v10040_v33 = vcombine.low %v10001_v22, %v10033_v19  ;;  %v10036_v61 = vcombine.low %v9985_v1, %v10017_v54  ;;  %v10137_v28 = vrot.slane %v10123_v53, %v13272_v2  ;;  %v10259_v59 = vcombine.high %v13767_v23, %v13838_v48 }
 0xe3d   : > { %v10121_v32 = vrot.slane %v10107_v6, %v13272_v2  ;;  %v10243_v12 = vcombine.high %v13764_v56, %v13835_v15  ;;  %v10427_v0 = vcombine.high %v13845_v27, %v13873_v47  ;;  %v10305_v55 = vrot.slane %v10291_v4, %v13272_v2 }
 0xe3e   : > { %10535 = vrot.lane.b32.xlu0 %v10447_v52, %s11347_s10  ;;  %10523 = vrot.lane.b32.xlu1 %v10443_v24, %s11347_s10  ;;  %v10176_v39 = vcombine.low %v10137_v28, %v10169_v43  ;;  %v10411_v58 = vcombine.high %v13897_v51, %v13870_v9  ;;  %v10289_v23 = vrot.slane %v10275_v25, %v13272_v2 }
 0xe3f   : > { %v10172_v48 = vcombine.low %v10121_v32, %v10153_v49  ;;  %v10395_v62 = vcombine.high %v13761_v7, %v13824_v14  ;;  %v10273_v35 = vrot.slane %v10259_v59, %v13272_v2  ;;  %v10379_v56 = vcombine.high %v13758_v42, %v13821_v63 }
 0xe40   : > { %v10257_v15 = vrot.slane %v10243_v12, %v13272_v2  ;;  %v10441_v27 = vrot.slane %v10427_v0, %v13272_v2  ;;  %v10425_v47 = vrot.slane %v10411_v58, %v13272_v2  ;;  %v10041_v63 = vcombine.high %v10001_v22, %v10033_v19 }
 0xe41   : > { %v10312_v9 = vcombine.low %v10273_v35, %v10305_v55  ;;  %v10409_v10 = vrot.slane %v10395_v62, %v13272_v2  ;;  %v10393_v7 = vrot.slane %v10379_v56, %v13272_v2  ;;  %v10037_v18 = vcombine.high %v9985_v1, %v10017_v54 }
 0xe42   : > { %10467 = vrot.lane.b32.xlu0 %v10040_v33, %s11343_s4  ;;  %10455 = vrot.lane.b32.xlu1 %v10036_v61, %s11343_s4  ;;  %v10308_v51 = vcombine.low %v10257_v15, %v10289_v23  ;;  %v10177_v52 = vcombine.high %v10137_v28, %v10169_v43  ;;  %v10173_v45 = vcombine.high %v10121_v32, %v10153_v49 }
 0xe43   : > { %v10448_v14 = vcombine.low %v10409_v10, %v10441_v27  ;;  %v10444_v42 = vcombine.low %v10393_v7, %v10425_v47  ;;  %v10313_v2 = vcombine.high %v10273_v35, %v10305_v55  ;;  %v10309_v24 = vcombine.high %v10257_v15, %v10289_v23 }
 0xe44   : > { %v10449_v53 = vcombine.high %v10409_v10, %v10441_v27  ;;  %v10445_v6 = vcombine.high %v10393_v7, %v10425_v47 }
 0xe46   : > { %10491 = vrot.lane.b32.xlu0 %v10176_v39, %s11343_s4  ;;  %10479 = vrot.lane.b32.xlu1 %v10172_v48, %s11343_s4 }
 0xe4a   : > { %10515 = vrot.lane.b32.xlu0 %v10312_v9, %s11343_s4  ;;  %10503 = vrot.lane.b32.xlu1 %v10308_v51, %s11343_s4 }
 0xe4e   : > { %10539 = vrot.lane.b32.xlu0 %v10448_v14, %s11343_s4  ;;  %10527 = vrot.lane.b32.xlu1 %v10444_v42, %s11343_s4 }
 0xe52   : > { %10471 = vrot.lane.b32.xlu0 %v10041_v63, %s11331_s30  ;;  %10459 = vrot.lane.b32.xlu1 %v10037_v18, %s11331_s30 }
 0xe56   : > { %10495 = vrot.lane.b32.xlu0 %v10177_v52, %s11331_s30  ;;  %10483 = vrot.lane.b32.xlu1 %v10173_v45, %s11331_s30 }
 0xe5a   : > { %10519 = vrot.lane.b32.xlu0 %v10313_v2, %s11331_s30  ;;  %10507 = vrot.lane.b32.xlu1 %v10309_v24, %s11331_s30 }
 0xe5e   : > { %10543 = vrot.lane.b32.xlu0 %v10449_v53, %s11331_s30  ;;  %10531 = vrot.lane.b32.xlu1 %v10445_v6, %s11331_s30  ;;  %s14045_s30 = scalar_lea.vmem [#allocation10], %s10709_s9 }
 0xe5f   : > { %s10596_s1 = sshll.u32 %s14045_s30, 4  ;;  %s14096_s1 = int_to_ptr.vmem [resolvable:$true] %s10596_s1 }
 0xe60   : > { %s11217_s29 = scalar_lea.vmem %s14096_s1, 1024  ;;  %p11224_p5 = scmp.lt.s32.totalorder %s14096_s1, %s11222_s23 }
 0xe61   : > { %p11218_p4 = scmp.ne.s32.totalorder %s14096_s1, %s11217_s29  ;;  %p11225_p3 = scmp.lt.s32.totalorder %s11223_s12, %s11217_s29 }
 0xe63   : > { %p11219_p12 = pnand %p11218_p4, %p14282_p6  ;;  %p11226_p7 = por %p11225_p3, %p11224_p5 }
 0xe65   : > { %p11220_p0 = pneg %p11219_p12 }
 0xe67   : > { %p11227_p9 = pnand %p11226_p7, %p11220_p0 }
 0xea4   : > { %v10464_v19 = vpop.permute.xlu0 %10463  ;;  %v10452_v54 = vpop.permute.xlu1 %10451 }
 0xea5   : > { %v10552_v39 = vsel %vm10546_vm2, %v10038_v16, %v10464_v19  ;;  %v10547_v58 = vsel %vm10546_vm2, %v10034_v41, %v10452_v54 }
 0xea8   : > { %v10488_v22 = vpop.permute.xlu0 %10487  ;;  %v10476_v1 = vpop.permute.xlu1 %10475 }
 0xea9   : > { %v10558_v29 = vsel %vm10546_vm2, %v10174_v60, %v10488_v22  ;;  %v10555_v13 = vsel %vm10546_vm2, %v10170_v5, %v10476_v1 }
 0xeac   : > { %v10512_v43 = vpop.permute.xlu0 %10511  ;;  %v10500_v4 = vpop.permute.xlu1 %10499 }
 0xead   : > { %v10564_v46 = vsel %vm10546_vm2, %v10310_v30, %v10512_v43  ;;  %v10561_v3 = vsel %vm10546_vm2, %v10306_v20, %v10500_v4 }
 0xeb0   : > { %v10536_v33 = vpop.permute.xlu0 %10535  ;;  %v10524_v49 = vpop.permute.xlu1 %10523 }
 0xeb1   : > { %v10570_v38 = vsel %vm10546_vm2, %v10446_v36, %v10536_v33  ;;  %v10567_v37 = vsel %vm10546_vm2, %v10442_v44, %v10524_v49 }
 0xeb4   : > { %v10468_v25 = vpop.permute.xlu0 %10467  ;;  %v10456_v61 = vpop.permute.xlu1 %10455 }
 0xeb5   : > { %v10553_v23 = vsel %vm10548_vm6, %v10552_v39, %v10468_v25  ;;  %v10549_v62 = vsel %vm10548_vm6, %v10547_v58, %v10456_v61 }
 0xeb8   : > { %v10492_v28 = vpop.permute.xlu0 %10491  ;;  %v10480_v59 = vpop.permute.xlu1 %10479 }
 0xeb9   : > { %v10559_v8 = vsel %vm10548_vm6, %v10558_v29, %v10492_v28  ;;  %v10556_v41 = vsel %vm10548_vm6, %v10555_v13, %v10480_v59 }
 0xebc   : > { %v10516_v32 = vpop.permute.xlu0 %10515  ;;  %v10504_v12 = vpop.permute.xlu1 %10503 }
 0xebd   : > { %v10565_v50 = vsel %vm10548_vm6, %v10564_v46, %v10516_v32  ;;  %v10562_v5 = vsel %vm10548_vm6, %v10561_v3, %v10504_v12 }
 0xec0   : > { %v10540_v0 = vpop.permute.xlu0 %10539  ;;  %v10528_v55 = vpop.permute.xlu1 %10527 }
 0xec1   : > { %v10571_v17 = vsel %vm10548_vm6, %v10570_v38, %v10540_v0  ;;  %v10568_v20 = vsel %vm10548_vm6, %v10567_v37, %v10528_v55 }
 0xec4   : > { %v10472_v48 = vpop.permute.xlu0 %10471  ;;  %v10460_v56 = vpop.permute.xlu1 %10459 }
 0xec5   : > { %v10554_v35 = vsel %vm10550_vm7, %v10553_v23, %v10472_v48  ;;  %v10551_v57 = vsel %vm10550_vm7, %v10549_v62, %v10460_v56 }
 0xec6   : > { %10574 = vst [vmem:[%s14045_s30 + $0x8] sm:$0xff] %v10554_v35  ;;  %10573 = vst [vmem:[%s14045_s30] sm:$0xff] %v10551_v57 }
 0xec8   : > { %v10496_v16 = vpop.permute.xlu0 %10495  ;;  %v10484_v27 = vpop.permute.xlu1 %10483 }
 0xec9   : > { %v10560_v15 = vsel %vm10550_vm7, %v10559_v8, %v10496_v16  ;;  %v10557_v21 = vsel %vm10550_vm7, %v10556_v41, %v10484_v27 }
 0xeca   : > { %10576 = vst [vmem:[%s14045_s30 + $0x18] sm:$0xff] %v10560_v15  ;;  %10575 = vst [vmem:[%s14045_s30 + $0x10] sm:$0xff] %v10557_v21 }
 0xecc   : > { %v10520_v60 = vpop.permute.xlu0 %10519  ;;  %v10508_v47 = vpop.permute.xlu1 %10507 }
 0xecd   : > { %v10566_v9 = vsel %vm10550_vm7, %v10565_v50, %v10520_v60  ;;  %v10563_v40 = vsel %vm10550_vm7, %v10562_v5, %v10508_v47 }
 0xece   : > { %10578 = vst [vmem:[%s14045_s30 + $0x28] sm:$0xff] %v10566_v9  ;;  %10577 = vst [vmem:[%s14045_s30 + $0x20] sm:$0xff] %v10563_v40 }
 0xed0   : > { %v10544_v30 = vpop.permute.xlu0 %10543  ;;  %v10532_v10 = vpop.permute.xlu1 %10531 }
 0xed1   : > { %v10572_v51 = vsel %vm10550_vm7, %v10571_v17, %v10544_v30  ;;  %v10569_v31 = vsel %vm10550_vm7, %v10568_v20, %v10532_v10 }
 0xed2   : > { %10580 = vst [vmem:[%s14045_s30 + $0x38] sm:$0xff] %v10572_v51  ;;  %10579 = vst [vmem:[%s14045_s30 + $0x30] sm:$0xff] %v10569_v31 }
 0xed3   : > { %11230 = shalt.err (!%p11227_p9)
}
 0xed4   : > { %s11231_s20 = scalar_lea.hbm %s14094_s21, 1024  ;;  %s11235_s13 = scalar_lea.hbm %s14147_s7, 2048 }
 0xed5   : > { %p11232_p13 = scmp.ne.s32.totalorder %s14094_s21, %s11231_s20  ;;  %p11236_p10 = scmp.lt.s32.totalorder %s14094_s21, %s14147_s7 }
 0xed6   : > { %p11237_p11 = scmp.lt.s32.totalorder %s11235_s13, %s11231_s20 }
 0xed7   : > { %p11233_p1 = pnand %p11232_p13, %p14282_p6 }
 0xed8   : > { %p11238_p2 = por %p11237_p11, %p11236_p10 }
 0xed9   : > { %p11234_p8 = pneg %p11233_p1 }
 0xedb   : > { %p11239_p4 = pnand %p11238_p2, %p11234_p8 }
 0xedd   : > { %11242 = shalt.err (!%p11239_p4)
}
 0xede   : > { %10943 = dma.vmem_to_hbm [thread:$0]  (%p14282_p6), %s14096_s1, 1024, %s14094_s21, %s10582_s16  }
 0xedf PF: > { %s10608_s30 = sand.u32 1, %s11277_s24   ;;  %p14283_p12 = scmp.ne.s32.totalorder %s14183_s8, 0 }
 0xee0   : > { %p14284_p0 = scmp.ge.s32.totalorder %s11289_s27, 2  ;;  %s10609_s11 = scalar_lea.sflag [#allocation4], %s10608_s30 }
 0xee2   : > { %p10960_p5 = pnand %p14284_p0, %p14283_p12 }
 0xee4   : > { %p10961_p3 = pneg %p10960_p5 }
 0xee6   : > { %11272 = dma.done.wait (%p10961_p3), %s10609_s11, 1024  }
 0xee7   : > { %11274 = vsyncadd (%p10961_p3), %s10609_s11, 4294966272  ;;  %p22_p7 = scmp.ge.s32.totalorder %s11469_s14, 4   ;;  %s14285_s24 = smov %s11281_s25 }
 0xee8   : > { %s14286_s25 = smov %s11285_s26  ;;  %s14287_s26 = smov %s11479_s17 }
 0xee9   : > { %s14288_s27 = smov %s11469_s14  ;;  %24 = sbr.rel (!%p22_p7) target bundleno = 10 (0xa), region = 121 }
 0xeee   :  { %10614 = vsyncpa [#allocation3], 1 }
 0xeef   :  { %10616 = vsyncpa [#allocation3 + $0x1], 1 }
 0xef0   :  { %10617 = vsyncpa [#allocation6], 1 }
 0xef1   :  { %10618 = vsyncpa [#allocation9], 1 }
 0xef2   :  { %10619 = vsyncpa [#allocation4], 1 }
 0xef3   :  { %10621 = vsyncpa [#allocation4 + $0x1], 1 }

</bundles_post_ra>
